<compile_context>
chip_gen: v6e
topology: v6e:2x2x1
jax: 0.10.0
libtpu: 0.0.40
codegen_flags: <defaults>
</compile_context>

<pallas_src>
import jax
import jax.numpy as jnp
import numpy as np
from jax import lax
from jax.experimental import pallas as pl
from jax.experimental.pallas import tpu as pltpu

# Matmul / streaming dtype: bf16 on real TPU (MXU + halved HBM streams); f32 elsewhere
# (the CPU executor does not support BF16 x BF16 = F32 dots).
_ON_TPU = jax.default_backend() == "tpu"
_MM_DTYPE = jnp.bfloat16 if _ON_TPU else jnp.float32


# ----------------------------------------------------------------------------
# Static tiling helpers
# ----------------------------------------------------------------------------
def _ceil_to(x, m):
    return -(-x // m) * m


def _pick_recurrence_tiles(S, Bt, H, gate_bytes, h_bytes, *, tc_target=4,
                           vmem_budget=40 * 2**20):
    """Pick (tc, bt_blk, vmem_bill) so the double-buffered pipeline fits VMEM.

    Keeps the whole Bt batch in one block (single-TC chips gain nothing from a
    split) unless the budget forces halving; reduces tc only as a last resort.
    """
    def bill(tc, blk):
        gate = 2 * 2 * tc * blk * 4 * H * gate_bytes   # 2 dirs x 2 pipeline buffers
        outs = 2 * 2 * tc * blk * H * h_bytes
        wts = 2 * 2 * H * 4 * H * gate_bytes           # 2 dirs x 2 buffers (weights)
        scr = 4 * blk * H * 4                          # f32 h/c scratch
        return gate + outs + wts + scr

    tc = min(tc_target, S)
    bt_blk = Bt
    while bill(tc, bt_blk) > vmem_budget and bt_blk % 2 == 0 and (bt_blk // 2) % 8 == 0:
        bt_blk //= 2
    while bill(tc, bt_blk) > vmem_budget and tc > 1:
        tc -= 1
    return tc, bt_blk, bill(tc, bt_blk)


def _pick_row_block(n, target=2048):
    """Row block for the FF kernel: largest multiple of 128 dividing n, <= target."""
    if n % 128 != 0:
        return n
    blk = 128
    while blk * 2 <= min(n, target) and n % (blk * 2) == 0:
        blk *= 2
    return blk


# ----------------------------------------------------------------------------
# Pallas kernels
# ----------------------------------------------------------------------------
def _bilstm_chunk_kernel(gf_ref, gb_ref, whh_f_ref, whh_b_ref,
                         hf_out_ref, hb_out_ref,
                         hf_scr, cf_scr, hb_scr, cb_scr):
    """Fused bidirectional LSTM recurrence over one chunk of timesteps.

    Inputs are pre-computed gate activations (x @ Wih + b), so per-step work is
    only the h @ Whh recurrence matmul plus the elementwise gate math.
    Grid = (batch_blocks ["parallel"], seq_chunks ["arbitrary", carried in scratch]).
    Forward chunk s and backward chunk sb-1-s are processed in the same grid step.
    """
    @pl.when(pl.program_id(1) == 0)
    def _init():
        hf_scr[...] = jnp.zeros_like(hf_scr)
        cf_scr[...] = jnp.zeros_like(cf_scr)
        hb_scr[...] = jnp.zeros_like(hb_scr)
        cb_scr[...] = jnp.zeros_like(cb_scr)

    H = hf_scr.shape[-1]          # static
    tc = gf_ref.shape[0]          # static chunk length (small, unrolled below)
    mm_dtype = whh_f_ref.dtype

    # Hoisted: recurrent weights are loaded once per grid step, reused across the
    # whole unrolled chunk for both directions.
    whh_f = whh_f_ref[...]
    whh_b = whh_b_ref[...]

    def _step(gx, h_prev, c_prev, whh):
        # Recurrence matmul on the MXU (bf16 operands, f32 accumulation on TPU).
        gates = gx.astype(jnp.float32) + jnp.dot(
            h_prev.astype(mm_dtype), whh, preferred_element_type=jnp.float32)
        # Gate slices are lane-aligned when H % 128 == 0 (PyTorch order i,f,g,o).
        i_g = jax.nn.sigmoid(gates[:, 0 * H:1 * H])
        f_g = jax.nn.sigmoid(gates[:, 1 * H:2 * H])
        g_g = jnp.tanh(gates[:, 2 * H:3 * H])
        o_g = jax.nn.sigmoid(gates[:, 3 * H:4 * H])
        c_new = f_g * c_prev + i_g * g_g          # elementwise math stays f32 (v5e)
        h_new = o_g * jnp.tanh(c_new)
        return h_new, c_new

    hf, cf = hf_scr[...], cf_scr[...]
    hb, cb = hb_scr[...], cb_scr[...]
    # tc is small (<= 4): statically unrolled, carries stay in registers.
    for i in range(tc):
        # Forward direction: local timestep i of chunk s.
        hf, cf = _step(gf_ref[i], hf, cf, whh_f)
        hf_out_ref[i] = hf.astype(hf_out_ref.dtype)
        # Backward direction: local timestep tc-1-i of chunk sb-1-s.
        j = tc - 1 - i
        hb, cb = _step(gb_ref[j], hb, cb, whh_b)
        hb_out_ref[j] = hb.astype(hb_out_ref.dtype)
    hf_scr[...], cf_scr[...] = hf, cf
    hb_scr[...], cb_scr[...] = hb, cb


def _ff_tanh_kernel(hf_ref, hb_ref, wf_ref, wb_ref, b_ref, o_ref):
    """tanh(W_f @ h_fwd^T + W_b @ h_bwd^T + b) written lane-dense as (n_out, Nblk)."""
    dn = (((1,), (1,)), ((), ()))  # contract feature dim of both operands -> (n_out, N)
    acc = (lax.dot_general(wf_ref[...], hf_ref[...], dn,
                           preferred_element_type=jnp.float32)
           + lax.dot_general(wb_ref[...], hb_ref[...], dn,
                             preferred_element_type=jnp.float32))
    o_ref[...] = jnp.tanh(acc + b_ref[...])


# ----------------------------------------------------------------------------
# Wrappers
# ----------------------------------------------------------------------------
def bilstm_recurrence(gf, gb, whh_f, whh_b, *, tc_target=4):
    """Run the fused bidirectional recurrence.

    gf / gb: (S, Bt, 4H) forward / backward gate pre-activations (bf16 on TPU).
    whh_f / whh_b: torch-layout (4H, H) float32 recurrent weights.
    Returns (h_fwd, h_bwd): each (S, Bt, H) in the streaming dtype.
    """
    S, Bt, G4 = gf.shape
    H = whh_f.shape[1]
    assert G4 == 4 * H
    h_dtype = gf.dtype
    itemsize = jnp.dtype(h_dtype).itemsize

    tc, bt_blk, vmem_bill = _pick_recurrence_tiles(S, Bt, H, itemsize, itemsize,
                                                   tc_target=tc_target)
    s_pad = _ceil_to(S, tc)
    if s_pad != S:
        # Zero gate pre-activations keep (h, c) at exactly zero: forward padded-tail
        # outputs are dropped, and the backward pass enters the last real timestep
        # with the correct all-zero initial state.
        pad = ((0, s_pad - S), (0, 0), (0, 0))
        gf = jnp.pad(gf, pad)
        gb = jnp.pad(gb, pad)
    sb = s_pad // tc
    nb = Bt // bt_blk

    whh_f_t = whh_f.T.astype(_MM_DTYPE)   # (H, 4H) MXU operand
    whh_b_t = whh_b.T.astype(_MM_DTYPE)

    gate_spec_f = pl.BlockSpec((tc, bt_blk, 4 * H), lambda b, s: (s, b, 0))
    gate_spec_b = pl.BlockSpec((tc, bt_blk, 4 * H), lambda b, s: (sb - 1 - s, b, 0))
    w_spec = pl.BlockSpec((H, 4 * H), lambda b, s: (0, 0))
    out_spec_f = pl.BlockSpec((tc, bt_blk, H), lambda b, s: (s, b, 0))
    out_spec_b = pl.BlockSpec((tc, bt_blk, H), lambda b, s: (sb - 1 - s, b, 0))

    h_fwd, h_bwd = pl.pallas_call(
        _bilstm_chunk_kernel,
        out_shape=(jax.ShapeDtypeStruct((s_pad, Bt, H), h_dtype),
                   jax.ShapeDtypeStruct((s_pad, Bt, H), h_dtype)),
        grid=(nb, sb),
        in_specs=[gate_spec_f, gate_spec_b, w_spec, w_spec],
        out_specs=(out_spec_f, out_spec_b),
        scratch_shapes=[pltpu.VMEM((bt_blk, H), jnp.float32)] * 4,
        compiler_params=pltpu.CompilerParams(
            dimension_semantics=("parallel", "arbitrary"),
            vmem_limit_bytes=int(min(64 * 2**20, max(32 * 2**20, 2 * vmem_bill)))),
    )(gf, gb, whh_f_t, whh_b_t)
    if s_pad != S:
        h_fwd = h_fwd[:S]
        h_bwd = h_bwd[:S]
    return h_fwd, h_bwd


def ff_tanh_lane_dense(h_fwd, h_bwd, w_ff, b_ff):
    """Final Linear(2H -> n_out) + tanh with lane-dense (n_out, N) output."""
    N, H = h_fwd.shape
    n_out = w_ff.shape[0]
    n_pad = _ceil_to(N, 128)
    if n_pad != N:  # keep the output lane-dense even for non-128-aligned row counts
        pad = ((0, n_pad - N), (0, 0))
        h_fwd = jnp.pad(h_fwd, pad)
        h_bwd = jnp.pad(h_bwd, pad)
    nblk = _pick_row_block(n_pad, target=2048)
    out = pl.pallas_call(
        _ff_tanh_kernel,
        out_shape=jax.ShapeDtypeStruct((n_out, n_pad), jnp.float32),
        grid=(n_pad // nblk,),
        in_specs=[
            pl.BlockSpec((nblk, H), lambda i: (i, 0)),
            pl.BlockSpec((nblk, H), lambda i: (i, 0)),
            pl.BlockSpec((n_out, H), lambda i: (0, 0)),
            pl.BlockSpec((n_out, H), lambda i: (0, 0)),
            pl.BlockSpec((n_out, 1), lambda i: (0, 0)),
        ],
        out_specs=pl.BlockSpec((n_out, nblk), lambda i: (0, i)),
        compiler_params=pltpu.CompilerParams(dimension_semantics=("parallel",)),
    )(h_fwd, h_bwd,
      w_ff[:, :H].astype(h_fwd.dtype), w_ff[:, H:].astype(h_fwd.dtype),
      b_ff.reshape(n_out, 1))
    return out[:, :N] if n_pad != N else out


def ftjnf_forward(x, params):
    """FTJNF forward: [B, C, F, T] float32 -> [B, 2, F, T] float32 (CRM mask, tanh)."""
    B, C, F, T = x.shape
    H1 = params["lstm1"][0][1].shape[1]
    H2 = params["lstm2"][0][1].shape[1]
    mm, f32 = _MM_DTYPE, jnp.float32

    # ---------------- Stage 1: frequency-direction BiLSTM ----------------
    (w1f_ih, w1f_hh, b1f_i, b1f_h), (w1b_ih, w1b_hh, b1b_i, b1b_h) = params["lstm1"]
    xq = x.astype(mm)
    # Input projections of both directions hoisted out of the recurrence (one large
    # GEMM each); the [B,C,F,T] -> (F,B,T,.) permute is folded into the einsum.
    g1f = (jnp.einsum("bcft,cg->fbtg", xq, w1f_ih.T.astype(mm),
                      preferred_element_type=f32) + (b1f_i + b1f_h)).astype(mm)
    g1b = (jnp.einsum("bcft,cg->fbtg", xq, w1b_ih.T.astype(mm),
                      preferred_element_type=f32) + (b1b_i + b1b_h)).astype(mm)
    g1f = g1f.reshape(F, B * T, 4 * H1)
    g1b = g1b.reshape(F, B * T, 4 * H1)
    h1f, h1b = bilstm_recurrence(g1f, g1b, w1f_hh, w1b_hh)   # (F, B*T, H1) x2

    # ---------------- Stage 2: time-direction BiLSTM ----------------
    (w2f_ih, w2f_hh, b2f_i, b2f_h), (w2b_ih, w2b_hh, b2b_i, b2b_h) = params["lstm2"]
    h1f4 = h1f.reshape(F, B, T, H1)
    h1b4 = h1b.reshape(F, B, T, H1)

    def proj2(wih, bih, bhh):
        # Split the (4H2, 2H1) input weights into the halves acting on h1_fwd / h1_bwd
        # so the [h_fwd, h_bwd] concat never materializes; the (F,B,T,.) -> (T,B,F,.)
        # permute is folded into the einsum output layout.
        wf = wih[:, :H1].T.astype(mm)
        wb = wih[:, H1:].T.astype(mm)
        g = (jnp.einsum("fbth,hg->tbfg", h1f4, wf, preferred_element_type=f32)
             + jnp.einsum("fbth,hg->tbfg", h1b4, wb, preferred_element_type=f32)
             + (bih + bhh)).astype(mm)
        return g.reshape(T, B * F, 4 * H2)

    g2f = proj2(w2f_ih, b2f_i, b2f_h)
    g2b = proj2(w2b_ih, b2b_i, b2b_h)
    h2f, h2b = bilstm_recurrence(g2f, g2b, w2f_hh, w2b_hh)   # (T, B*F, H2) x2

    # ---------------- FF + tanh (CRM mask) ----------------
    w_ff, b_ff = params["ff"]
    out2n = ff_tanh_lane_dense(h2f.reshape(T * B * F, H2),
                               h2b.reshape(T * B * F, H2), w_ff, b_ff)   # (2, T*B*F)
    out = out2n.reshape(2, T, B, F).transpose(2, 0, 3, 1)                # [B, 2, F, T]
    return out


# ----------------------------------------------------------------------------
# Deterministic parameter init (PyTorch-style shapes, U(-1/sqrt(H), 1/sqrt(H)))
# ----------------------------------------------------------------------------
def init_bilstm_params(key, input_size, hidden):
    k = 1.0 / np.sqrt(hidden)
    keys = jax.random.split(key, 8)
    u = lambda kk, shape: jax.random.uniform(kk, shape, jnp.float32, -k, k)
    params = []
    for d in range(2):
        wih = u(keys[4 * d + 0], (4 * hidden, input_size))
        whh = u(keys[4 * d + 1], (4 * hidden, hidden))
        bih = u(keys[4 * d + 2], (4 * hidden,))
        bhh = u(keys[4 * d + 3], (4 * hidden,))
        params.append((wih, whh, bih, bhh))
    return params


def init_params(key, n_channels, h1, h2, out_features=2):
    k1, k2, k3, k4 = jax.random.split(key, 4)
    lstm1_in = 2 * n_channels
    kf = 1.0 / np.sqrt(2 * h2)
    return {
        "lstm1": init_bilstm_params(k1, lstm1_in, h1),
        "lstm2": init_bilstm_params(k2, 2 * h1, h2),
        "ff": (
            jax.random.uniform(k3, (out_features, 2 * h2), jnp.float32, -kf, kf),
            jax.random.uniform(k4, (out_features,), jnp.float32, -kf, kf),
        ),
    }


# ----------------------------------------------------------------------------
# Pure-JAX reference (torch.nn.LSTM / Linear semantics, mirroring the kernel's
# streaming / matmul dtype choices so the tolerance check is robust).
# ----------------------------------------------------------------------------
def _lstm_ref_dir(x, wih, whh, bih, bhh, reverse):
    S, Bt, D = x.shape
    H = whh.shape[1]
    mm = _MM_DTYPE
    gx = (jnp.dot(x.reshape(S * Bt, D).astype(mm), wih.T.astype(mm),
                  preferred_element_type=jnp.float32)
          + (bih + bhh)).astype(mm).reshape(S, Bt, 4 * H)
    whh_m = whh.T.astype(mm)

    def step(carry, g_x):
        h, c = carry
        g = g_x.astype(jnp.float32) + jnp.dot(h.astype(mm), whh_m,
                                              preferred_element_type=jnp.float32)
        i = jax.nn.sigmoid(g[:, :H])
        f = jax.nn.sigmoid(g[:, H:2 * H])
        gg = jnp.tanh(g[:, 2 * H:3 * H])
        o = jax.nn.sigmoid(g[:, 3 * H:])
        c = f * c + i * gg
        h = o * jnp.tanh(c)
        return (h, c), h.astype(mm)

    gxs = gx[::-1] if reverse else gx
    init = (jnp.zeros((Bt, H), jnp.float32), jnp.zeros((Bt, H), jnp.float32))
    _, hs = lax.scan(step, init, gxs)
    return hs[::-1] if reverse else hs


def _bilstm_ref(x, dir_params):
    fwd = _lstm_ref_dir(x, *dir_params[0], reverse=False)
    bwd = _lstm_ref_dir(x, *dir_params[1], reverse=True)
    return jnp.concatenate([fwd, bwd], axis=-1)


def ftjnf_ref(x, params):
    B, C, F, T = x.shape
    H1 = params["lstm1"][0][1].shape[1]
    H2 = params["lstm2"][0][1].shape[1]
    mm = _MM_DTYPE
    x1 = jnp.transpose(x, (2, 0, 3, 1)).reshape(F, B * T, C)
    h1 = _bilstm_ref(x1, params["lstm1"])
    x2 = h1.reshape(F, B, T, 2 * H1).transpose(2, 1, 0, 3).reshape(T, B * F, 2 * H1)
    h2 = _bilstm_ref(x2, params["lstm2"])
    w_ff, b_ff = params["ff"]
    out = jnp.tanh(
        jnp.dot(h2.reshape(T * B * F, 2 * H2).astype(mm), w_ff.T.astype(mm),
                preferred_element_type=jnp.float32) + b_ff)
    return out.reshape(T, B, F, 2).transpose(1, 3, 2, 0)


# ----------------------------------------------------------------------------
if __name__ == "__main__":
    # Small shapes: n_channels=2 -> CHANNEL dim = 4, B=2, F=8, T=8; hidden sizes are
    # 128 so gate blocks and h tiles are exactly 128-lane aligned.
    B, n_channels, F, T = 2, 2, 8, 8
    H1, H2 = 128, 128
    C = 2 * n_channels

    key = jax.random.PRNGKey(0)
    kx, kp, kx2 = jax.random.split(key, 3)
    x = jax.random.normal(kx, (B, C, F, T), jnp.float32)
    params = init_params(kp, n_channels, H1, H2)

    fwd = jax.jit(ftjnf_forward)
    ref_fn = jax.jit(ftjnf_ref)

    out = jax.block_until_ready(fwd(x, params))
    assert out.shape == (B, 2, F, T), out.shape
    ref = jax.block_until_ready(ref_fn(x, params))
    np.testing.assert_allclose(np.asarray(out), np.asarray(ref), atol=1e-2, rtol=1e-2)

    # Second config exercises the padding paths (prime F, non-128-aligned FF rows).
    B2, F2, T2 = 2, 7, 5
    x2 = jax.random.normal(kx2, (B2, C, F2, T2), jnp.float32)
    out2 = jax.block_until_ready(fwd(x2, params))
    assert out2.shape == (B2, 2, F2, T2), out2.shape
    ref2 = jax.block_until_ready(ref_fn(x2, params))
    np.testing.assert_allclose(np.asarray(out2), np.asarray(ref2), atol=1e-2, rtol=1e-2)

    print("KERNEL_OK")
</pallas_src>

<mosaic_0001>
module attributes {stable_mosaic.version = 11 : i64} {
  func.func @_bilstm_chunk_kernel(%arg0: i32, %arg1: i32, %arg2: memref<4x16x512xf32, #tpu.memory_space<vmem>>, %arg3: memref<4x16x512xf32, #tpu.memory_space<vmem>>, %arg4: memref<128x512xf32, #tpu.memory_space<vmem>>, %arg5: memref<128x512xf32, #tpu.memory_space<vmem>>, %arg6: memref<4x16x128xf32, #tpu.memory_space<vmem>>, %arg7: memref<4x16x128xf32, #tpu.memory_space<vmem>>, %arg8: memref<16x128xf32, #tpu.memory_space<vmem>>, %arg9: memref<16x128xf32, #tpu.memory_space<vmem>>, %arg10: memref<16x128xf32, #tpu.memory_space<vmem>>, %arg11: memref<16x128xf32, #tpu.memory_space<vmem>>) attributes {dimension_semantics = [#tpu.dimension_semantics<parallel>, #tpu.dimension_semantics<arbitrary>], iteration_bounds = array<i64: 1, 2>, scalar_prefetch = 0 : i64, scratch_operands = 4 : i64, tpu.core_type = #tpu.core_type<tc>, window_params = [{transform_indices = @transform_0, window_bounds = array<i64: 4, 16, 512>}, {transform_indices = @transform_1, window_bounds = array<i64: 4, 16, 512>}, {pipeline_mode = #tpu.pipeline_mode<synchronous>, transform_indices = @transform_2, window_bounds = array<i64: 128, 512>}, {pipeline_mode = #tpu.pipeline_mode<synchronous>, transform_indices = @transform_3, window_bounds = array<i64: 128, 512>}, {transform_indices = @transform_4, window_bounds = array<i64: 4, 16, 128>}, {transform_indices = @transform_5, window_bounds = array<i64: 4, 16, 128>}]} {
    %c0_i32 = arith.constant 0 : i32
    %0 = arith.cmpi eq, %arg1, %c0_i32 : i32
    %1 = arith.extui %0 : i1 to i32
    %c0_i32_0 = arith.constant 0 : i32
    %2 = arith.cmpi ne, %1, %c0_i32_0 : i32
    scf.if %2 {
      %cst_96 = arith.constant 0.000000e+00 : f32
      %269 = vector.broadcast %cst_96 : f32 to vector<16x128xf32>
      %c0_97 = arith.constant 0 : index
      %c0_98 = arith.constant 0 : index
      %270 = vector.load %arg8[%c0_97, %c0_98] : memref<16x128xf32, #tpu.memory_space<vmem>>, vector<16x128xf32>
      tpu.vector_store %arg8[%c0_97, %c0_98], %269 {strides = array<i32>} : memref<16x128xf32, #tpu.memory_space<vmem>>, vector<16x128xf32>,
      %cst_99 = arith.constant 0.000000e+00 : f32
      %271 = vector.broadcast %cst_99 : f32 to vector<16x128xf32>
      %c0_100 = arith.constant 0 : index
      %c0_101 = arith.constant 0 : index
      %272 = vector.load %arg9[%c0_100, %c0_101] : memref<16x128xf32, #tpu.memory_space<vmem>>, vector<16x128xf32>
      tpu.vector_store %arg9[%c0_100, %c0_101], %271 {strides = array<i32>} : memref<16x128xf32, #tpu.memory_space<vmem>>, vector<16x128xf32>,
      %cst_102 = arith.constant 0.000000e+00 : f32
      %273 = vector.broadcast %cst_102 : f32 to vector<16x128xf32>
      %c0_103 = arith.constant 0 : index
      %c0_104 = arith.constant 0 : index
      %274 = vector.load %arg10[%c0_103, %c0_104] : memref<16x128xf32, #tpu.memory_space<vmem>>, vector<16x128xf32>
      tpu.vector_store %arg10[%c0_103, %c0_104], %273 {strides = array<i32>} : memref<16x128xf32, #tpu.memory_space<vmem>>, vector<16x128xf32>,
      %cst_105 = arith.constant 0.000000e+00 : f32
      %275 = vector.broadcast %cst_105 : f32 to vector<16x128xf32>
      %c0_106 = arith.constant 0 : index
      %c0_107 = arith.constant 0 : index
      %276 = vector.load %arg11[%c0_106, %c0_107] : memref<16x128xf32, #tpu.memory_space<vmem>>, vector<16x128xf32>
      tpu.vector_store %arg11[%c0_106, %c0_107], %275 {strides = array<i32>} : memref<16x128xf32, #tpu.memory_space<vmem>>, vector<16x128xf32>,
    } else {
    }
    %c0 = arith.constant 0 : index
    %c0_1 = arith.constant 0 : index
    %3 = vector.load %arg4[%c0, %c0_1] : memref<128x512xf32, #tpu.memory_space<vmem>>, vector<128x512xf32>
    %c0_2 = arith.constant 0 : index
    %c0_3 = arith.constant 0 : index
    %4 = vector.load %arg5[%c0_2, %c0_3] : memref<128x512xf32, #tpu.memory_space<vmem>>, vector<128x512xf32>
    %c0_4 = arith.constant 0 : index
    %c0_5 = arith.constant 0 : index
    %5 = vector.load %arg8[%c0_4, %c0_5] : memref<16x128xf32, #tpu.memory_space<vmem>>, vector<16x128xf32>
    %c0_6 = arith.constant 0 : index
    %c0_7 = arith.constant 0 : index
    %6 = vector.load %arg9[%c0_6, %c0_7] : memref<16x128xf32, #tpu.memory_space<vmem>>, vector<16x128xf32>
    %c0_8 = arith.constant 0 : index
    %c0_9 = arith.constant 0 : index
    %7 = vector.load %arg10[%c0_8, %c0_9] : memref<16x128xf32, #tpu.memory_space<vmem>>, vector<16x128xf32>
    %c0_10 = arith.constant 0 : index
    %c0_11 = arith.constant 0 : index
    %8 = vector.load %arg11[%c0_10, %c0_11] : memref<16x128xf32, #tpu.memory_space<vmem>>, vector<16x128xf32>
    %c0_12 = arith.constant 0 : index
    %c0_13 = arith.constant 0 : index
    %c0_14 = arith.constant 0 : index
    %9 = vector.load %arg2[%c0_12, %c0_13, %c0_14] : memref<4x16x512xf32, #tpu.memory_space<vmem>>, vector<1x16x512xf32>
    %10 = vector.shape_cast %9 : vector<1x16x512xf32> to vector<16x512xf32>
    %cst = arith.constant dense<0.000000e+00> : vector<16x512xf32>
    %11 = tpu.matmul %5, %3, %cst {dimension_numbers = #tpu.dot_dimension_numbers<[1], [0], [0], [1], [0, 0, 1, 1], [], []>} : vector<16x128xf32>, vector<128x512xf32>, vector<16x512xf32> -> vector<16x512xf32>
    %12 = arith.addf %10, %11 : vector<16x512xf32>
    %13 = vector.extract_strided_slice %12 {offsets = [0, 0], sizes = [16, 128], strides = [1, 1]} : vector<16x512xf32> to vector<16x128xf32>
    %14 = arith.negf %13 : vector<16x128xf32>
    %15 = math.exp %14 : vector<16x128xf32>
    %cst_15 = arith.constant 1.000000e+00 : f32
    %16 = vector.broadcast %cst_15 : f32 to vector<16x128xf32>
    %17 = arith.addf %16, %15 : vector<16x128xf32>
    %18 = arith.divf %16, %17 : vector<16x128xf32>
    %19 = vector.extract_strided_slice %12 {offsets = [0, 128], sizes = [16, 128], strides = [1, 1]} : vector<16x512xf32> to vector<16x128xf32>
    %20 = arith.negf %19 : vector<16x128xf32>
    %21 = math.exp %20 : vector<16x128xf32>
    %cst_16 = arith.constant 1.000000e+00 : f32
    %22 = vector.broadcast %cst_16 : f32 to vector<16x128xf32>
    %23 = arith.addf %22, %21 : vector<16x128xf32>
    %24 = arith.divf %22, %23 : vector<16x128xf32>
    %25 = vector.extract_strided_slice %12 {offsets = [0, 256], sizes = [16, 128], strides = [1, 1]} : vector<16x512xf32> to vector<16x128xf32>
    %26 = math.tanh %25 : vector<16x128xf32>
    %27 = vector.extract_strided_slice %12 {offsets = [0, 384], sizes = [16, 128], strides = [1, 1]} : vector<16x512xf32> to vector<16x128xf32>
    %28 = arith.negf %27 : vector<16x128xf32>
    %29 = math.exp %28 : vector<16x128xf32>
    %cst_17 = arith.constant 1.000000e+00 : f32
    %30 = vector.broadcast %cst_17 : f32 to vector<16x128xf32>
    %31 = arith.addf %30, %29 : vector<16x128xf32>
    %32 = arith.divf %30, %31 : vector<16x128xf32>
    %33 = arith.mulf %24, %6 : vector<16x128xf32>
    %34 = arith.mulf %18, %26 : vector<16x128xf32>
    %35 = arith.addf %33, %34 : vector<16x128xf32>
    %36 = math.tanh %35 : vector<16x128xf32>
    %37 = arith.mulf %32, %36 : vector<16x128xf32>
    %c0_18 = arith.constant 0 : index
    %c0_19 = arith.constant 0 : index
    %c0_20 = arith.constant 0 : index
    %38 = vector.load %arg6[%c0_18, %c0_19, %c0_20] : memref<4x16x128xf32, #tpu.memory_space<vmem>>, vector<1x16x128xf32>
    %39 = vector.shape_cast %38 : vector<1x16x128xf32> to vector<16x128xf32>
    %40 = vector.shape_cast %37 : vector<16x128xf32> to vector<1x16x128xf32>
    tpu.vector_store %arg6[%c0_18, %c0_19, %c0_20], %40 {strides = array<i32>} : memref<4x16x128xf32, #tpu.memory_space<vmem>>, vector<1x16x128xf32>,
    %c3 = arith.constant 3 : index
    %c0_21 = arith.constant 0 : index
    %c0_22 = arith.constant 0 : index
    %41 = vector.load %arg3[%c3, %c0_21, %c0_22] : memref<4x16x512xf32, #tpu.memory_space<vmem>>, vector<1x16x512xf32>
    %42 = vector.shape_cast %41 : vector<1x16x512xf32> to vector<16x512xf32>
    %cst_23 = arith.constant dense<0.000000e+00> : vector<16x512xf32>
    %43 = tpu.matmul %7, %4, %cst_23 {dimension_numbers = #tpu.dot_dimension_numbers<[1], [0], [0], [1], [0, 0, 1, 1], [], []>} : vector<16x128xf32>, vector<128x512xf32>, vector<16x512xf32> -> vector<16x512xf32>
    %44 = arith.addf %42, %43 : vector<16x512xf32>
    %45 = vector.extract_strided_slice %44 {offsets = [0, 0], sizes = [16, 128], strides = [1, 1]} : vector<16x512xf32> to vector<16x128xf32>
    %46 = arith.negf %45 : vector<16x128xf32>
    %47 = math.exp %46 : vector<16x128xf32>
    %cst_24 = arith.constant 1.000000e+00 : f32
    %48 = vector.broadcast %cst_24 : f32 to vector<16x128xf32>
    %49 = arith.addf %48, %47 : vector<16x128xf32>
    %50 = arith.divf %48, %49 : vector<16x128xf32>
    %51 = vector.extract_strided_slice %44 {offsets = [0, 128], sizes = [16, 128], strides = [1, 1]} : vector<16x512xf32> to vector<16x128xf32>
    %52 = arith.negf %51 : vector<16x128xf32>
    %53 = math.exp %52 : vector<16x128xf32>
    %cst_25 = arith.constant 1.000000e+00 : f32
    %54 = vector.broadcast %cst_25 : f32 to vector<16x128xf32>
    %55 = arith.addf %54, %53 : vector<16x128xf32>
    %56 = arith.divf %54, %55 : vector<16x128xf32>
    %57 = vector.extract_strided_slice %44 {offsets = [0, 256], sizes = [16, 128], strides = [1, 1]} : vector<16x512xf32> to vector<16x128xf32>
    %58 = math.tanh %57 : vector<16x128xf32>
    %59 = vector.extract_strided_slice %44 {offsets = [0, 384], sizes = [16, 128], strides = [1, 1]} : vector<16x512xf32> to vector<16x128xf32>
    %60 = arith.negf %59 : vector<16x128xf32>
    %61 = math.exp %60 : vector<16x128xf32>
    %cst_26 = arith.constant 1.000000e+00 : f32
    %62 = vector.broadcast %cst_26 : f32 to vector<16x128xf32>
    %63 = arith.addf %62, %61 : vector<16x128xf32>
    %64 = arith.divf %62, %63 : vector<16x128xf32>
    %65 = arith.mulf %56, %8 : vector<16x128xf32>
    %66 = arith.mulf %50, %58 : vector<16x128xf32>
    %67 = arith.addf %65, %66 : vector<16x128xf32>
    %68 = math.tanh %67 : vector<16x128xf32>
    %69 = arith.mulf %64, %68 : vector<16x128xf32>
    %c3_27 = arith.constant 3 : index
    %c0_28 = arith.constant 0 : index
    %c0_29 = arith.constant 0 : index
    %70 = vector.load %arg7[%c3_27, %c0_28, %c0_29] : memref<4x16x128xf32, #tpu.memory_space<vmem>>, vector<1x16x128xf32>
    %71 = vector.shape_cast %70 : vector<1x16x128xf32> to vector<16x128xf32>
    %72 = vector.shape_cast %69 : vector<16x128xf32> to vector<1x16x128xf32>
    tpu.vector_store %arg7[%c3_27, %c0_28, %c0_29], %72 {strides = array<i32>} : memref<4x16x128xf32, #tpu.memory_space<vmem>>, vector<1x16x128xf32>,
    %c1 = arith.constant 1 : index
    %c0_30 = arith.constant 0 : index
    %c0_31 = arith.constant 0 : index
    %73 = vector.load %arg2[%c1, %c0_30, %c0_31] : memref<4x16x512xf32, #tpu.memory_space<vmem>>, vector<1x16x512xf32>
    %74 = vector.shape_cast %73 : vector<1x16x512xf32> to vector<16x512xf32>
    %cst_32 = arith.constant dense<0.000000e+00> : vector<16x512xf32>
    %75 = tpu.matmul %37, %3, %cst_32 {dimension_numbers = #tpu.dot_dimension_numbers<[1], [0], [0], [1], [0, 0, 1, 1], [], []>} : vector<16x128xf32>, vector<128x512xf32>, vector<16x512xf32> -> vector<16x512xf32>
    %76 = arith.addf %74, %75 : vector<16x512xf32>
    %77 = vector.extract_strided_slice %76 {offsets = [0, 0], sizes = [16, 128], strides = [1, 1]} : vector<16x512xf32> to vector<16x128xf32>
    %78 = arith.negf %77 : vector<16x128xf32>
    %79 = math.exp %78 : vector<16x128xf32>
    %cst_33 = arith.constant 1.000000e+00 : f32
    %80 = vector.broadcast %cst_33 : f32 to vector<16x128xf32>
    %81 = arith.addf %80, %79 : vector<16x128xf32>
    %82 = arith.divf %80, %81 : vector<16x128xf32>
    %83 = vector.extract_strided_slice %76 {offsets = [0, 128], sizes = [16, 128], strides = [1, 1]} : vector<16x512xf32> to vector<16x128xf32>
    %84 = arith.negf %83 : vector<16x128xf32>
    %85 = math.exp %84 : vector<16x128xf32>
    %cst_34 = arith.constant 1.000000e+00 : f32
    %86 = vector.broadcast %cst_34 : f32 to vector<16x128xf32>
    %87 = arith.addf %86, %85 : vector<16x128xf32>
    %88 = arith.divf %86, %87 : vector<16x128xf32>
    %89 = vector.extract_strided_slice %76 {offsets = [0, 256], sizes = [16, 128], strides = [1, 1]} : vector<16x512xf32> to vector<16x128xf32>
    %90 = math.tanh %89 : vector<16x128xf32>
    %91 = vector.extract_strided_slice %76 {offsets = [0, 384], sizes = [16, 128], strides = [1, 1]} : vector<16x512xf32> to vector<16x128xf32>
    %92 = arith.negf %91 : vector<16x128xf32>
    %93 = math.exp %92 : vector<16x128xf32>
    %cst_35 = arith.constant 1.000000e+00 : f32
    %94 = vector.broadcast %cst_35 : f32 to vector<16x128xf32>
    %95 = arith.addf %94, %93 : vector<16x128xf32>
    %96 = arith.divf %94, %95 : vector<16x128xf32>
    %97 = arith.mulf %88, %35 : vector<16x128xf32>
    %98 = arith.mulf %82, %90 : vector<16x128xf32>
    %99 = arith.addf %97, %98 : vector<16x128xf32>
    %100 = math.tanh %99 : vector<16x128xf32>
    %101 = arith.mulf %96, %100 : vector<16x128xf32>
    %c1_36 = arith.constant 1 : index
    %c0_37 = arith.constant 0 : index
    %c0_38 = arith.constant 0 : index
    %102 = vector.load %arg6[%c1_36, %c0_37, %c0_38] : memref<4x16x128xf32, #tpu.memory_space<vmem>>, vector<1x16x128xf32>
    %103 = vector.shape_cast %102 : vector<1x16x128xf32> to vector<16x128xf32>
    %104 = vector.shape_cast %101 : vector<16x128xf32> to vector<1x16x128xf32>
    tpu.vector_store %arg6[%c1_36, %c0_37, %c0_38], %104 {strides = array<i32>} : memref<4x16x128xf32, #tpu.memory_space<vmem>>, vector<1x16x128xf32>,
    %c2 = arith.constant 2 : index
    %c0_39 = arith.constant 0 : index
    %c0_40 = arith.constant 0 : index
    %105 = vector.load %arg3[%c2, %c0_39, %c0_40] : memref<4x16x512xf32, #tpu.memory_space<vmem>>, vector<1x16x512xf32>
    %106 = vector.shape_cast %105 : vector<1x16x512xf32> to vector<16x512xf32>
    %cst_41 = arith.constant dense<0.000000e+00> : vector<16x512xf32>
    %107 = tpu.matmul %69, %4, %cst_41 {dimension_numbers = #tpu.dot_dimension_numbers<[1], [0], [0], [1], [0, 0, 1, 1], [], []>} : vector<16x128xf32>, vector<128x512xf32>, vector<16x512xf32> -> vector<16x512xf32>
    %108 = arith.addf %106, %107 : vector<16x512xf32>
    %109 = vector.extract_strided_slice %108 {offsets = [0, 0], sizes = [16, 128], strides = [1, 1]} : vector<16x512xf32> to vector<16x128xf32>
    %110 = arith.negf %109 : vector<16x128xf32>
    %111 = math.exp %110 : vector<16x128xf32>
    %cst_42 = arith.constant 1.000000e+00 : f32
    %112 = vector.broadcast %cst_42 : f32 to vector<16x128xf32>
    %113 = arith.addf %112, %111 : vector<16x128xf32>
    %114 = arith.divf %112, %113 : vector<16x128xf32>
    %115 = vector.extract_strided_slice %108 {offsets = [0, 128], sizes = [16, 128], strides = [1, 1]} : vector<16x512xf32> to vector<16x128xf32>
    %116 = arith.negf %115 : vector<16x128xf32>
    %117 = math.exp %116 : vector<16x128xf32>
    %cst_43 = arith.constant 1.000000e+00 : f32
    %118 = vector.broadcast %cst_43 : f32 to vector<16x128xf32>
    %119 = arith.addf %118, %117 : vector<16x128xf32>
    %120 = arith.divf %118, %119 : vector<16x128xf32>
    %121 = vector.extract_strided_slice %108 {offsets = [0, 256], sizes = [16, 128], strides = [1, 1]} : vector<16x512xf32> to vector<16x128xf32>
    %122 = math.tanh %121 : vector<16x128xf32>
    %123 = vector.extract_strided_slice %108 {offsets = [0, 384], sizes = [16, 128], strides = [1, 1]} : vector<16x512xf32> to vector<16x128xf32>
    %124 = arith.negf %123 : vector<16x128xf32>
    %125 = math.exp %124 : vector<16x128xf32>
    %cst_44 = arith.constant 1.000000e+00 : f32
    %126 = vector.broadcast %cst_44 : f32 to vector<16x128xf32>
    %127 = arith.addf %126, %125 : vector<16x128xf32>
    %128 = arith.divf %126, %127 : vector<16x128xf32>
    %129 = arith.mulf %120, %67 : vector<16x128xf32>
    %130 = arith.mulf %114, %122 : vector<16x128xf32>
    %131 = arith.addf %129, %130 : vector<16x128xf32>
    %132 = math.tanh %131 : vector<16x128xf32>
    %133 = arith.mulf %128, %132 : vector<16x128xf32>
    %c2_45 = arith.constant 2 : index
    %c0_46 = arith.constant 0 : index
    %c0_47 = arith.constant 0 : index
    %134 = vector.load %arg7[%c2_45, %c0_46, %c0_47] : memref<4x16x128xf32, #tpu.memory_space<vmem>>, vector<1x16x128xf32>
    %135 = vector.shape_cast %134 : vector<1x16x128xf32> to vector<16x128xf32>
    %136 = vector.shape_cast %133 : vector<16x128xf32> to vector<1x16x128xf32>
    tpu.vector_store %arg7[%c2_45, %c0_46, %c0_47], %136 {strides = array<i32>} : memref<4x16x128xf32, #tpu.memory_space<vmem>>, vector<1x16x128xf32>,
    %c2_48 = arith.constant 2 : index
    %c0_49 = arith.constant 0 : index
    %c0_50 = arith.constant 0 : index
    %137 = vector.load %arg2[%c2_48, %c0_49, %c0_50] : memref<4x16x512xf32, #tpu.memory_space<vmem>>, vector<1x16x512xf32>
    %138 = vector.shape_cast %137 : vector<1x16x512xf32> to vector<16x512xf32>
    %cst_51 = arith.constant dense<0.000000e+00> : vector<16x512xf32>
    %139 = tpu.matmul %101, %3, %cst_51 {dimension_numbers = #tpu.dot_dimension_numbers<[1], [0], [0], [1], [0, 0, 1, 1], [], []>} : vector<16x128xf32>, vector<128x512xf32>, vector<16x512xf32> -> vector<16x512xf32>
    %140 = arith.addf %138, %139 : vector<16x512xf32>
    %141 = vector.extract_strided_slice %140 {offsets = [0, 0], sizes = [16, 128], strides = [1, 1]} : vector<16x512xf32> to vector<16x128xf32>
    %142 = arith.negf %141 : vector<16x128xf32>
    %143 = math.exp %142 : vector<16x128xf32>
    %cst_52 = arith.constant 1.000000e+00 : f32
    %144 = vector.broadcast %cst_52 : f32 to vector<16x128xf32>
    %145 = arith.addf %144, %143 : vector<16x128xf32>
    %146 = arith.divf %144, %145 : vector<16x128xf32>
    %147 = vector.extract_strided_slice %140 {offsets = [0, 128], sizes = [16, 128], strides = [1, 1]} : vector<16x512xf32> to vector<16x128xf32>
    %148 = arith.negf %147 : vector<16x128xf32>
    %149 = math.exp %148 : vector<16x128xf32>
    %cst_53 = arith.constant 1.000000e+00 : f32
    %150 = vector.broadcast %cst_53 : f32 to vector<16x128xf32>
    %151 = arith.addf %150, %149 : vector<16x128xf32>
    %152 = arith.divf %150, %151 : vector<16x128xf32>
    %153 = vector.extract_strided_slice %140 {offsets = [0, 256], sizes = [16, 128], strides = [1, 1]} : vector<16x512xf32> to vector<16x128xf32>
    %154 = math.tanh %153 : vector<16x128xf32>
    %155 = vector.extract_strided_slice %140 {offsets = [0, 384], sizes = [16, 128], strides = [1, 1]} : vector<16x512xf32> to vector<16x128xf32>
    %156 = arith.negf %155 : vector<16x128xf32>
    %157 = math.exp %156 : vector<16x128xf32>
    %cst_54 = arith.constant 1.000000e+00 : f32
    %158 = vector.broadcast %cst_54 : f32 to vector<16x128xf32>
    %159 = arith.addf %158, %157 : vector<16x128xf32>
    %160 = arith.divf %158, %159 : vector<16x128xf32>
    %161 = arith.mulf %152, %99 : vector<16x128xf32>
    %162 = arith.mulf %146, %154 : vector<16x128xf32>
    %163 = arith.addf %161, %162 : vector<16x128xf32>
    %164 = math.tanh %163 : vector<16x128xf32>
    %165 = arith.mulf %160, %164 : vector<16x128xf32>
    %c2_55 = arith.constant 2 : index
    %c0_56 = arith.constant 0 : index
    %c0_57 = arith.constant 0 : index
    %166 = vector.load %arg6[%c2_55, %c0_56, %c0_57] : memref<4x16x128xf32, #tpu.memory_space<vmem>>, vector<1x16x128xf32>
    %167 = vector.shape_cast %166 : vector<1x16x128xf32> to vector<16x128xf32>
    %168 = vector.shape_cast %165 : vector<16x128xf32> to vector<1x16x128xf32>
    tpu.vector_store %arg6[%c2_55, %c0_56, %c0_57], %168 {strides = array<i32>} : memref<4x16x128xf32, #tpu.memory_space<vmem>>, vector<1x16x128xf32>,
    %c1_58 = arith.constant 1 : index
    %c0_59 = arith.constant 0 : index
    %c0_60 = arith.constant 0 : index
    %169 = vector.load %arg3[%c1_58, %c0_59, %c0_60] : memref<4x16x512xf32, #tpu.memory_space<vmem>>, vector<1x16x512xf32>
    %170 = vector.shape_cast %169 : vector<1x16x512xf32> to vector<16x512xf32>
    %cst_61 = arith.constant dense<0.000000e+00> : vector<16x512xf32>
    %171 = tpu.matmul %133, %4, %cst_61 {dimension_numbers = #tpu.dot_dimension_numbers<[1], [0], [0], [1], [0, 0, 1, 1], [], []>} : vector<16x128xf32>, vector<128x512xf32>, vector<16x512xf32> -> vector<16x512xf32>
    %172 = arith.addf %170, %171 : vector<16x512xf32>
    %173 = vector.extract_strided_slice %172 {offsets = [0, 0], sizes = [16, 128], strides = [1, 1]} : vector<16x512xf32> to vector<16x128xf32>
    %174 = arith.negf %173 : vector<16x128xf32>
    %175 = math.exp %174 : vector<16x128xf32>
    %cst_62 = arith.constant 1.000000e+00 : f32
    %176 = vector.broadcast %cst_62 : f32 to vector<16x128xf32>
    %177 = arith.addf %176, %175 : vector<16x128xf32>
    %178 = arith.divf %176, %177 : vector<16x128xf32>
    %179 = vector.extract_strided_slice %172 {offsets = [0, 128], sizes = [16, 128], strides = [1, 1]} : vector<16x512xf32> to vector<16x128xf32>
    %180 = arith.negf %179 : vector<16x128xf32>
    %181 = math.exp %180 : vector<16x128xf32>
    %cst_63 = arith.constant 1.000000e+00 : f32
    %182 = vector.broadcast %cst_63 : f32 to vector<16x128xf32>
    %183 = arith.addf %182, %181 : vector<16x128xf32>
    %184 = arith.divf %182, %183 : vector<16x128xf32>
    %185 = vector.extract_strided_slice %172 {offsets = [0, 256], sizes = [16, 128], strides = [1, 1]} : vector<16x512xf32> to vector<16x128xf32>
    %186 = math.tanh %185 : vector<16x128xf32>
    %187 = vector.extract_strided_slice %172 {offsets = [0, 384], sizes = [16, 128], strides = [1, 1]} : vector<16x512xf32> to vector<16x128xf32>
    %188 = arith.negf %187 : vector<16x128xf32>
    %189 = math.exp %188 : vector<16x128xf32>
    %cst_64 = arith.constant 1.000000e+00 : f32
    %190 = vector.broadcast %cst_64 : f32 to vector<16x128xf32>
    %191 = arith.addf %190, %189 : vector<16x128xf32>
    %192 = arith.divf %190, %191 : vector<16x128xf32>
    %193 = arith.mulf %184, %131 : vector<16x128xf32>
    %194 = arith.mulf %178, %186 : vector<16x128xf32>
    %195 = arith.addf %193, %194 : vector<16x128xf32>
    %196 = math.tanh %195 : vector<16x128xf32>
    %197 = arith.mulf %192, %196 : vector<16x128xf32>
    %c1_65 = arith.constant 1 : index
    %c0_66 = arith.constant 0 : index
    %c0_67 = arith.constant 0 : index
    %198 = vector.load %arg7[%c1_65, %c0_66, %c0_67] : memref<4x16x128xf32, #tpu.memory_space<vmem>>, vector<1x16x128xf32>
    %199 = vector.shape_cast %198 : vector<1x16x128xf32> to vector<16x128xf32>
    %200 = vector.shape_cast %197 : vector<16x128xf32> to vector<1x16x128xf32>
    tpu.vector_store %arg7[%c1_65, %c0_66, %c0_67], %200 {strides = array<i32>} : memref<4x16x128xf32, #tpu.memory_space<vmem>>, vector<1x16x128xf32>,
    %c3_68 = arith.constant 3 : index
    %c0_69 = arith.constant 0 : index
    %c0_70 = arith.constant 0 : index
    %201 = vector.load %arg2[%c3_68, %c0_69, %c0_70] : memref<4x16x512xf32, #tpu.memory_space<vmem>>, vector<1x16x512xf32>
    %202 = vector.shape_cast %201 : vector<1x16x512xf32> to vector<16x512xf32>
    %cst_71 = arith.constant dense<0.000000e+00> : vector<16x512xf32>
    %203 = tpu.matmul %165, %3, %cst_71 {dimension_numbers = #tpu.dot_dimension_numbers<[1], [0], [0], [1], [0, 0, 1, 1], [], []>} : vector<16x128xf32>, vector<128x512xf32>, vector<16x512xf32> -> vector<16x512xf32>
    %204 = arith.addf %202, %203 : vector<16x512xf32>
    %205 = vector.extract_strided_slice %204 {offsets = [0, 0], sizes = [16, 128], strides = [1, 1]} : vector<16x512xf32> to vector<16x128xf32>
    %206 = arith.negf %205 : vector<16x128xf32>
    %207 = math.exp %206 : vector<16x128xf32>
    %cst_72 = arith.constant 1.000000e+00 : f32
    %208 = vector.broadcast %cst_72 : f32 to vector<16x128xf32>
    %209 = arith.addf %208, %207 : vector<16x128xf32>
    %210 = arith.divf %208, %209 : vector<16x128xf32>
    %211 = vector.extract_strided_slice %204 {offsets = [0, 128], sizes = [16, 128], strides = [1, 1]} : vector<16x512xf32> to vector<16x128xf32>
    %212 = arith.negf %211 : vector<16x128xf32>
    %213 = math.exp %212 : vector<16x128xf32>
    %cst_73 = arith.constant 1.000000e+00 : f32
    %214 = vector.broadcast %cst_73 : f32 to vector<16x128xf32>
    %215 = arith.addf %214, %213 : vector<16x128xf32>
    %216 = arith.divf %214, %215 : vector<16x128xf32>
    %217 = vector.extract_strided_slice %204 {offsets = [0, 256], sizes = [16, 128], strides = [1, 1]} : vector<16x512xf32> to vector<16x128xf32>
    %218 = math.tanh %217 : vector<16x128xf32>
    %219 = vector.extract_strided_slice %204 {offsets = [0, 384], sizes = [16, 128], strides = [1, 1]} : vector<16x512xf32> to vector<16x128xf32>
    %220 = arith.negf %219 : vector<16x128xf32>
    %221 = math.exp %220 : vector<16x128xf32>
    %cst_74 = arith.constant 1.000000e+00 : f32
    %222 = vector.broadcast %cst_74 : f32 to vector<16x128xf32>
    %223 = arith.addf %222, %221 : vector<16x128xf32>
    %224 = arith.divf %222, %223 : vector<16x128xf32>
    %225 = arith.mulf %216, %163 : vector<16x128xf32>
    %226 = arith.mulf %210, %218 : vector<16x128xf32>
    %227 = arith.addf %225, %226 : vector<16x128xf32>
    %228 = math.tanh %227 : vector<16x128xf32>
    %229 = arith.mulf %224, %228 : vector<16x128xf32>
    %c3_75 = arith.constant 3 : index
    %c0_76 = arith.constant 0 : index
    %c0_77 = arith.constant 0 : index
    %230 = vector.load %arg6[%c3_75, %c0_76, %c0_77] : memref<4x16x128xf32, #tpu.memory_space<vmem>>, vector<1x16x128xf32>
    %231 = vector.shape_cast %230 : vector<1x16x128xf32> to vector<16x128xf32>
    %232 = vector.shape_cast %229 : vector<16x128xf32> to vector<1x16x128xf32>
    tpu.vector_store %arg6[%c3_75, %c0_76, %c0_77], %232 {strides = array<i32>} : memref<4x16x128xf32, #tpu.memory_space<vmem>>, vector<1x16x128xf32>,
    %c0_78 = arith.constant 0 : index
    %c0_79 = arith.constant 0 : index
    %c0_80 = arith.constant 0 : index
    %233 = vector.load %arg3[%c0_78, %c0_79, %c0_80] : memref<4x16x512xf32, #tpu.memory_space<vmem>>, vector<1x16x512xf32>
    %234 = vector.shape_cast %233 : vector<1x16x512xf32> to vector<16x512xf32>
    %cst_81 = arith.constant dense<0.000000e+00> : vector<16x512xf32>
    %235 = tpu.matmul %197, %4, %cst_81 {dimension_numbers = #tpu.dot_dimension_numbers<[1], [0], [0], [1], [0, 0, 1, 1], [], []>} : vector<16x128xf32>, vector<128x512xf32>, vector<16x512xf32> -> vector<16x512xf32>
    %236 = arith.addf %234, %235 : vector<16x512xf32>
    %237 = vector.extract_strided_slice %236 {offsets = [0, 0], sizes = [16, 128], strides = [1, 1]} : vector<16x512xf32> to vector<16x128xf32>
    %238 = arith.negf %237 : vector<16x128xf32>
    %239 = math.exp %238 : vector<16x128xf32>
    %cst_82 = arith.constant 1.000000e+00 : f32
    %240 = vector.broadcast %cst_82 : f32 to vector<16x128xf32>
    %241 = arith.addf %240, %239 : vector<16x128xf32>
    %242 = arith.divf %240, %241 : vector<16x128xf32>
    %243 = vector.extract_strided_slice %236 {offsets = [0, 128], sizes = [16, 128], strides = [1, 1]} : vector<16x512xf32> to vector<16x128xf32>
    %244 = arith.negf %243 : vector<16x128xf32>
    %245 = math.exp %244 : vector<16x128xf32>
    %cst_83 = arith.constant 1.000000e+00 : f32
    %246 = vector.broadcast %cst_83 : f32 to vector<16x128xf32>
    %247 = arith.addf %246, %245 : vector<16x128xf32>
    %248 = arith.divf %246, %247 : vector<16x128xf32>
    %249 = vector.extract_strided_slice %236 {offsets = [0, 256], sizes = [16, 128], strides = [1, 1]} : vector<16x512xf32> to vector<16x128xf32>
    %250 = math.tanh %249 : vector<16x128xf32>
    %251 = vector.extract_strided_slice %236 {offsets = [0, 384], sizes = [16, 128], strides = [1, 1]} : vector<16x512xf32> to vector<16x128xf32>
    %252 = arith.negf %251 : vector<16x128xf32>
    %253 = math.exp %252 : vector<16x128xf32>
    %cst_84 = arith.constant 1.000000e+00 : f32
    %254 = vector.broadcast %cst_84 : f32 to vector<16x128xf32>
    %255 = arith.addf %254, %253 : vector<16x128xf32>
    %256 = arith.divf %254, %255 : vector<16x128xf32>
    %257 = arith.mulf %248, %195 : vector<16x128xf32>
    %258 = arith.mulf %242, %250 : vector<16x128xf32>
    %259 = arith.addf %257, %258 : vector<16x128xf32>
    %260 = math.tanh %259 : vector<16x128xf32>
    %261 = arith.mulf %256, %260 : vector<16x128xf32>
    %c0_85 = arith.constant 0 : index
    %c0_86 = arith.constant 0 : index
    %c0_87 = arith.constant 0 : index
    %262 = vector.load %arg7[%c0_85, %c0_86, %c0_87] : memref<4x16x128xf32, #tpu.memory_space<vmem>>, vector<1x16x128xf32>
    %263 = vector.shape_cast %262 : vector<1x16x128xf32> to vector<16x128xf32>
    %264 = vector.shape_cast %261 : vector<16x128xf32> to vector<1x16x128xf32>
    tpu.vector_store %arg7[%c0_85, %c0_86, %c0_87], %264 {strides = array<i32>} : memref<4x16x128xf32, #tpu.memory_space<vmem>>, vector<1x16x128xf32>,
    %c0_88 = arith.constant 0 : index
    %c0_89 = arith.constant 0 : index
    %265 = vector.load %arg8[%c0_88, %c0_89] : memref<16x128xf32, #tpu.memory_space<vmem>>, vector<16x128xf32>
    tpu.vector_store %arg8[%c0_88, %c0_89], %229 {strides = array<i32>} : memref<16x128xf32, #tpu.memory_space<vmem>>, vector<16x128xf32>,
    %c0_90 = arith.constant 0 : index
    %c0_91 = arith.constant 0 : index
    %266 = vector.load %arg9[%c0_90, %c0_91] : memref<16x128xf32, #tpu.memory_space<vmem>>, vector<16x128xf32>
    tpu.vector_store %arg9[%c0_90, %c0_91], %227 {strides = array<i32>} : memref<16x128xf32, #tpu.memory_space<vmem>>, vector<16x128xf32>,
    %c0_92 = arith.constant 0 : index
    %c0_93 = arith.constant 0 : index
    %267 = vector.load %arg10[%c0_92, %c0_93] : memref<16x128xf32, #tpu.memory_space<vmem>>, vector<16x128xf32>
    tpu.vector_store %arg10[%c0_92, %c0_93], %261 {strides = array<i32>} : memref<16x128xf32, #tpu.memory_space<vmem>>, vector<16x128xf32>,
    %c0_94 = arith.constant 0 : index
    %c0_95 = arith.constant 0 : index
    %268 = vector.load %arg11[%c0_94, %c0_95] : memref<16x128xf32, #tpu.memory_space<vmem>>, vector<16x128xf32>
    tpu.vector_store %arg11[%c0_94, %c0_95], %259 {strides = array<i32>} : memref<16x128xf32, #tpu.memory_space<vmem>>, vector<16x128xf32>,
    return
  }
  func.func @transform_0(%arg0: i32, %arg1: i32) -> (i32, i32, i32) {
    %c0_i32 = arith.constant 0 : i32
    %c0_i32_0 = arith.constant 0 : i32
    return %arg1, %arg0, %c0_i32 : i32, i32, i32
  }
  func.func @transform_1(%arg0: i32, %arg1: i32) -> (i32, i32, i32) {
    %c1_i32 = arith.constant 1 : i32
    %0 = arith.subi %c1_i32, %arg1 : i32
    %c0_i32 = arith.constant 0 : i32
    %c0_i32_0 = arith.constant 0 : i32
    return %0, %arg0, %c0_i32 : i32, i32, i32
  }
  func.func @transform_2(%arg0: i32, %arg1: i32) -> (i32, i32) {
    %c0_i32 = arith.constant 0 : i32
    %c0_i32_0 = arith.constant 0 : i32
    %c0_i32_1 = arith.constant 0 : i32
    return %c0_i32, %c0_i32_0 : i32, i32
  }
  func.func @transform_3(%arg0: i32, %arg1: i32) -> (i32, i32) {
    %c0_i32 = arith.constant 0 : i32
    %c0_i32_0 = arith.constant 0 : i32
    %c0_i32_1 = arith.constant 0 : i32
    return %c0_i32, %c0_i32_0 : i32, i32
  }
  func.func @transform_4(%arg0: i32, %arg1: i32) -> (i32, i32, i32) {
    %c0_i32 = arith.constant 0 : i32
    %c0_i32_0 = arith.constant 0 : i32
    return %arg1, %arg0, %c0_i32 : i32, i32, i32
  }
  func.func @transform_5(%arg0: i32, %arg1: i32) -> (i32, i32, i32) {
    %c1_i32 = arith.constant 1 : i32
    %0 = arith.subi %c1_i32, %arg1 : i32
    %c0_i32 = arith.constant 0 : i32
    %c0_i32_0 = arith.constant 0 : i32
    return %0, %arg0, %c0_i32 : i32, i32, i32
  }
}

module attributes {stable_mosaic.version = 11 : i64} {
  func.func @_ff_tanh_kernel(%arg0: i32, %arg1: memref<128x128xf32, #tpu.memory_space<vmem>>, %arg2: memref<128x128xf32, #tpu.memory_space<vmem>>, %arg3: memref<2x128xf32, #tpu.memory_space<vmem>>, %arg4: memref<2x128xf32, #tpu.memory_space<vmem>>, %arg5: memref<2x1xf32, #tpu.memory_space<vmem>>, %arg6: memref<2x128xf32, #tpu.memory_space<vmem>>) attributes {dimension_semantics = [#tpu.dimension_semantics<parallel>], iteration_bounds = array<i64: 1>, scalar_prefetch = 0 : i64, scratch_operands = 0 : i64, tpu.core_type = #tpu.core_type<tc>, window_params = [{transform_indices = @transform_0, window_bounds = array<i64: 128, 128>}, {transform_indices = @transform_1, window_bounds = array<i64: 128, 128>}, {pipeline_mode = #tpu.pipeline_mode<synchronous>, transform_indices = @transform_2, window_bounds = array<i64: 2, 128>}, {pipeline_mode = #tpu.pipeline_mode<synchronous>, transform_indices = @transform_3, window_bounds = array<i64: 2, 128>}, {pipeline_mode = #tpu.pipeline_mode<synchronous>, transform_indices = @transform_4, window_bounds = array<i64: 2, 1>}, {transform_indices = @transform_5, window_bounds = array<i64: 2, 128>}]} {
    %c0 = arith.constant 0 : index
    %c0_0 = arith.constant 0 : index
    %0 = vector.load %arg3[%c0, %c0_0] : memref<2x128xf32, #tpu.memory_space<vmem>>, vector<2x128xf32>
    %c0_1 = arith.constant 0 : index
    %c0_2 = arith.constant 0 : index
    %1 = vector.load %arg1[%c0_1, %c0_2] : memref<128x128xf32, #tpu.memory_space<vmem>>, vector<128x128xf32>
    %cst = arith.constant dense<0.000000e+00> : vector<2x128xf32>
    %2 = tpu.matmul %0, %1, %cst {dimension_numbers = #tpu.dot_dimension_numbers<[1], [1], [0], [0], [0, 0, 1, 0], [], []>} : vector<2x128xf32>, vector<128x128xf32>, vector<2x128xf32> -> vector<2x128xf32>
    %c0_3 = arith.constant 0 : index
    %c0_4 = arith.constant 0 : index
    %3 = vector.load %arg4[%c0_3, %c0_4] : memref<2x128xf32, #tpu.memory_space<vmem>>, vector<2x128xf32>
    %c0_5 = arith.constant 0 : index
    %c0_6 = arith.constant 0 : index
    %4 = vector.load %arg2[%c0_5, %c0_6] : memref<128x128xf32, #tpu.memory_space<vmem>>, vector<128x128xf32>
    %cst_7 = arith.constant dense<0.000000e+00> : vector<2x128xf32>
    %5 = tpu.matmul %3, %4, %cst_7 {dimension_numbers = #tpu.dot_dimension_numbers<[1], [1], [0], [0], [0, 0, 1, 0], [], []>} : vector<2x128xf32>, vector<128x128xf32>, vector<2x128xf32> -> vector<2x128xf32>
    %6 = arith.addf %2, %5 : vector<2x128xf32>
    %c0_8 = arith.constant 0 : index
    %c0_9 = arith.constant 0 : index
    %7 = vector.load %arg5[%c0_8, %c0_9] : memref<2x1xf32, #tpu.memory_space<vmem>>, vector<2x1xf32>
    %8 = vector.broadcast %7 : vector<2x1xf32> to vector<2x128xf32>
    %9 = arith.addf %6, %8 : vector<2x128xf32>
    %10 = math.tanh %9 : vector<2x128xf32>
    %c0_10 = arith.constant 0 : index
    %c0_11 = arith.constant 0 : index
    %11 = vector.load %arg6[%c0_10, %c0_11] : memref<2x128xf32, #tpu.memory_space<vmem>>, vector<2x128xf32>
    tpu.vector_store %arg6[%c0_10, %c0_11], %10 {strides = array<i32>} : memref<2x128xf32, #tpu.memory_space<vmem>>, vector<2x128xf32>,
    return
  }
  func.func @transform_0(%arg0: i32) -> (i32, i32) {
    %c0_i32 = arith.constant 0 : i32
    %c0_i32_0 = arith.constant 0 : i32
    return %arg0, %c0_i32 : i32, i32
  }
  func.func @transform_1(%arg0: i32) -> (i32, i32) {
    %c0_i32 = arith.constant 0 : i32
    %c0_i32_0 = arith.constant 0 : i32
    return %arg0, %c0_i32 : i32, i32
  }
  func.func @transform_2(%arg0: i32) -> (i32, i32) {
    %c0_i32 = arith.constant 0 : i32
    %c0_i32_0 = arith.constant 0 : i32
    %c0_i32_1 = arith.constant 0 : i32
    return %c0_i32, %c0_i32_0 : i32, i32
  }
  func.func @transform_3(%arg0: i32) -> (i32, i32) {
    %c0_i32 = arith.constant 0 : i32
    %c0_i32_0 = arith.constant 0 : i32
    %c0_i32_1 = arith.constant 0 : i32
    return %c0_i32, %c0_i32_0 : i32, i32
  }
  func.func @transform_4(%arg0: i32) -> (i32, i32) {
    %c0_i32 = arith.constant 0 : i32
    %c0_i32_0 = arith.constant 0 : i32
    %c0_i32_1 = arith.constant 0 : i32
    return %c0_i32, %c0_i32_0 : i32, i32
  }
  func.func @transform_5(%arg0: i32) -> (i32, i32) {
    %c0_i32 = arith.constant 0 : i32
    %c0_i32_0 = arith.constant 0 : i32
    return %c0_i32, %arg0 : i32, i32
  }
}

</mosaic_0001>

<bundles_post_ra>
// kernel: ftjnf_forward.5
= control target key start
LH: loop header
LB: loop body
LE: loop exit
PB: predicated region body
PF: predicated region fallthrough
CT: control target
= control target key end

     0   :  { %v317_v0 = vmov 0.0   ;;  %vm318_vm0 = vmmov 0   ;;  %v319_v5 = vmov 0   ;;  %s492_s1 = inlined_call_operand.vmem [shape: f32[128,128], index: 1, kind: input, shape index: {}]   ;;  %s493_s0 = inlined_call_operand.vmem [shape: f32[128,128], index: 0, kind: input, shape index: {}]   ;;  %s494_s4 = inlined_call_operand.vmem [shape: f32[2,1], index: 4, kind: input, shape index: {}]   ;;  %s495_s3 = inlined_call_operand.vmem [shape: f32[2,128], index: 3, kind: input, shape index: {}]   ;;  %s496_s2 = inlined_call_operand.vmem [shape: f32[2,128], index: 2, kind: input, shape index: {}]   ;;  %s497_s5 = inlined_call_operand.vmem [shape: f32[2,128], index: 5, kind: output, shape index: {}]  }
   0x1   :  { %241 = vmatprep.subr.mxu0 %v317_v0  ;;  %276 = vmatprep.subr.mxu1 %v317_v0  ;;  %v53_v1 = vld [vmem:[%s492_s1 + $0x78] sm:$0xff]  ;;  %v52_v3 = vld [vmem:[%s492_s1 + $0x70] sm:$0xff]  ;;  %v51_v6 = vld [vmem:[%s492_s1 + $0x68] sm:$0xff] }
   0x2   :  { %v36_v2 = vld [vmem:[%s493_s0 + $0x78] sm:$0xff]  ;;  %242 = vmatpush3.xpose.msra.mxu0 %v53_v1  ;;  %v35_v4 = vld [vmem:[%s493_s0 + $0x70] sm:$0xff]  ;;  %273 = vmatprep.mubr.msk.f32.mxu0 %vm318_vm0, %v317_v0  ;;  %v34_v7 = vld [vmem:[%s493_s0 + $0x68] sm:$0xff] }
   0x3   :  { %277 = vmatpush3.xpose.msra.mxu1 %v36_v2  ;;  %243 = vmatprep.subr.mxu0 %v317_v0  ;;  %v50_v8 = vld [vmem:[%s492_s1 + $0x60] sm:$0xff]  ;;  %v49_v11 = vld [vmem:[%s492_s1 + $0x58] sm:$0xff]  ;;  %v48_v13 = vld [vmem:[%s492_s1 + $0x50] sm:$0xff] }
   0x4   :  { %278 = vmatprep.subr.mxu1 %v317_v0  ;;  %308 = vmatprep.mubr.msk.f32.mxu1 %vm318_vm0, %v317_v0  ;;  %v33_v9 = vld [vmem:[%s493_s0 + $0x60] sm:$0xff]  ;;  %v32_v12 = vld [vmem:[%s493_s0 + $0x58] sm:$0xff]  ;;  %v31_v14 = vld [vmem:[%s493_s0 + $0x50] sm:$0xff] }
   0x5   :  { %314 = vset.pattern.permute.xlu0 %v319_v5  ;;  %v194_v10 = vld [vmem:[%s494_s4] sm:$0x3]  ;;  %v47_v15 = vld [vmem:[%s492_s1 + $0x48] sm:$0xff]  ;;  %v45_v19 = vld [vmem:[%s492_s1 + $0x38] sm:$0xff] }
   0x6   :  { %244 = vmatpush3.xpose.msra.mxu0 %v52_v3  ;;  %197 = vperm.xlu0 %314, %v194_v10   ;;  %v30_v16 = vld [vmem:[%s493_s0 + $0x48] sm:$0xff]  ;;  %v46_v17 = vld [vmem:[%s492_s1 + $0x40] sm:$0xff]  ;;  %v28_v20 = vld [vmem:[%s493_s0 + $0x38] sm:$0xff] }
   0x7   :  { %279 = vmatpush3.xpose.msra.mxu1 %v35_v4  ;;  %245 = vmatprep.subr.mxu0 %v317_v0  ;;  %v29_v18 = vld [vmem:[%s493_s0 + $0x40] sm:$0xff]  ;;  %v44_v21 = vld [vmem:[%s492_s1 + $0x30] sm:$0xff]  ;;  %v43_v23 = vld [vmem:[%s492_s1 + $0x28] sm:$0xff] }
   0x8   :  { %280 = vmatprep.subr.mxu1 %v317_v0  ;;  %v27_v22 = vld [vmem:[%s493_s0 + $0x30] sm:$0xff]  ;;  %v26_v24 = vld [vmem:[%s493_s0 + $0x28] sm:$0xff]  ;;  %v42_v25 = vld [vmem:[%s492_s1 + $0x20] sm:$0xff] }
   0x9   :  { %v25_v26 = vld [vmem:[%s493_s0 + $0x20] sm:$0xff]  ;;  %v41_v27 = vld [vmem:[%s492_s1 + $0x18] sm:$0xff]  ;;  %v40_v29 = vld [vmem:[%s492_s1 + $0x10] sm:$0xff] }
   0xa   :  { %246 = vmatpush3.xpose.msra.mxu0 %v51_v6  ;;  %v24_v28 = vld [vmem:[%s493_s0 + $0x18] sm:$0xff]  ;;  %v23_v30 = vld [vmem:[%s493_s0 + $0x10] sm:$0xff]  ;;  %v39_v31 = vld [vmem:[%s492_s1 + $0x8] sm:$0xff] }
   0xb   :  { %281 = vmatpush3.xpose.msra.mxu1 %v34_v7  ;;  %247 = vmatprep.subr.mxu0 %v317_v0  ;;  %v22_v32 = vld [vmem:[%s493_s0 + $0x8] sm:$0xff]  ;;  %v38_v33 = vld [vmem:[%s492_s1] sm:$0xff] }
   0xc   :  { %282 = vmatprep.subr.mxu1 %v317_v0  ;;  %v21_v34 = vld [vmem:[%s493_s0] sm:$0xff] }
   0xd   :  { %v37_v35 = vld [vmem:[%s495_s3] sm:$0x3] }
   0xe   :  { %248 = vmatpush3.xpose.msra.mxu0 %v50_v8  ;;  %v20_v36 = vld [vmem:[%s496_s2] sm:$0x3] }
   0xf   :  { %283 = vmatpush3.xpose.msra.mxu1 %v33_v9  ;;  %249 = vmatprep.subr.mxu0 %v317_v0 }
  0x10   :  { %284 = vmatprep.subr.mxu1 %v317_v0 }
  0x12   :  { %250 = vmatpush3.xpose.msra.mxu0 %v49_v11 }
  0x13   :  { %285 = vmatpush3.xpose.msra.mxu1 %v32_v12  ;;  %251 = vmatprep.subr.mxu0 %v317_v0 }
  0x14   :  { %286 = vmatprep.subr.mxu1 %v317_v0 }
  0x16   :  { %252 = vmatpush3.xpose.msra.mxu0 %v48_v13 }
  0x17   :  { %287 = vmatpush3.xpose.msra.mxu1 %v31_v14  ;;  %253 = vmatprep.subr.mxu0 %v317_v0 }
  0x18   :  { %288 = vmatprep.subr.mxu1 %v317_v0 }
  0x1a   :  { %254 = vmatpush3.xpose.msra.mxu0 %v47_v15 }
  0x1b   :  { %289 = vmatpush3.xpose.msra.mxu1 %v30_v16  ;;  %255 = vmatprep.subr.mxu0 %v317_v0 }
  0x1c   :  { %290 = vmatprep.subr.mxu1 %v317_v0 }
  0x1e   :  { %256 = vmatpush3.xpose.msra.mxu0 %v46_v17 }
  0x1f   :  { %291 = vmatpush3.xpose.msra.mxu1 %v29_v18  ;;  %257 = vmatprep.subr.mxu0 %v317_v0 }
  0x20   :  { %292 = vmatprep.subr.mxu1 %v317_v0 }
  0x22   :  { %258 = vmatpush3.xpose.msra.mxu0 %v45_v19 }
  0x23   :  { %293 = vmatpush3.xpose.msra.mxu1 %v28_v20  ;;  %259 = vmatprep.subr.mxu0 %v317_v0 }
  0x24   :  { %294 = vmatprep.subr.mxu1 %v317_v0 }
  0x26   :  { %260 = vmatpush3.xpose.msra.mxu0 %v44_v21 }
  0x27   :  { %295 = vmatpush3.xpose.msra.mxu1 %v27_v22  ;;  %261 = vmatprep.subr.mxu0 %v317_v0 }
  0x28   :  { %296 = vmatprep.subr.mxu1 %v317_v0 }
  0x2a   :  { %262 = vmatpush3.xpose.msra.mxu0 %v43_v23 }
  0x2b   :  { %297 = vmatpush3.xpose.msra.mxu1 %v26_v24  ;;  %263 = vmatprep.subr.mxu0 %v317_v0 }
  0x2c   :  { %298 = vmatprep.subr.mxu1 %v317_v0 }
  0x2e   :  { %264 = vmatpush3.xpose.msra.mxu0 %v42_v25 }
  0x2f   :  { %299 = vmatpush3.xpose.msra.mxu1 %v25_v26  ;;  %265 = vmatprep.subr.mxu0 %v317_v0 }
  0x30   :  { %300 = vmatprep.subr.mxu1 %v317_v0 }
  0x32   :  { %266 = vmatpush3.xpose.msra.mxu0 %v41_v27 }
  0x33   :  { %301 = vmatpush3.xpose.msra.mxu1 %v24_v28  ;;  %267 = vmatprep.subr.mxu0 %v317_v0 }
  0x34   :  { %302 = vmatprep.subr.mxu1 %v317_v0 }
  0x36   :  { %268 = vmatpush3.xpose.msra.mxu0 %v40_v29 }
  0x37   :  { %303 = vmatpush3.xpose.msra.mxu1 %v23_v30  ;;  %269 = vmatprep.subr.mxu0 %v317_v0 }
  0x38   :  { %304 = vmatprep.subr.mxu1 %v317_v0 }
  0x3a   :  { %270 = vmatpush3.xpose.msra.mxu0 %v39_v31 }
  0x3b   :  { %305 = vmatpush3.xpose.msra.mxu1 %v22_v32  ;;  %271 = vmatprep.subr.mxu0 %v317_v0 }
  0x3c   :  { %306 = vmatprep.subr.mxu1 %v317_v0 }
  0x3e   :  { %272 = vmatpush3.xpose.msra.mxu0 %v38_v33 }
  0x3f   :  { %307 = vmatpush3.xpose.msra.mxu1 %v21_v34 }
  0x41   :  { %274 = vmatmul.mubr.f32.vlgmr.msra.gmra.mxu0 %v37_v35 }
  0x42   :  { %309 = vmatmul.mubr.f32.vlgmr.msra.gmra.mxu1 %v20_v36 }
  0x81   :  { %v198_v37 = vpop.permute.xlu0 %197 }
 0x101   :  { %v120_v38 = vpop.f32.mrf.mxu0 }
 0x102   :  { %v190_v39 = vpop.f32.mrf.mxu1 }
 0x103   :  { %v191_v40 = vadd.f32 %v190_v39, %v120_v38  ;;  %v275_v41 = vpop.f32.mrf.mxu0 }
 0x104   :  { %v310_v42 = vpop.f32.mrf.mxu1 }
 0x105   :  { %v200_v43 = vadd.f32 %v198_v37, %v191_v40 }
 0x107   :  { %315 = vtanh.f32 %v200_v43 }
 0x114   :  { %v316_v44 = vpop.eup %315 }
 0x115   :  { %202 = vst [vmem:[%s497_s5] sm:$0x3] %v316_v44 }

// kernel: ftjnf_forward.3
= control target key start
LH: loop header
LB: loop body
LE: loop exit
PB: predicated region body
PF: predicated region fallthrough
CT: control target
= control target key end

     0   :  { %s3054_s18 = smov 0   ;;  %s3056_s19 = smov 0   ;;  %s5040_s0 = inlined_call_operand.vmem [shape: f32[8,16,512], index: 0, kind: input, shape index: {}]   ;;  %s5041_s1 = inlined_call_operand.vmem [shape: f32[8,16,512], index: 1, kind: input, shape index: {}]   ;;  %s5042_s2 = inlined_call_operand.vmem [shape: f32[128,512], index: 2, kind: input, shape index: {}]   ;;  %s5043_s3 = inlined_call_operand.vmem [shape: f32[128,512], index: 3, kind: input, shape index: {}]   ;;  %s5044_s4 = inlined_call_operand.vmem [shape: f32[8,16,128], index: 4, kind: output, shape index: {0}]   ;;  %s5045_s5 = inlined_call_operand.vmem [shape: f32[8,16,128], index: 5, kind: output, shape index: {1}]  }
   0x1   :  { %s3058_s20 = smov 0  }
   0x2 LB: > { %s25_s21 = sadd.s32 1, %s3016_s19  ;;  %p2460_p0 = scmp.ge.s32.totalorder %s3020_s20, 1  ;;  %s3020_s20 = sphi %s3058_s20, %s16_s20   ;;  %s3016_s19 = sphi %s3056_s19, %s5454_s19   ;;  %s3012_s18 = sphi %s3054_s18, %s5453_s18  }
   0x3   : > { %p26_p1 = scmp.ge.s32.totalorder %s25_s21, 2  ;;  %p242_p2 = scmp.lt.s32.totalorder %s3020_s20, 3 }
   0x5   : > { %s5456_s21 = smov (%p26_p1, %s25_s21), 0  ;;  %p243_p3 = pnand %p2460_p0, %p242_p2 }
   0x7   : > { %246 = sbr.rel (%p243_p3) target bundleno = 1099 (0x44b), region = 36 }
   0xc   : > { %s2461_s22 = sshll.u32 %s3012_s18, 2  ;;  %s317_s23 = ssub.s32 1, %s3012_s18 }
   0xd   : > { %p306_p4 = scmp.lt.s32.totalorder %s2461_s22, 7  ;;  %s2464_s24 = sshll.u32 %s317_s23, 2 }
   0xe   : > { %p320_p5 = scmp.lt.s32.totalorder %s2464_s24, 7  ;;  %p2473_p6 = scmp.ne.s32.totalorder %s3012_s18, 0 }
   0xf   : > { %s5458_s22 = smov (!%p306_p4, %s2461_s22), 7 }
  0x10   : > { %s5460_s24 = smov (!%p320_p5, %s2464_s24), 7  ;;  %s2584_s25 = sshll.u32 %s5458_s22, 6 }
  0x11   : > { %s2586_s26 = sshll.u32 %s5458_s22, 4  ;;  %s3075_s29 = scalar_lea.vmem %s5040_s0, %s2584_s25 }
  0x12   : > { %s2585_s30 = sshll.u32 %s5460_s24, 6  ;;  %s3085_s11 = scalar_lea.vmem %s5044_s4, %s2586_s26 }
  0x13   : > { %s3080_s8 = scalar_lea.vmem %s5041_s1, %s2585_s30  ;;  %s2587_s12 = sshll.u32 %s5460_s24, 4 }
  0x14   : > { %s3090_s15 = scalar_lea.vmem %s5045_s5, %s2587_s12  ;;  %361 = sbr.rel (%p2473_p6) target bundleno = 30 (0x1e), region = 40 }
  0x19   : > { %v3022_v0 = vmov 0.0  }
  0x1a   : > { %362 = vst [vmem:[#allocation2] sm:$0xff] %v3022_v0  ;;  %363 = vst [vmem:[#allocation2 + $0x8] sm:$0xff] %v3022_v0 }
  0x1b   : > { %364 = vst [vmem:[#allocation3 + $0x8] sm:$0xff] %v3022_v0  ;;  %365 = vst [vmem:[#allocation3] sm:$0xff] %v3022_v0 }
  0x1c   : > { %366 = vst [vmem:[#allocation4 + $0x8] sm:$0xff] %v3022_v0  ;;  %367 = vst [vmem:[#allocation4] sm:$0xff] %v3022_v0 }
  0x1d   : > { %368 = vst [vmem:[#allocation5] sm:$0xff] %v3022_v0  ;;  %369 = vst [vmem:[#allocation5 + $0x8] sm:$0xff] %v3022_v0 }
  0x1e PF: > { %v3095_v1 = vld [vmem:[%s5042_s2 + $0x1e8] sm:$0xff]  ;;  %v3100_v2 = vld [vmem:[%s5042_s2 + $0x1e0] sm:$0xff]  ;;  %v5046_v5 = vmov 0.0   ;;  %v3142_v10 = vld [vmem:[%s5042_s2 + $0x1f8] sm:$0xff] }
  0x1f   : > { %v3105_v3 = vld [vmem:[%s5042_s2 + $0x1c8] sm:$0xff]  ;;  %514 = vmatprep.subr.mxu0 %v3095_v1  ;;  %v3111_v4 = vld [vmem:[%s5042_s2 + $0x1c0] sm:$0xff]  ;;  %578 = vmatprep.mubr.f32.mxu0 %v5046_v5  ;;  %v3154_v12 = vld [vmem:[%s5042_s2 + $0x1f0] sm:$0xff] }
  0x20   : > { %515 = vmatpush1.msra.mxu0 %v3100_v2  ;;  %v3118_v6 = vld [vmem:[%s5042_s2 + $0x1a8] sm:$0xff]  ;;  %655 = vmatprep.mubr.f32.mxu1 %v5046_v5  ;;  %v3125_v7 = vld [vmem:[%s5042_s2 + $0x1a0] sm:$0xff]  ;;  %v3166_v14 = vld [vmem:[%s5042_s2 + $0x1d8] sm:$0xff] }
  0x21   : > { %516 = vmatprep.subr.mxu0 %v3105_v3  ;;  %v3131_v8 = vld [vmem:[%s5042_s2 + $0x188] sm:$0xff]  ;;  %v3137_v9 = vld [vmem:[%s5042_s2 + $0x180] sm:$0xff]  ;;  %591 = vmatprep.subr.mxu1 %v3142_v10  ;;  %v3171_v15 = vld [vmem:[%s5042_s2 + $0x1d0] sm:$0xff] }
  0x22   : > { %517 = vmatpush1.msra.mxu0 %v3111_v4  ;;  %v3148_v11 = vld [vmem:[%s5042_s2 + $0x168] sm:$0xff]  ;;  %v3160_v13 = vld [vmem:[%s5042_s2 + $0x160] sm:$0xff]  ;;  %592 = vmatpush1.msra.mxu1 %v3154_v12  ;;  %v3183_v17 = vld [vmem:[%s5042_s2 + $0x1b8] sm:$0xff] }
  0x23   : > { %518 = vmatprep.subr.mxu0 %v3118_v6  ;;  %v3177_v16 = vld [vmem:[%s5042_s2 + $0x148] sm:$0xff]  ;;  %593 = vmatprep.subr.mxu1 %v3166_v14  ;;  %v3189_v18 = vld [vmem:[%s5042_s2 + $0x140] sm:$0xff]  ;;  %v3195_v19 = vld [vmem:[%s5042_s2 + $0x1b0] sm:$0xff] }
  0x24   : > { %519 = vmatpush1.msra.mxu0 %v3125_v7  ;;  %594 = vmatpush1.msra.mxu1 %v3171_v15  ;;  %v3200_v20 = vld [vmem:[%s5042_s2 + $0x198] sm:$0xff]  ;;  %v3206_v21 = vld [vmem:[%s5042_s2 + $0x128] sm:$0xff]  ;;  %v3212_v22 = vld [vmem:[%s5042_s2 + $0x190] sm:$0xff] }
  0x25   : > { %520 = vmatprep.subr.mxu0 %v3131_v8  ;;  %595 = vmatprep.subr.mxu1 %v3183_v17  ;;  %v3218_v23 = vld [vmem:[%s5042_s2 + $0x120] sm:$0xff]  ;;  %v3224_v24 = vld [vmem:[%s5042_s2 + $0x178] sm:$0xff]  ;;  %v3230_v25 = vld [vmem:[%s5042_s2 + $0x108] sm:$0xff] }
  0x26   : > { %521 = vmatpush1.msra.mxu0 %v3137_v9  ;;  %596 = vmatpush1.msra.mxu1 %v3195_v19  ;;  %v3236_v26 = vld [vmem:[%s5042_s2 + $0x170] sm:$0xff]  ;;  %v3242_v27 = vld [vmem:[%s5042_s2 + $0x100] sm:$0xff]  ;;  %v3248_v28 = vld [vmem:[%s5042_s2 + $0x158] sm:$0xff] }
  0x27   : > { %522 = vmatprep.subr.mxu0 %v3148_v11  ;;  %597 = vmatprep.subr.mxu1 %v3200_v20  ;;  %v3254_v29 = vld [vmem:[%s5042_s2 + $0xe8] sm:$0xff]  ;;  %v3260_v30 = vld [vmem:[%s5042_s2 + $0x150] sm:$0xff]  ;;  %v3266_v31 = vld [vmem:[%s5042_s2 + $0xe0] sm:$0xff] }
  0x28   : > { %523 = vmatpush1.msra.mxu0 %v3160_v13  ;;  %598 = vmatpush1.msra.mxu1 %v3212_v22  ;;  %v3272_v32 = vld [vmem:[%s5042_s2 + $0x138] sm:$0xff]  ;;  %v3278_v33 = vld [vmem:[%s5042_s2 + $0xc8] sm:$0xff]  ;;  %v3284_v34 = vld [vmem:[%s5042_s2 + $0x130] sm:$0xff] }
  0x29   : > { %524 = vmatprep.subr.mxu0 %v3177_v16  ;;  %599 = vmatprep.subr.mxu1 %v3224_v24  ;;  %v3290_v35 = vld [vmem:[%s5042_s2 + $0xc0] sm:$0xff]  ;;  %v3296_v36 = vld [vmem:[%s5042_s2 + $0x118] sm:$0xff]  ;;  %v3302_v37 = vld [vmem:[%s5042_s2 + $0xa8] sm:$0xff] }
  0x2a   : > { %525 = vmatpush1.msra.mxu0 %v3189_v18  ;;  %600 = vmatpush1.msra.mxu1 %v3236_v26  ;;  %v3308_v38 = vld [vmem:[%s5042_s2 + $0x110] sm:$0xff]  ;;  %v3314_v39 = vld [vmem:[%s5042_s2 + $0xa0] sm:$0xff]  ;;  %v3320_v40 = vld [vmem:[%s5042_s2 + $0xf8] sm:$0xff] }
  0x2b   : > { %526 = vmatprep.subr.mxu0 %v3206_v21  ;;  %601 = vmatprep.subr.mxu1 %v3248_v28  ;;  %v3326_v41 = vld [vmem:[%s5042_s2 + $0x88] sm:$0xff]  ;;  %v3332_v42 = vld [vmem:[%s5042_s2 + $0xf0] sm:$0xff]  ;;  %v3338_v43 = vld [vmem:[%s5042_s2 + $0x80] sm:$0xff] }
  0x2c   : > { %527 = vmatpush1.msra.mxu0 %v3218_v23  ;;  %602 = vmatpush1.msra.mxu1 %v3260_v30  ;;  %v3344_v44 = vld [vmem:[%s5042_s2 + $0xd8] sm:$0xff]  ;;  %v3350_v45 = vld [vmem:[%s5042_s2 + $0x68] sm:$0xff]  ;;  %v3356_v46 = vld [vmem:[%s5042_s2 + $0xd0] sm:$0xff] }
  0x2d   : > { %528 = vmatprep.subr.mxu0 %v3230_v25  ;;  %603 = vmatprep.subr.mxu1 %v3272_v32  ;;  %v3362_v47 = vld [vmem:[%s5042_s2 + $0x60] sm:$0xff]  ;;  %v3368_v48 = vld [vmem:[%s5042_s2 + $0xb8] sm:$0xff]  ;;  %v3374_v49 = vld [vmem:[%s5042_s2 + $0x48] sm:$0xff] }
  0x2e   : > { %529 = vmatpush1.msra.mxu0 %v3242_v27  ;;  %604 = vmatpush1.msra.mxu1 %v3284_v34  ;;  %v3380_v50 = vld [vmem:[%s5042_s2 + $0xb0] sm:$0xff]  ;;  %v3386_v51 = vld [vmem:[%s5042_s2 + $0x40] sm:$0xff]  ;;  %v3392_v52 = vld [vmem:[%s5042_s2 + $0x98] sm:$0xff] }
  0x2f   : > { %530 = vmatprep.subr.mxu0 %v3254_v29  ;;  %605 = vmatprep.subr.mxu1 %v3296_v36  ;;  %v3398_v53 = vld [vmem:[%s5042_s2 + $0x28] sm:$0xff]  ;;  %v3404_v54 = vld [vmem:[%s5042_s2 + $0x90] sm:$0xff]  ;;  %v3410_v55 = vld [vmem:[%s5042_s2 + $0x20] sm:$0xff] }
  0x30   : > { %531 = vmatpush1.msra.mxu0 %v3266_v31  ;;  %606 = vmatpush1.msra.mxu1 %v3308_v38  ;;  %5186 = vst [vmem:[#allocation6_spill] sm:$0xff] %v3398_v53  ;;  %5187 = vst [vmem:[#allocation7_spill] sm:$0xff] %v3410_v55  ;;  %v3416_v56 = vld [vmem:[%s5042_s2 + $0x78] sm:$0xff]  ;;  %v3422_v57 = vld [vmem:[%s5042_s2 + $0x8] sm:$0xff] }
  0x31   : > { %532 = vmatprep.subr.mxu0 %v3278_v33  ;;  %607 = vmatprep.subr.mxu1 %v3320_v40  ;;  %5188 = vst [vmem:[#allocation8_spill] sm:$0xff] %v3416_v56  ;;  %5189 = vst [vmem:[#allocation9_spill] sm:$0xff] %v3422_v57  ;;  %v3428_v58 = vld [vmem:[%s5042_s2 + $0x70] sm:$0xff]  ;;  %v3434_v59 = vld [vmem:[%s5042_s2] sm:$0xff] }
  0x32   : > { %533 = vmatpush1.msra.mxu0 %v3290_v35  ;;  %608 = vmatpush1.msra.mxu1 %v3332_v42  ;;  %5190 = vst [vmem:[#allocation10_spill] sm:$0xff] %v3428_v58  ;;  %5191 = vst [vmem:[#allocation11_spill] sm:$0xff] %v3434_v59  ;;  %v3440_v60 = vld [vmem:[%s5042_s2 + $0x58] sm:$0xff]  ;;  %v498_v61 = vld [vmem:[#allocation2] sm:$0xff] }
  0x33   : > { %534 = vmatprep.subr.mxu0 %v3302_v37  ;;  %609 = vmatprep.subr.mxu1 %v3344_v44  ;;  %5192 = vst [vmem:[#allocation12_spill] sm:$0xff] %v3440_v60  ;;  %v3446_v62 = vld [vmem:[%s5043_s3 + $0x1e8] sm:$0xff]  ;;  %v3453_v63 = vld [vmem:[%s5043_s3 + $0x1e0] sm:$0xff]  ;;  %v3466_v5 = vld [vmem:[%s5042_s2 + $0x50] sm:$0xff] }
  0x34   : > { %535 = vmatpush1.msra.mxu0 %v3314_v39  ;;  %610 = vmatpush1.msra.mxu1 %v3356_v46  ;;  %5193 = vst [vmem:[#allocation13_spill] sm:$0xff] %v3446_v62  ;;  %5194 = vst [vmem:[#allocation14_spill] sm:$0xff] %v3453_v63  ;;  %v3460_v0 = vld [vmem:[%s5043_s3 + $0x1c8] sm:$0xff] }
  0x35   : > { %536 = vmatprep.subr.mxu0 %v3326_v41  ;;  %611 = vmatprep.subr.mxu1 %v3368_v48  ;;  %5195 = vst [vmem:[#allocation15_spill] sm:$0xff] %v3460_v0  ;;  %5196 = vst [vmem:[#allocation16_spill] sm:$0xff] %v3466_v5 }
  0x36   : > { %537 = vmatpush1.msra.mxu0 %v3338_v43  ;;  %612 = vmatpush1.msra.mxu1 %v3380_v50 }
  0x37   : > { %538 = vmatprep.subr.mxu0 %v3350_v45  ;;  %613 = vmatprep.subr.mxu1 %v3392_v52 }
  0x38   : > { %539 = vmatpush1.msra.mxu0 %v3362_v47  ;;  %614 = vmatpush1.msra.mxu1 %v3404_v54 }
  0x39   : > { %540 = vmatprep.subr.mxu0 %v3374_v49  ;;  %615 = vmatprep.subr.mxu1 %v3416_v56  ;;  %v3502_v56 = vld [vmem:[%s5043_s3 + $0x188] sm:$0xff] }
  0x3a   : > { %541 = vmatpush1.msra.mxu0 %v3386_v51  ;;  %616 = vmatpush1.msra.mxu1 %v3428_v58  ;;  %v499_v58 = vld [vmem:[#allocation2 + $0x8] sm:$0xff]  ;;  %5202 = vst [vmem:[#allocation21_spill] sm:$0xff] %v3502_v56 }
  0x3b   : > { %542 = vmatprep.subr.mxu0 %v3398_v53  ;;  %617 = vmatprep.subr.mxu1 %v3440_v60  ;;  %v5199_v60 = vmov 0.0   ;;  %v3537_v53 = vld [vmem:[%s5043_s3 + $0x160] sm:$0xff] }
  0x3c   : > { %543 = vmatpush1.msra.mxu0 %v3410_v55  ;;  %v3484_v55 = vld [vmem:[%s5043_s3 + $0x1a8] sm:$0xff]  ;;  %618 = vmatpush1.msra.mxu1 %v3466_v5  ;;  %v3514_v5 = vld [vmem:[%s5043_s3 + $0x180] sm:$0xff]  ;;  %5208 = vst [vmem:[#allocation27_spill] sm:$0xff] %v3537_v53 }
  0x3d   : > { %544 = vmatprep.subr.mxu0 %v3422_v57  ;;  %v3472_v57 = vld [vmem:[%s5043_s3 + $0x1c0] sm:$0xff]  ;;  %5200 = vst [vmem:[#allocation19_spill] sm:$0xff] %v3484_v55  ;;  %5204 = vst [vmem:[#allocation23_spill] sm:$0xff] %v3514_v5 }
  0x3e   : > { %545 = vmatpush1.msra.mxu0 %v3434_v59  ;;  %5197 = vst [vmem:[#allocation17_spill] sm:$0xff] %v3472_v57  ;;  %v3477_v59 = vld [vmem:[%s5042_s2 + $0x38] sm:$0xff] }
  0x3f   : > { %579 = vmatmul.mubr.f32.vlgmr.msra.gmra.mxu0 %v498_v61  ;;  %735 = vmatprep.subr.mxu0 %v3446_v62  ;;  %5198 = vst [vmem:[#allocation18_spill] sm:$0xff] %v3477_v59  ;;  %v3490_v62 = vld [vmem:[%s5043_s3 + $0x1a0] sm:$0xff] }
  0x40   : > { %736 = vmatpush1.msra.mxu0 %v3453_v63  ;;  %584 = vmatprep.mubr.f32.mxu0 %v5199_v60  ;;  %5201 = vst [vmem:[#allocation20_spill] sm:$0xff] %v3490_v62  ;;  %v3496_v63 = vld [vmem:[%s5042_s2 + $0x30] sm:$0xff] }
  0x41   : > { %737 = vmatprep.subr.mxu0 %v3460_v0  ;;  %619 = vmatprep.subr.mxu1 %v3477_v59  ;;  %v3508_v0 = vld [vmem:[%s5042_s2 + $0x18] sm:$0xff]  ;;  %v3525_v59 = vld [vmem:[%s5043_s3 + $0x168] sm:$0xff] }
  0x42   : > { %738 = vmatpush1.msra.mxu0 %v3472_v57  ;;  %5203 = vst [vmem:[#allocation22_spill] sm:$0xff] %v3508_v0  ;;  %v3519_v57 = vld [vmem:[%s5042_s2 + $0x10] sm:$0xff]  ;;  %5206 = vst [vmem:[#allocation25_spill] sm:$0xff] %v3525_v59  ;;  %620 = vmatpush1.msra.mxu1 %v3496_v63 }
  0x43   : > { %585 = vmatmul.mubr.f32.gmra.mxu0 %v499_v58  ;;  %739 = vmatprep.subr.mxu0 %v3484_v55  ;;  %5205 = vst [vmem:[#allocation24_spill] sm:$0xff] %v3519_v57  ;;  %v3531_v55 = vld [vmem:[%s5043_s3 + $0x1f8] sm:$0xff] }
  0x44   : > { %740 = vmatpush1.msra.mxu0 %v3490_v62  ;;  %5207 = vst [vmem:[#allocation26_spill] sm:$0xff] %v3531_v55  ;;  %621 = vmatprep.subr.mxu1 %v3508_v0  ;;  %v3544_v62 = vld [vmem:[%s5043_s3 + $0x148] sm:$0xff]  ;;  %v3556_v0 = vld [vmem:[%s5043_s3 + $0x140] sm:$0xff] }
  0x45   : > { %741 = vmatprep.subr.mxu0 %v3502_v56  ;;  %5209 = vst [vmem:[#allocation28_spill] sm:$0xff] %v3544_v62  ;;  %622 = vmatpush1.msra.mxu1 %v3519_v57  ;;  %v3550_v56 = vld [vmem:[%s5043_s3 + $0x1f0] sm:$0xff]  ;;  %5210 = vst [vmem:[#allocation29_spill] sm:$0xff] %v3556_v0  ;;  %v3568_v57 = vld [vmem:[%s5043_s3 + $0x128] sm:$0xff] }
  0x46   : > { %742 = vmatpush1.msra.mxu0 %v3514_v5  ;;  %812 = vmatprep.subr.mxu1 %v3531_v55  ;;  %v3562_v5 = vld [vmem:[%s5043_s3 + $0x1d8] sm:$0xff]  ;;  %5212 = vst [vmem:[#allocation31_spill] sm:$0xff] %v3568_v57  ;;  %v3579_v55 = vld [vmem:[%s5043_s3 + $0x120] sm:$0xff] }
  0x47   : > { %743 = vmatprep.subr.mxu0 %v3525_v59  ;;  %5211 = vst [vmem:[#allocation30_spill] sm:$0xff] %v3562_v5  ;;  %656 = vmatmul.mubr.f32.vlgmr.msra.gmra.mxu1 %v498_v61  ;;  %v3573_v59 = vld [vmem:[%s5043_s3 + $0x1d0] sm:$0xff]  ;;  %5214 = vst [vmem:[#allocation33_spill] sm:$0xff] %v3579_v55  ;;  %v3591_v61 = vld [vmem:[%s5043_s3 + $0x108] sm:$0xff] }
  0x48   : > { %744 = vmatpush1.msra.mxu0 %v3537_v53  ;;  %5213 = vst [vmem:[#allocation32_spill] sm:$0xff] %v3573_v59  ;;  %813 = vmatpush1.msra.mxu1 %v3550_v56  ;;  %v3585_v53 = vld [vmem:[%s5043_s3 + $0x1b8] sm:$0xff]  ;;  %5216 = vst [vmem:[#allocation35_spill] sm:$0xff] %v3591_v61 }
  0x49   : > { %745 = vmatprep.subr.mxu0 %v3544_v62  ;;  %5215 = vst [vmem:[#allocation34_spill] sm:$0xff] %v3585_v53  ;;  %814 = vmatprep.subr.mxu1 %v3562_v5  ;;  %v3598_v62 = vld [vmem:[%s5043_s3 + $0x100] sm:$0xff]  ;;  %v3610_v5 = vld [vmem:[%s5043_s3 + $0xe8] sm:$0xff] }
  0x4a   : > { %746 = vmatpush1.msra.mxu0 %v3556_v0  ;;  %5217 = vst [vmem:[#allocation36_spill] sm:$0xff] %v3598_v62  ;;  %815 = vmatpush1.msra.mxu1 %v3573_v59  ;;  %v3604_v0 = vld [vmem:[%s5043_s3 + $0x1b0] sm:$0xff]  ;;  %5219 = vst [vmem:[#allocation38_spill] sm:$0xff] %v3610_v5  ;;  %v3641_v59 = vld [vmem:[%s5043_s3 + $0xc0] sm:$0xff] }
  0x4b   : > { %747 = vmatprep.subr.mxu0 %v3568_v57  ;;  %5218 = vst [vmem:[#allocation37_spill] sm:$0xff] %v3604_v0  ;;  %816 = vmatprep.subr.mxu1 %v3585_v53  ;;  %v3617_v57 = vld [vmem:[%s5043_s3 + $0xe0] sm:$0xff]  ;;  %v3629_v53 = vld [vmem:[%s5043_s3 + $0xc8] sm:$0xff]  ;;  %5224 = vst [vmem:[#allocation43_spill] sm:$0xff] %v3641_v59 }
  0x4c   : > { %748 = vmatpush1.msra.mxu0 %v3579_v55  ;;  %5220 = vst [vmem:[#allocation39_spill] sm:$0xff] %v3617_v57  ;;  %661 = vmatprep.mubr.f32.mxu1 %v5199_v60  ;;  %v3623_v55 = vld [vmem:[%s5043_s3 + $0x198] sm:$0xff]  ;;  %5222 = vst [vmem:[#allocation41_spill] sm:$0xff] %v3629_v53 }
  0x4d   : > { %749 = vmatprep.subr.mxu0 %v3591_v61  ;;  %5221 = vst [vmem:[#allocation40_spill] sm:$0xff] %v3623_v55  ;;  %817 = vmatpush1.msra.mxu1 %v3604_v0  ;;  %v3635_v61 = vld [vmem:[%s5043_s3 + $0x190] sm:$0xff]  ;;  %v3652_v0 = vld [vmem:[%s5043_s3 + $0xa8] sm:$0xff] }
  0x4e   : > { %750 = vmatpush1.msra.mxu0 %v3598_v62  ;;  %5223 = vst [vmem:[#allocation42_spill] sm:$0xff] %v3635_v61  ;;  %662 = vmatmul.mubr.f32.gmra.mxu1 %v499_v58  ;;  %v3646_v62 = vld [vmem:[%s5043_s3 + $0x178] sm:$0xff]  ;;  %5226 = vst [vmem:[#allocation45_spill] sm:$0xff] %v3652_v0  ;;  %v3664_v58 = vld [vmem:[%s5043_s3 + $0xa0] sm:$0xff] }
  0x4f   : > { %751 = vmatprep.subr.mxu0 %v3610_v5  ;;  %5225 = vst [vmem:[#allocation44_spill] sm:$0xff] %v3646_v62  ;;  %818 = vmatprep.subr.mxu1 %v3623_v55  ;;  %v3658_v5 = vld [vmem:[%s5043_s3 + $0x170] sm:$0xff]  ;;  %5228 = vst [vmem:[#allocation47_spill] sm:$0xff] %v3664_v58  ;;  %v3676_v55 = vld [vmem:[%s5043_s3 + $0x88] sm:$0xff] }
  0x50   : > { %752 = vmatpush1.msra.mxu0 %v3617_v57  ;;  %5227 = vst [vmem:[#allocation46_spill] sm:$0xff] %v3658_v5  ;;  %819 = vmatpush1.msra.mxu1 %v3635_v61  ;;  %v3670_v57 = vld [vmem:[%s5043_s3 + $0x158] sm:$0xff]  ;;  %5230 = vst [vmem:[#allocation49_spill] sm:$0xff] %v3676_v55  ;;  %v3688_v61 = vld [vmem:[%s5043_s3 + $0x80] sm:$0xff] }
  0x51   : > { %753 = vmatprep.subr.mxu0 %v3629_v53  ;;  %5229 = vst [vmem:[#allocation48_spill] sm:$0xff] %v3670_v57  ;;  %820 = vmatprep.subr.mxu1 %v3646_v62  ;;  %v3682_v53 = vld [vmem:[%s5043_s3 + $0x150] sm:$0xff]  ;;  %5232 = vst [vmem:[#allocation51_spill] sm:$0xff] %v3688_v61  ;;  %v3700_v62 = vld [vmem:[%s5043_s3 + $0x68] sm:$0xff] }
  0x52   : > { %754 = vmatpush1.msra.mxu0 %v3641_v59  ;;  %5231 = vst [vmem:[#allocation50_spill] sm:$0xff] %v3682_v53  ;;  %821 = vmatpush1.msra.mxu1 %v3658_v5  ;;  %v3694_v59 = vld [vmem:[%s5043_s3 + $0x138] sm:$0xff]  ;;  %5234 = vst [vmem:[#allocation53_spill] sm:$0xff] %v3700_v62  ;;  %v3712_v5 = vld [vmem:[%s5043_s3 + $0x60] sm:$0xff] }
  0x53   : > { %755 = vmatprep.subr.mxu0 %v3652_v0  ;;  %5233 = vst [vmem:[#allocation52_spill] sm:$0xff] %v3694_v59  ;;  %822 = vmatprep.subr.mxu1 %v3670_v57  ;;  %v3706_v0 = vld [vmem:[%s5043_s3 + $0x130] sm:$0xff]  ;;  %5236 = vst [vmem:[#allocation55_spill] sm:$0xff] %v3712_v5  ;;  %v3724_v57 = vld [vmem:[%s5043_s3 + $0x48] sm:$0xff] }
  0x54   : > { %756 = vmatpush1.msra.mxu0 %v3664_v58  ;;  %5235 = vst [vmem:[#allocation54_spill] sm:$0xff] %v3706_v0  ;;  %823 = vmatpush1.msra.mxu1 %v3682_v53  ;;  %v3718_v58 = vld [vmem:[%s5043_s3 + $0x118] sm:$0xff]  ;;  %5238 = vst [vmem:[#allocation57_spill] sm:$0xff] %v3724_v57  ;;  %v3779_v53 = vld [vmem:[%s5043_s3] sm:$0xff] }
  0x55   : > { %757 = vmatprep.subr.mxu0 %v3676_v55  ;;  %5237 = vst [vmem:[#allocation56_spill] sm:$0xff] %v3718_v58  ;;  %824 = vmatprep.subr.mxu1 %v3694_v59  ;;  %v3731_v55 = vld [vmem:[%s5043_s3 + $0x40] sm:$0xff]  ;;  %v3743_v59 = vld [vmem:[%s5043_s3 + $0x28] sm:$0xff]  ;;  %5246 = vst [vmem:[#allocation65_spill] sm:$0xff] %v3779_v53 }
  0x56   : > { %758 = vmatpush1.msra.mxu0 %v3688_v61  ;;  %5239 = vst [vmem:[#allocation58_spill] sm:$0xff] %v3731_v55  ;;  %825 = vmatpush1.msra.mxu1 %v3706_v0  ;;  %v3737_v61 = vld [vmem:[%s5043_s3 + $0x110] sm:$0xff]  ;;  %5241 = vst [vmem:[#allocation60_spill] sm:$0xff] %v3743_v59  ;;  %v3755_v0 = vld [vmem:[%s5043_s3 + $0x20] sm:$0xff] }
  0x57   : > { %759 = vmatprep.subr.mxu0 %v3700_v62  ;;  %5240 = vst [vmem:[#allocation59_spill] sm:$0xff] %v3737_v61  ;;  %826 = vmatprep.subr.mxu1 %v3718_v58  ;;  %v3749_v62 = vld [vmem:[%s5043_s3 + $0xf8] sm:$0xff]  ;;  %5243 = vst [vmem:[#allocation62_spill] sm:$0xff] %v3755_v0  ;;  %v3767_v58 = vld [vmem:[%s5043_s3 + $0x8] sm:$0xff] }
  0x58   : > { %760 = vmatpush1.msra.mxu0 %v3712_v5  ;;  %5242 = vst [vmem:[#allocation61_spill] sm:$0xff] %v3749_v62  ;;  %799 = vmatprep.mubr.f32.mxu0 %v5199_v60  ;;  %v3761_v5 = vld [vmem:[%s5043_s3 + $0xf0] sm:$0xff]  ;;  %5244 = vst [vmem:[#allocation63_spill] sm:$0xff] %v3767_v58 }
  0x59   : > { %761 = vmatprep.subr.mxu0 %v3724_v57  ;;  %827 = vmatpush1.msra.mxu1 %v3737_v61  ;;  %v3773_v57 = vld [vmem:[%s5043_s3 + $0xd8] sm:$0xff]  ;;  %v502_v61 = vld [vmem:[#allocation4 + $0x8] sm:$0xff] }
  0x5a   : > { %762 = vmatpush1.msra.mxu0 %v3731_v55  ;;  %5245 = vst [vmem:[#allocation64_spill] sm:$0xff] %v3773_v57  ;;  %828 = vmatprep.subr.mxu1 %v3749_v62  ;;  %v3785_v55 = vld [vmem:[%s5043_s3 + $0xd0] sm:$0xff] }
  0x5b   : > { %763 = vmatprep.subr.mxu0 %v3743_v59  ;;  %829 = vmatpush1.msra.mxu1 %v3761_v5  ;;  %v3792_v59 = vld [vmem:[%s5043_s3 + $0xb8] sm:$0xff]  ;;  %v3799_v62 = vld [vmem:[%s5043_s3 + $0xb0] sm:$0xff] }
  0x5c   : > { %764 = vmatpush1.msra.mxu0 %v3755_v0  ;;  %5247 = vst [vmem:[#allocation66_spill] sm:$0xff] %v3792_v59  ;;  %830 = vmatprep.subr.mxu1 %v3773_v57  ;;  %5248 = vst [vmem:[#allocation67_spill] sm:$0xff] %v3799_v62  ;;  %v3806_v0 = vld [vmem:[%s5043_s3 + $0x98] sm:$0xff]  ;;  %v503_v57 = vld [vmem:[#allocation4] sm:$0xff] }
  0x5d   : > { %765 = vmatprep.subr.mxu0 %v3767_v58  ;;  %831 = vmatpush1.msra.mxu1 %v3785_v55  ;;  %5249 = vst [vmem:[#allocation68_spill] sm:$0xff] %v3806_v0  ;;  %v3812_v58 = vld [vmem:[%s5043_s3 + $0x90] sm:$0xff] }
  0x5e   : > { %766 = vmatpush1.msra.mxu0 %v3779_v53  ;;  %832 = vmatprep.subr.mxu1 %v3792_v59  ;;  %5250 = vst [vmem:[#allocation69_spill] sm:$0xff] %v3812_v58  ;;  %v3819_v53 = vld [vmem:[%s5043_s3 + $0x78] sm:$0xff]  ;;  %v3825_v59 = vld [vmem:[%s5043_s3 + $0x70] sm:$0xff] }
  0x5f   : > { %800 = vmatmul.mubr.f32.vlgmr.msra.gmra.mxu0 %v502_v61  ;;  %833 = vmatpush1.msra.mxu1 %v3799_v62  ;;  %5251 = vst [vmem:[#allocation70_spill] sm:$0xff] %v3825_v59  ;;  %v3832_v62 = vld [vmem:[%s5043_s3 + $0x58] sm:$0xff] }
  0x60   : > { %805 = vmatprep.mubr.f32.mxu0 %v5199_v60  ;;  %834 = vmatprep.subr.mxu1 %v3806_v0  ;;  %v3839_v0 = vld [vmem:[%s5043_s3 + $0x50] sm:$0xff] }
  0x61   : > { %876 = vmatprep.mubr.f32.mxu1 %v5199_v60  ;;  %835 = vmatpush1.msra.mxu1 %v3812_v58  ;;  %v3845_v58 = vld [vmem:[%s5043_s3 + $0x38] sm:$0xff] }
  0x62   : > { %957 = vmatprep.subr.mxu0 %v3095_v1  ;;  %836 = vmatprep.subr.mxu1 %v3819_v53  ;;  %v3852_v1 = vld [vmem:[%s5043_s3 + $0x30] sm:$0xff] }
  0x63   : > { %806 = vmatmul.mubr.f32.gmra.mxu0 %v503_v57  ;;  %837 = vmatpush1.msra.mxu1 %v3825_v59  ;;  %v3859_v59 = vld [vmem:[%s5043_s3 + $0x18] sm:$0xff] }
  0x64   : > { %958 = vmatpush1.msra.mxu0 %v3100_v2  ;;  %838 = vmatprep.subr.mxu1 %v3832_v62  ;;  %v3866_v2 = vld [vmem:[%s5043_s3 + $0x10] sm:$0xff] }
  0x65   : > { %959 = vmatprep.subr.mxu0 %v3105_v3  ;;  %839 = vmatpush1.msra.mxu1 %v3839_v0  ;;  %v5252_v3 = vld [vmem:[#allocation6_spill] sm:$0xff] }
  0x66   : > { %960 = vmatpush1.msra.mxu0 %v3111_v4  ;;  %840 = vmatprep.subr.mxu1 %v3845_v58  ;;  %v5253_v4 = vld [vmem:[#allocation8_spill] sm:$0xff] }
  0x67   : > { %961 = vmatprep.subr.mxu0 %v3118_v6  ;;  %841 = vmatpush1.msra.mxu1 %v3852_v1  ;;  %v5254_v6 = vld [vmem:[#allocation7_spill] sm:$0xff] }
  0x68   : > { %962 = vmatpush1.msra.mxu0 %v3125_v7  ;;  %842 = vmatprep.subr.mxu1 %v3859_v59  ;;  %v5255_v7 = vld [vmem:[#allocation10_spill] sm:$0xff] }
  0x69   : > { %963 = vmatprep.subr.mxu0 %v3131_v8  ;;  %843 = vmatpush1.msra.mxu1 %v3866_v2  ;;  %v5256_v8 = vld [vmem:[#allocation9_spill] sm:$0xff] }
  0x6a   : > { %964 = vmatpush1.msra.mxu0 %v3137_v9  ;;  %877 = vmatmul.mubr.f32.vlgmr.msra.gmra.mxu1 %v502_v61  ;;  %v5257_v9 = vld [vmem:[#allocation12_spill] sm:$0xff]  ;;  %v2480_v61 = vld [vmem:[%s3080_s8 + $0xc0] sm:$0xff] }
  0x6b   : > { %1034 = vmatprep.subr.mxu1 %v3142_v10  ;;  %882 = vmatprep.mubr.f32.mxu1 %v5199_v60  ;;  %v5258_v10 = vld [vmem:[#allocation11_spill] sm:$0xff] }
  0x6c   : > { %1035 = vmatpush1.msra.mxu1 %v3154_v12  ;;  %965 = vmatprep.subr.mxu0 %v3148_v11  ;;  %v5259_v11 = vld [vmem:[#allocation16_spill] sm:$0xff]  ;;  %v5260_v12 = vld [vmem:[#allocation18_spill] sm:$0xff] }
  0x6d   : > { %1036 = vmatprep.subr.mxu1 %v3166_v14  ;;  %966 = vmatpush1.msra.mxu0 %v3160_v13  ;;  %v5261_v13 = vld [vmem:[#allocation13_spill] sm:$0xff]  ;;  %v5262_v14 = vld [vmem:[#allocation22_spill] sm:$0xff] }
  0x6e   : > { %1037 = vmatpush1.msra.mxu1 %v3171_v15  ;;  %967 = vmatprep.subr.mxu0 %v3177_v16  ;;  %v5263_v15 = vld [vmem:[#allocation24_spill] sm:$0xff]  ;;  %v5264_v16 = vld [vmem:[#allocation26_spill] sm:$0xff] }
  0x6f   : > { %883 = vmatmul.mubr.f32.gmra.mxu1 %v503_v57  ;;  %1038 = vmatprep.subr.mxu1 %v3183_v17  ;;  %v506_v17 = vld [vmem:[%s3075_s29] sm:$0xff] }
  0x70   : > { %1039 = vmatpush1.msra.mxu1 %v3195_v19  ;;  %968 = vmatpush1.msra.mxu0 %v3189_v18  ;;  %v507_v19 = vld [vmem:[%s3075_s29 + $0x8] sm:$0xff] }
  0x71   : > { %1040 = vmatprep.subr.mxu1 %v3200_v20  ;;  %969 = vmatprep.subr.mxu0 %v3206_v21 }
  0x72   : > { %1041 = vmatpush1.msra.mxu1 %v3212_v22  ;;  %970 = vmatpush1.msra.mxu0 %v3218_v23  ;;  %v510_v22 = vld [vmem:[%s3075_s29 + $0x20] sm:$0xff] }
  0x73   : > { %1042 = vmatprep.subr.mxu1 %v3224_v24  ;;  %971 = vmatprep.subr.mxu0 %v3230_v25 }
  0x74   : > { %1043 = vmatpush1.msra.mxu1 %v3236_v26  ;;  %972 = vmatpush1.msra.mxu0 %v3242_v27  ;;  %v511_v26 = vld [vmem:[%s3075_s29 + $0x28] sm:$0xff] }
  0x75   : > { %1044 = vmatprep.subr.mxu1 %v3248_v28  ;;  %973 = vmatprep.subr.mxu0 %v3254_v29 }
  0x76   : > { %1045 = vmatpush1.msra.mxu1 %v3260_v30  ;;  %974 = vmatpush1.msra.mxu0 %v3266_v31 }
  0x77   : > { %1046 = vmatprep.subr.mxu1 %v3272_v32  ;;  %975 = vmatprep.subr.mxu0 %v3278_v33 }
  0x78   : > { %1047 = vmatpush1.msra.mxu1 %v3284_v34  ;;  %976 = vmatpush1.msra.mxu0 %v3290_v35  ;;  %v509_v34 = vld [vmem:[%s3075_s29 + $0x18] sm:$0xff] }
  0x79   : > { %1048 = vmatprep.subr.mxu1 %v3296_v36  ;;  %977 = vmatprep.subr.mxu0 %v3302_v37  ;;  %v508_v36 = vld [vmem:[%s3075_s29 + $0x10] sm:$0xff] }
  0x7a   : > { %1049 = vmatpush1.msra.mxu1 %v3308_v38  ;;  %978 = vmatpush1.msra.mxu0 %v3314_v39 }
  0x7b   : > { %1050 = vmatprep.subr.mxu1 %v3320_v40  ;;  %979 = vmatprep.subr.mxu0 %v3326_v41  ;;  %v512_v40 = vld [vmem:[%s3075_s29 + $0x30] sm:$0xff] }
  0x7c   : > { %1051 = vmatpush1.msra.mxu1 %v3332_v42  ;;  %980 = vmatpush1.msra.mxu0 %v3338_v43  ;;  %v513_v42 = vld [vmem:[%s3075_s29 + $0x38] sm:$0xff] }
  0x7d   : > { %1052 = vmatprep.subr.mxu1 %v3344_v44  ;;  %981 = vmatprep.subr.mxu0 %v3350_v45 }
  0x7e   : > { %1053 = vmatpush1.msra.mxu1 %v3356_v46  ;;  %982 = vmatpush1.msra.mxu0 %v3362_v47 }
  0x7f   : > { %1054 = vmatprep.subr.mxu1 %v3368_v48  ;;  %983 = vmatprep.subr.mxu0 %v3374_v49 }
  0x80   : > { %1055 = vmatpush1.msra.mxu1 %v3380_v50  ;;  %984 = vmatpush1.msra.mxu0 %v3386_v51 }
  0x81   : > { %1056 = vmatprep.subr.mxu1 %v3392_v52  ;;  %985 = vmatprep.subr.mxu0 %v5252_v3 }
  0x82   : > { %1057 = vmatpush1.msra.mxu1 %v3404_v54  ;;  %986 = vmatpush1.msra.mxu0 %v5254_v6 }
  0x83   : > { %1058 = vmatprep.subr.mxu1 %v5253_v4  ;;  %987 = vmatprep.subr.mxu0 %v5256_v8 }
  0x84   : > { %1059 = vmatpush1.msra.mxu1 %v5255_v7  ;;  %988 = vmatpush1.msra.mxu0 %v5258_v10  ;;  %v2481_v7 = vld [vmem:[%s3080_s8 + $0xc8] sm:$0xff]  ;;  %v500_v10 = vld [vmem:[#allocation3 + $0x8] sm:$0xff] }
  0x85   : > { %1060 = vmatprep.subr.mxu1 %v5257_v9  ;;  %1021 = vmatprep.mubr.f32.mxu0 %v5199_v60 }
  0x86   : > { %1061 = vmatpush1.msra.mxu1 %v5259_v11  ;;  %1098 = vmatprep.mubr.f32.mxu1 %v5199_v60 }
  0x87   : > { %1062 = vmatprep.subr.mxu1 %v5260_v12  ;;  %1179 = vmatprep.subr.mxu0 %v5261_v13 }
  0x88   : > { %1063 = vmatpush1.msra.mxu1 %v3496_v63 }
  0x89   : > { %1064 = vmatprep.subr.mxu1 %v5262_v14 }
  0x8a   : > { %1065 = vmatpush1.msra.mxu1 %v5263_v15 }
  0x8b   : > { %1256 = vmatprep.subr.mxu1 %v5264_v16 }
  0xff   : > { %v580_v18 = vpop.f32.mrf.mxu0 }
 0x100   : > { %v668_v20 = vadd.f32 %v580_v18, %v506_v17  ;;  %v2484_v18 = vld [vmem:[%s3080_s8 + $0xe0] sm:$0xff] }
 0x101   : > { %v582_v21 = vpop.f32.mrf.mxu0 }
 0x102   : > { %v2474_v23 = vmul.f32 -1.442695, %v668_v20  ;;  %v669_v24 = vadd.f32 %v582_v21, %v507_v19 }
 0x103   : > { %v586_v25 = vpop.f32.mrf.mxu0 }
 0x104   : > { %2614 = vpow2.f32 %v2474_v23  ;;  %v2476_v27 = vmul.f32 -1.442695, %v669_v24  ;;  %v672_v28 = vadd.f32 %v586_v25, %v510_v22 }
 0x105   : > { %v588_v29 = vpop.f32.mrf.mxu0 }
 0x106   : > { %2616 = vpow2.f32 %v2476_v27  ;;  %v2475_v30 = vmul.f32 -1.442695, %v672_v28  ;;  %v673_v31 = vadd.f32 %v588_v29, %v511_v26  ;;  %v2485_v29 = vld [vmem:[%s3080_s8 + $0xe8] sm:$0xff] }
 0x107   : > { %v657_v33 = vpop.f32.mrf.mxu1 }
 0x108   : > { %2618 = vpow2.f32 %v2475_v30  ;;  %v2477_v32 = vmul.f32 -1.442695, %v673_v31  ;;  %v670_v39 = vadd.f32 %v657_v33, %v508_v36  ;;  %v501_v31 = vld [vmem:[#allocation3] sm:$0xff] }
 0x109   : > { %v659_v35 = vpop.f32.mrf.mxu1 }
 0x10a   : > { %2620 = vpow2.f32 %v2477_v32  ;;  %v671_v37 = vadd.f32 %v659_v35, %v509_v34 }
 0x10c   : > { %v2478_v38 = vmul.f32 -1.442695, %v671_v37 }
 0x10e   : > { %v663_v41 = vpop.f32.mrf.mxu1  ;;  %2622 = vpow2.f32 %v2478_v38 }
 0x10f   : > { %v674_v44 = vadd.f32 %v663_v41, %v512_v40  ;;  %2624 = vtanh.f32 %v670_v39 }
 0x110   : > { %v665_v45 = vpop.f32.mrf.mxu1 }
 0x111   : > { %v2615_v43 = vpop.eup %2614  ;;  %v675_v47 = vadd.f32 %v665_v45, %v513_v42  ;;  %v2482_v42 = vld [vmem:[%s3080_s8 + $0xd0] sm:$0xff] }
 0x112   : > { %v682_v46 = vadd.f32 1.0, %v2615_v43 }
 0x113   : > { %v2617_v48 = vpop.eup %2616  ;;  %v2479_v50 = vmul.f32 -1.442695, %v675_v47 }
 0x114   : > { %2626 = vrcp.f32 %v682_v46  ;;  %v694_v49 = vadd.f32 1.0, %v2617_v48 }
 0x115   : > { %v2619_v51 = vpop.eup %2618  ;;  %2628 = vtanh.f32 %v674_v44  ;;  %v2483_v44 = vld [vmem:[%s3080_s8 + $0xd8] sm:$0xff] }
 0x116   : > { %2630 = vrcp.f32 %v694_v49  ;;  %v683_v52 = vadd.f32 1.0, %v2619_v51  ;;  %v2487_v49 = vld [vmem:[%s3080_s8 + $0xf8] sm:$0xff]  ;;  %v2486_v51 = vld [vmem:[%s3080_s8 + $0xf0] sm:$0xff] }
 0x117   : > { %v2621_v54 = vpop.eup %2620  ;;  %2632 = vpow2.f32 %v2479_v50 }
 0x118   : > { %2634 = vrcp.f32 %v683_v52  ;;  %v695_v57 = vadd.f32 1.0, %v2621_v54 }
 0x11a   : > { %2636 = vrcp.f32 %v695_v57 }
 0x11b   : > { %v2623_v3 = vpop.eup %2622 }
 0x11c   : > { %v2625_v4 = vpop.eup %2624  ;;  %v708_v13 = vadd.f32 1.0, %v2623_v3 }
 0x11f   : > { %v801_v6 = vpop.f32.mrf.mxu0 }
 0x120   : > { %v889_v8 = vadd.f32 %v2480_v61, %v801_v6 }
 0x121   : > { %v2627_v9 = vpop.eup %2626  ;;  %v803_v17 = vpop.f32.mrf.mxu0 }
 0x122   : > { %v2629_v19 = vpop.eup %2628  ;;  %v716_v20 = vmul.f32 %v2627_v9, %v2625_v4  ;;  %v2488_v21 = vmul.f32 -1.442695, %v889_v8  ;;  %v890_v22 = vadd.f32 %v2481_v7, %v803_v17 }
 0x123   : > { %v2631_v23 = vpop.eup %2630  ;;  %v807_v24 = vpop.f32.mrf.mxu0 }
 0x124   : > { %v2633_v25 = vpop.eup %2632  ;;  %v714_v26 = vmul.f32 %v2631_v23, %v500_v10  ;;  %2638 = vpow2.f32 %v2488_v21  ;;  %v2490_v27 = vmul.f32 -1.442695, %v890_v22  ;;  %v893_v28 = vadd.f32 %v2484_v18, %v807_v24  ;;  %v5265_v22 = vld [vmem:[#allocation14_spill] sm:$0xff]  ;;  %v5266_v23 = vld [vmem:[#allocation15_spill] sm:$0xff] }
 0x125   : > { %v2635_v30 = vpop.eup %2634  ;;  %2640 = vrcp.f32 %v708_v13  ;;  %v709_v32 = vadd.f32 1.0, %v2633_v25  ;;  %v809_v33 = vpop.f32.mrf.mxu0  ;;  %v5267_v24 = vld [vmem:[#allocation30_spill] sm:$0xff] }
 0x126   : > { %v3948_v34 = vadd.f32 %v716_v20, %v714_v26  ;;  %v717_v35 = vmul.f32 %v2635_v30, %v2629_v19  ;;  %2642 = vpow2.f32 %v2490_v27  ;;  %v2489_v36 = vmul.f32 -1.442695, %v893_v28  ;;  %v5268_v26 = vld [vmem:[#allocation17_spill] sm:$0xff]  ;;  %v5269_v27 = vld [vmem:[#allocation32_spill] sm:$0xff]  ;;  %v5270_v28 = vld [vmem:[#allocation19_spill] sm:$0xff] }
 0x127   : > { %v2637_v37 = vpop.eup %2636  ;;  %v894_v38 = vadd.f32 %v2485_v29, %v809_v33  ;;  %v5272_v29 = vld [vmem:[#allocation20_spill] sm:$0xff]  ;;  %v5273_v30 = vld [vmem:[#allocation37_spill] sm:$0xff] }
 0x128   : > { %2644 = vtanh.f32 %v3948_v34  ;;  %v715_v39 = vmul.f32 %v2637_v37, %v501_v31  ;;  %v5275_v33 = vld [vmem:[#allocation40_spill] sm:$0xff]  ;;  %v5277_v37 = vld [vmem:[#allocation42_spill] sm:$0xff] }
 0x129   : > { %2646 = vpow2.f32 %v2489_v36  ;;  %v2491_v40 = vmul.f32 -1.442695, %v894_v38  ;;  %v5276_v36 = vld [vmem:[#allocation23_spill] sm:$0xff] }
 0x12a   : > { %v3951_v41 = vadd.f32 %v717_v35, %v715_v39  ;;  %2648 = vrcp.f32 %v709_v32  ;;  %v878_v43 = vpop.f32.mrf.mxu1  ;;  %v5274_v32 = vld [vmem:[#allocation21_spill] sm:$0xff]  ;;  %v504_v39 = vld [vmem:[#allocation5] sm:$0xff] }
 0x12b   : > { %2650 = vpow2.f32 %v2491_v40  ;;  %v891_v46 = vadd.f32 %v2482_v42, %v878_v43  ;;  %v5278_v40 = vld [vmem:[#allocation25_spill] sm:$0xff]  ;;  %v5279_v42 = vld [vmem:[#allocation44_spill] sm:$0xff]  ;;  %v5280_v43 = vld [vmem:[#allocation27_spill] sm:$0xff] }
 0x12c   : > { %2652 = vtanh.f32 %v3951_v41  ;;  %v880_v45 = vpop.f32.mrf.mxu1 }
 0x12d   : > { %v892_v47 = vadd.f32 %v2483_v44, %v880_v45  ;;  %2654 = vtanh.f32 %v891_v46  ;;  %v5281_v44 = vld [vmem:[#allocation46_spill] sm:$0xff] }
 0x12f   : > { %v884_v48 = vpop.f32.mrf.mxu1  ;;  %v2492_v50 = vmul.f32 -1.442695, %v892_v47  ;;  %v5282_v47 = vld [vmem:[#allocation28_spill] sm:$0xff] }
 0x130   : > { %v895_v6 = vadd.f32 %v2486_v51, %v884_v48  ;;  %v5283_v48 = vld [vmem:[#allocation48_spill] sm:$0xff] }
 0x131   : > { %v2639_v52 = vpop.eup %2638  ;;  %v886_v54 = vpop.f32.mrf.mxu1  ;;  %2656 = vpow2.f32 %v2492_v50 }
 0x132   : > { %v2641_v57 = vpop.eup %2640  ;;  %v903_v61 = vadd.f32 1.0, %v2639_v52  ;;  %v896_v3 = vadd.f32 %v2487_v49, %v886_v54  ;;  %v5284_v52 = vld [vmem:[#allocation29_spill] sm:$0xff]  ;;  %v5285_v54 = vld [vmem:[#allocation50_spill] sm:$0xff] }
 0x133   : > { %v2643_v4 = vpop.eup %2642 }
 0x134   : > { %2658 = vrcp.f32 %v903_v61  ;;  %v915_v7 = vadd.f32 1.0, %v2643_v4  ;;  %v2493_v8 = vmul.f32 -1.442695, %v896_v3  ;;  %v5286_v61 = vld [vmem:[#allocation31_spill] sm:$0xff]  ;;  %v5287_v3 = vld [vmem:[#allocation52_spill] sm:$0xff] }
 0x135   : > { %v2645_v9 = vpop.eup %2644 }
 0x136   : > { %v2647_v10 = vpop.eup %2646  ;;  %2660 = vrcp.f32 %v915_v7  ;;  %v722_v13 = vmul.f32 %v2645_v9, %v2641_v57  ;;  %v505_v7 = vld [vmem:[#allocation5 + $0x8] sm:$0xff]  ;;  %v5289_v9 = vld [vmem:[#allocation54_spill] sm:$0xff] }
 0x137   : > { %v2649_v17 = vpop.eup %2648  ;;  %v904_v18 = vadd.f32 1.0, %v2647_v10  ;;  %2662 = vtanh.f32 %v895_v6  ;;  %v5290_v10 = vld [vmem:[#allocation35_spill] sm:$0xff] }
 0x138   : > { %v2651_v19 = vpop.eup %2650  ;;  %2664 = vpow2.f32 %v2493_v8  ;;  %724 = vst [vmem:[%s3085_s11] sm:$0xff] %v722_v13  ;;  %1022 = vmatmul.mubr.f32.vlgmr.msra.gmra.mxu0 %v722_v13  ;;  %1099 = vmatmul.mubr.f32.vlgmr.msra.gmra.mxu1 %v722_v13  ;;  %v5288_v8 = vld [vmem:[#allocation33_spill] sm:$0xff]  ;;  %v5291_v13 = vld [vmem:[#allocation56_spill] sm:$0xff] }
 0x139   : > { %v2653_v20 = vpop.eup %2652  ;;  %2666 = vrcp.f32 %v904_v18  ;;  %v916_v21 = vadd.f32 1.0, %v2651_v19  ;;  %1180 = vmatpush1.msra.mxu0 %v5265_v22  ;;  %1257 = vmatpush1.msra.mxu1 %v3550_v56  ;;  %v5271_v56 = vld [vmem:[#allocation34_spill] sm:$0xff]  ;;  %v5292_v19 = vld [vmem:[#allocation36_spill] sm:$0xff] }
 0x13a   : > { %1181 = vmatprep.subr.mxu0 %v5266_v23  ;;  %1258 = vmatprep.subr.mxu1 %v5267_v24  ;;  %v3963_v25 = vmul.f32 %v2653_v20, %v2649_v17  ;;  %v2655_v31 = vpop.eup %2654  ;;  %v5293_v20 = vld [vmem:[#allocation59_spill] sm:$0xff]  ;;  %v5294_v23 = vld [vmem:[#allocation38_spill] sm:$0xff]  ;;  %v5295_v24 = vld [vmem:[#allocation61_spill] sm:$0xff] }
 0x13b   : > { %2668 = vrcp.f32 %v916_v21  ;;  %1027 = vmatprep.mubr.f32.mxu0 %v5199_v60  ;;  %1182 = vmatpush1.msra.mxu0 %v5268_v26  ;;  %v5296_v26 = vld [vmem:[#allocation39_spill] sm:$0xff] }
 0x13c   : > { %1259 = vmatpush1.msra.mxu1 %v5269_v27  ;;  %725 = vst [vmem:[%s3085_s11 + $0x8] sm:$0xff] %v3963_v25  ;;  %1028 = vmatmul.mubr.f32.gmra.mxu0 %v3963_v25 }
 0x13d   : > { %1183 = vmatprep.subr.mxu0 %v5270_v28  ;;  %1260 = vmatprep.subr.mxu1 %v5271_v56  ;;  %v5297_v28 = vld [vmem:[#allocation41_spill] sm:$0xff]  ;;  %v5298_v56 = vld [vmem:[#allocation64_spill] sm:$0xff] }
 0x13e   : > { %1184 = vmatpush1.msra.mxu0 %v5272_v29  ;;  %1261 = vmatpush1.msra.mxu1 %v5273_v30  ;;  %v2657_v35 = vpop.eup %2656  ;;  %v5299_v29 = vld [vmem:[#allocation43_spill] sm:$0xff]  ;;  %v5300_v30 = vld [vmem:[#allocation45_spill] sm:$0xff] }
 0x13f   : > { %1185 = vmatprep.subr.mxu0 %v5274_v32  ;;  %1262 = vmatprep.subr.mxu1 %v5275_v33  ;;  %v929_v46 = vadd.f32 1.0, %v2657_v35  ;;  %v5303_v32 = vld [vmem:[#allocation67_spill] sm:$0xff]  ;;  %v5304_v33 = vld [vmem:[#allocation49_spill] sm:$0xff]  ;;  %v5305_v35 = vld [vmem:[#allocation68_spill] sm:$0xff] }
 0x140   : > { %1186 = vmatpush1.msra.mxu0 %v5276_v36  ;;  %1263 = vmatpush1.msra.mxu1 %v5277_v37  ;;  %v5306_v36 = vld [vmem:[#allocation51_spill] sm:$0xff]  ;;  %v5308_v37 = vld [vmem:[#allocation53_spill] sm:$0xff] }
 0x141   : > { %v2659_v38 = vpop.eup %2658  ;;  %1187 = vmatprep.subr.mxu0 %v5278_v40  ;;  %1264 = vmatprep.subr.mxu1 %v5279_v42  ;;  %2670 = vrcp.f32 %v929_v46  ;;  %v5311_v42 = vld [vmem:[#allocation57_spill] sm:$0xff]  ;;  %v5315_v46 = vld [vmem:[#allocation63_spill] sm:$0xff] }
 0x142   : > { %1188 = vmatpush1.msra.mxu0 %v5280_v43  ;;  %1265 = vmatpush1.msra.mxu1 %v5281_v44  ;;  %v937_v51 = vmul.f32 %v2659_v38, %v2655_v31  ;;  %v5301_v31 = vld [vmem:[#allocation66_spill] sm:$0xff]  ;;  %v5309_v38 = vld [vmem:[#allocation55_spill] sm:$0xff]  ;;  %v5313_v44 = vld [vmem:[#allocation60_spill] sm:$0xff] }
 0x143   : > { %v2661_v45 = vpop.eup %2660  ;;  %1189 = vmatprep.subr.mxu0 %v5282_v47  ;;  %1266 = vmatprep.subr.mxu1 %v5283_v48  ;;  %v5312_v43 = vld [vmem:[#allocation58_spill] sm:$0xff]  ;;  %v5316_v47 = vld [vmem:[#allocation65_spill] sm:$0xff]  ;;  %v4062_v48 = vld [vmem:[%s5042_s2 + $0x1f0] sm:$0xff] }
 0x144   : > { %v2663_v49 = vpop.eup %2662  ;;  %v935_v50 = vmul.f32 %v2661_v45, %v504_v39  ;;  %1190 = vmatpush1.msra.mxu0 %v5284_v52  ;;  %1267 = vmatpush1.msra.mxu1 %v5285_v54  ;;  %v5310_v39 = vld [vmem:[#allocation70_spill] sm:$0xff]  ;;  %v4086_v52 = vld [vmem:[%s5042_s2 + $0x1d0] sm:$0xff]  ;;  %v4092_v54 = vld [vmem:[%s5042_s2 + $0x1a8] sm:$0xff] }
 0x145   : > { %v2665_v57 = vpop.eup %2664  ;;  %1191 = vmatprep.subr.mxu0 %v5286_v61  ;;  %1268 = vmatprep.subr.mxu1 %v5287_v3  ;;  %v5314_v45 = vld [vmem:[#allocation62_spill] sm:$0xff]  ;;  %v4110_v3 = vld [vmem:[%s5042_s2 + $0x1b0] sm:$0xff] }
 0x146   : > { %v2667_v4 = vpop.eup %2666  ;;  %v3989_v6 = vadd.f32 %v937_v51, %v935_v50  ;;  %1192 = vmatpush1.msra.mxu0 %v5288_v8  ;;  %1269 = vmatpush1.msra.mxu1 %v5289_v9  ;;  %v930_v18 = vadd.f32 1.0, %v2665_v57  ;;  %v4074_v50 = vld [vmem:[%s5042_s2 + $0x1d8] sm:$0xff]  ;;  %v4080_v51 = vld [vmem:[%s5042_s2 + $0x1c0] sm:$0xff]  ;;  %v4134_v9 = vld [vmem:[%s5042_s2 + $0x190] sm:$0xff] }
 0x147   : > { %1193 = vmatprep.subr.mxu0 %v5290_v10  ;;  %1270 = vmatprep.subr.mxu1 %v5291_v13  ;;  %v938_v22 = vmul.f32 %v2667_v4, %v2663_v49  ;;  %v4068_v49 = vld [vmem:[%s5042_s2 + $0x1c8] sm:$0xff]  ;;  %v4098_v57 = vld [vmem:[%s5042_s2 + $0x1b8] sm:$0xff]  ;;  %v4104_v61 = vld [vmem:[%s5042_s2 + $0x1a0] sm:$0xff] }
 0x148   : > { %v2669_v17 = vpop.eup %2668  ;;  %2672 = vtanh.f32 %v3989_v6  ;;  %1194 = vmatpush1.msra.mxu0 %v5292_v19  ;;  %1271 = vmatpush1.msra.mxu1 %v5293_v20  ;;  %v4116_v4 = vld [vmem:[%s5042_s2 + $0x188] sm:$0xff]  ;;  %v4128_v8 = vld [vmem:[%s5042_s2 + $0x180] sm:$0xff]  ;;  %v4146_v13 = vld [vmem:[%s5042_s2 + $0x178] sm:$0xff] }
 0x149   : > { %v936_v21 = vmul.f32 %v2669_v17, %v505_v7  ;;  %1195 = vmatprep.subr.mxu0 %v5294_v23  ;;  %1272 = vmatprep.subr.mxu1 %v5295_v24  ;;  %2674 = vrcp.f32 %v930_v18  ;;  %v4122_v7 = vld [vmem:[%s5042_s2 + $0x198] sm:$0xff]  ;;  %v4140_v10 = vld [vmem:[%s5042_s2 + $0x168] sm:$0xff]  ;;  %v4152_v17 = vld [vmem:[%s5042_s2 + $0x160] sm:$0xff] }
 0x14a   : > { %1196 = vmatpush1.msra.mxu0 %v5296_v26  ;;  %1273 = vmatpush1.msra.mxu1 %v3761_v5  ;;  %v5302_v5 = vld [vmem:[#allocation47_spill] sm:$0xff]  ;;  %v4158_v18 = vld [vmem:[%s5042_s2 + $0x170] sm:$0xff]  ;;  %v4170_v20 = vld [vmem:[%s5042_s2 + $0x158] sm:$0xff] }
 0x14b   : > { %v4002_v27 = vadd.f32 %v938_v22, %v936_v21  ;;  %1197 = vmatprep.subr.mxu0 %v5297_v28  ;;  %1274 = vmatprep.subr.mxu1 %v5298_v56  ;;  %v4164_v19 = vld [vmem:[%s5042_s2 + $0x148] sm:$0xff]  ;;  %v4176_v21 = vld [vmem:[%s5042_s2 + $0x140] sm:$0xff]  ;;  %v4182_v22 = vld [vmem:[%s5042_s2 + $0x150] sm:$0xff] }
 0x14c   : > { %1198 = vmatpush1.msra.mxu0 %v5299_v29  ;;  %1275 = vmatpush1.msra.mxu1 %v3785_v55  ;;  %v5307_v55 = vld [vmem:[#allocation69_spill] sm:$0xff]  ;;  %v4188_v23 = vld [vmem:[%s5042_s2 + $0x128] sm:$0xff]  ;;  %v4200_v26 = vld [vmem:[%s5042_s2 + $0x120] sm:$0xff] }
 0x14d   : > { %1199 = vmatprep.subr.mxu0 %v5300_v30  ;;  %1276 = vmatprep.subr.mxu1 %v5301_v31  ;;  %2676 = vtanh.f32 %v4002_v27  ;;  %v4194_v24 = vld [vmem:[%s5042_s2 + $0x138] sm:$0xff]  ;;  %v4206_v28 = vld [vmem:[%s5042_s2 + $0x130] sm:$0xff]  ;;  %v4212_v56 = vld [vmem:[%s5042_s2 + $0x108] sm:$0xff] }
 0x14e   : > { %1104 = vmatprep.mubr.f32.mxu1 %v5199_v60  ;;  %1200 = vmatpush1.msra.mxu0 %v5302_v5  ;;  %v2671_v40 = vpop.eup %2670  ;;  %v4218_v29 = vld [vmem:[%s5042_s2 + $0x118] sm:$0xff]  ;;  %v4224_v30 = vld [vmem:[%s5042_s2 + $0x100] sm:$0xff]  ;;  %v4230_v31 = vld [vmem:[%s5042_s2 + $0x110] sm:$0xff] }
 0x14f   : > { %1277 = vmatpush1.msra.mxu1 %v5303_v32  ;;  %1201 = vmatprep.subr.mxu0 %v5304_v33  ;;  %v4236_v5 = vld [vmem:[%s5042_s2 + $0xe8] sm:$0xff]  ;;  %v4242_v32 = vld [vmem:[%s5042_s2 + $0xf8] sm:$0xff]  ;;  %v4248_v33 = vld [vmem:[%s5042_s2 + $0xe0] sm:$0xff] }
 0x150   : > { %1105 = vmatmul.mubr.f32.gmra.mxu1 %v3963_v25  ;;  %1278 = vmatprep.subr.mxu1 %v5305_v35  ;;  %v4254_v35 = vld [vmem:[%s5042_s2 + $0xf0] sm:$0xff] }
 0x151   : > { %1202 = vmatpush1.msra.mxu0 %v5306_v36  ;;  %1279 = vmatpush1.msra.mxu1 %v5307_v55  ;;  %v4260_v36 = vld [vmem:[%s5042_s2 + $0xc8] sm:$0xff]  ;;  %v4266_v55 = vld [vmem:[%s5042_s2 + $0xd8] sm:$0xff] }
 0x152   : > { %1203 = vmatprep.subr.mxu0 %v5308_v37  ;;  %1280 = vmatprep.subr.mxu1 %v3819_v53  ;;  %5317 = vst [vmem:[#allocation6_spill] sm:$0xff] %v4266_v55  ;;  %v4272_v37 = vld [vmem:[%s5042_s2 + $0xc0] sm:$0xff] }
 0x153   : > { %1204 = vmatpush1.msra.mxu0 %v5309_v38  ;;  %1281 = vmatpush1.msra.mxu1 %v5310_v39  ;;  %5318 = vst [vmem:[#allocation8_spill] sm:$0xff] %v4272_v37  ;;  %v4278_v38 = vld [vmem:[%s5042_s2 + $0xd0] sm:$0xff]  ;;  %v4284_v39 = vld [vmem:[%s5042_s2 + $0xa8] sm:$0xff] }
 0x154   : > { %1205 = vmatprep.subr.mxu0 %v5311_v42  ;;  %1282 = vmatprep.subr.mxu1 %v3832_v62  ;;  %5319 = vst [vmem:[#allocation7_spill] sm:$0xff] %v4278_v38  ;;  %5320 = vst [vmem:[#allocation10_spill] sm:$0xff] %v4284_v39  ;;  %v4296_v42 = vld [vmem:[%s5042_s2 + $0xa0] sm:$0xff] }
 0x155   : > { %v2673_v25 = vpop.eup %2672  ;;  %1206 = vmatpush1.msra.mxu0 %v5312_v43  ;;  %1283 = vmatpush1.msra.mxu1 %v3839_v0  ;;  %5322 = vst [vmem:[#allocation12_spill] sm:$0xff] %v4296_v42  ;;  %v4308_v43 = vld [vmem:[%s5042_s2 + $0x88] sm:$0xff] }
 0x156   : > { %1207 = vmatprep.subr.mxu0 %v5313_v44  ;;  %1284 = vmatprep.subr.mxu1 %v3845_v58  ;;  %v943_v53 = vmul.f32 %v2673_v25, %v2671_v40  ;;  %v2675_v62 = vpop.eup %2674  ;;  %v4290_v40 = vld [vmem:[%s5042_s2 + $0xb8] sm:$0xff]  ;;  %v4302_v25 = vld [vmem:[%s5042_s2 + $0xb0] sm:$0xff]  ;;  %5324 = vst [vmem:[#allocation16_spill] sm:$0xff] %v4308_v43 }
 0x157   : > { %1208 = vmatpush1.msra.mxu0 %v5314_v45  ;;  %1285 = vmatpush1.msra.mxu1 %v3852_v1  ;;  %v4050_v1 = vld [vmem:[%s5042_s2 + $0x1f8] sm:$0xff]  ;;  %5321 = vst [vmem:[#allocation9_spill] sm:$0xff] %v4290_v40  ;;  %5323 = vst [vmem:[#allocation11_spill] sm:$0xff] %v4302_v25  ;;  %v4326_v45 = vld [vmem:[%s5042_s2 + $0x90] sm:$0xff] }
 0x158   : > { %1209 = vmatprep.subr.mxu0 %v5315_v46  ;;  %1286 = vmatprep.subr.mxu1 %v3859_v59  ;;  %2494 = vst [vmem:[%s3090_s15 + $0x30] sm:$0xff] %v943_v53  ;;  %v4044_v59 = vld [vmem:[%s5042_s2 + $0x1e8] sm:$0xff]  ;;  %v4314_v44 = vld [vmem:[%s5042_s2 + $0x98] sm:$0xff]  ;;  %5327 = vst [vmem:[#allocation22_spill] sm:$0xff] %v4326_v45 }
 0x159   : > { %1210 = vmatpush1.msra.mxu0 %v5316_v47  ;;  %1243 = vmatprep.mubr.f32.mxu0 %v5199_v60  ;;  %5325 = vst [vmem:[#allocation18_spill] sm:$0xff] %v4314_v44  ;;  %v4332_v46 = vld [vmem:[%s5042_s2 + $0x68] sm:$0xff]  ;;  %v4344_v47 = vld [vmem:[%s5042_s2 + $0x60] sm:$0xff] }
 0x15a   : > { %v2677_v0 = vpop.eup %2676  ;;  %1287 = vmatpush1.msra.mxu1 %v3866_v2  ;;  %1320 = vmatprep.mubr.f32.mxu1 %v5199_v60  ;;  %v4056_v2 = vld [vmem:[%s5042_s2 + $0x1e0] sm:$0xff]  ;;  %5328 = vst [vmem:[#allocation24_spill] sm:$0xff] %v4332_v46  ;;  %5330 = vst [vmem:[#allocation14_spill] sm:$0xff] %v4344_v47 }
 0x15b   : > { %1244 = vmatmul.mubr.f32.vlgmr.msra.gmra.mxu0 %v943_v53  ;;  %1321 = vmatmul.mubr.f32.vlgmr.msra.gmra.mxu1 %v943_v53  ;;  %v944_v58 = vmul.f32 %v2677_v0, %v2675_v62  ;;  %v4320_v53 = vld [vmem:[%s5042_s2 + $0x80] sm:$0xff]  ;;  %v4338_v62 = vld [vmem:[%s5042_s2 + $0x78] sm:$0xff]  ;;  %v4350_v0 = vld [vmem:[%s5042_s2 + $0x70] sm:$0xff] }
 0x15c   : > { %1249 = vmatprep.mubr.f32.mxu0 %v5199_v60  ;;  %1326 = vmatprep.mubr.f32.mxu1 %v5199_v60  ;;  %5326 = vst [vmem:[#allocation13_spill] sm:$0xff] %v4320_v53  ;;  %5329 = vst [vmem:[#allocation26_spill] sm:$0xff] %v4338_v62 }
 0x15d   : > { %2495 = vst [vmem:[%s3090_s15 + $0x38] sm:$0xff] %v944_v58  ;;  %1401 = vmatprep.subr.mxu0 %v4044_v59  ;;  %1478 = vmatprep.subr.mxu1 %v4050_v1  ;;  %5331 = vst [vmem:[#allocation15_spill] sm:$0xff] %v4350_v0 }
 0x15e   : > { %1402 = vmatpush1.msra.mxu0 %v4056_v2  ;;  %1479 = vmatpush1.msra.mxu1 %v4062_v48 }
 0x15f   : > { %1250 = vmatmul.mubr.f32.gmra.mxu0 %v944_v58  ;;  %1327 = vmatmul.mubr.f32.gmra.mxu1 %v944_v58  ;;  %v4356_v58 = vld [vmem:[%s5042_s2 + $0x48] sm:$0xff] }
 0x160   : > { %1403 = vmatprep.subr.mxu0 %v4068_v49  ;;  %1480 = vmatprep.subr.mxu1 %v4074_v50  ;;  %5332 = vst [vmem:[#allocation30_spill] sm:$0xff] %v4356_v58 }
 0x161   : > { %1404 = vmatpush1.msra.mxu0 %v4080_v51  ;;  %1481 = vmatpush1.msra.mxu1 %v4086_v52 }
 0x162   : > { %1405 = vmatprep.subr.mxu0 %v4092_v54  ;;  %1482 = vmatprep.subr.mxu1 %v4098_v57 }
 0x163   : > { %1406 = vmatpush1.msra.mxu0 %v4104_v61  ;;  %1483 = vmatpush1.msra.mxu1 %v4110_v3 }
 0x164   : > { %1407 = vmatprep.subr.mxu0 %v4116_v4  ;;  %1484 = vmatprep.subr.mxu1 %v4122_v7 }
 0x165   : > { %1408 = vmatpush1.msra.mxu0 %v4128_v8  ;;  %1485 = vmatpush1.msra.mxu1 %v4134_v9 }
 0x166   : > { %1409 = vmatprep.subr.mxu0 %v4140_v10  ;;  %1486 = vmatprep.subr.mxu1 %v4146_v13 }
 0x167   : > { %1410 = vmatpush1.msra.mxu0 %v4152_v17  ;;  %1487 = vmatpush1.msra.mxu1 %v4158_v18 }
 0x168   : > { %1411 = vmatprep.subr.mxu0 %v4164_v19  ;;  %1488 = vmatprep.subr.mxu1 %v4170_v20 }
 0x169   : > { %1412 = vmatpush1.msra.mxu0 %v4176_v21  ;;  %1489 = vmatpush1.msra.mxu1 %v4182_v22 }
 0x16a   : > { %1413 = vmatprep.subr.mxu0 %v4188_v23  ;;  %1490 = vmatprep.subr.mxu1 %v4194_v24 }
 0x16b   : > { %1414 = vmatpush1.msra.mxu0 %v4200_v26  ;;  %1491 = vmatpush1.msra.mxu1 %v4206_v28 }
 0x16c   : > { %1415 = vmatprep.subr.mxu0 %v4212_v56  ;;  %1492 = vmatprep.subr.mxu1 %v4218_v29 }
 0x16d   : > { %1416 = vmatpush1.msra.mxu0 %v4224_v30  ;;  %1493 = vmatpush1.msra.mxu1 %v4230_v31 }
 0x16e   : > { %1417 = vmatprep.subr.mxu0 %v4236_v5  ;;  %1494 = vmatprep.subr.mxu1 %v4242_v32 }
 0x16f   : > { %1418 = vmatpush1.msra.mxu0 %v4248_v33  ;;  %1495 = vmatpush1.msra.mxu1 %v4254_v35 }
 0x170   : > { %1419 = vmatprep.subr.mxu0 %v4260_v36  ;;  %1496 = vmatprep.subr.mxu1 %v4266_v55 }
 0x171   : > { %1420 = vmatpush1.msra.mxu0 %v4272_v37  ;;  %1497 = vmatpush1.msra.mxu1 %v4278_v38 }
 0x172   : > { %1421 = vmatprep.subr.mxu0 %v4284_v39  ;;  %1498 = vmatprep.subr.mxu1 %v4290_v40 }
 0x173   : > { %1422 = vmatpush1.msra.mxu0 %v4296_v42  ;;  %1499 = vmatpush1.msra.mxu1 %v4302_v25  ;;  %v2499_v42 = vld [vmem:[%s3075_s29 + $0x58] sm:$0xff] }
 0x174   : > { %1423 = vmatprep.subr.mxu0 %v4308_v43  ;;  %1500 = vmatprep.subr.mxu1 %v4314_v44 }
 0x175   : > { %1424 = vmatpush1.msra.mxu0 %v4320_v53  ;;  %1501 = vmatpush1.msra.mxu1 %v4326_v45  ;;  %v2501_v53 = vld [vmem:[%s3075_s29 + $0x68] sm:$0xff] }
 0x176   : > { %1425 = vmatprep.subr.mxu0 %v4332_v46  ;;  %1502 = vmatprep.subr.mxu1 %v4338_v62  ;;  %v4362_v62 = vld [vmem:[%s5042_s2 + $0x58] sm:$0xff] }
 0x177   : > { %1426 = vmatpush1.msra.mxu0 %v4344_v47  ;;  %1503 = vmatpush1.msra.mxu1 %v4350_v0  ;;  %5333 = vst [vmem:[#allocation17_spill] sm:$0xff] %v4362_v62  ;;  %v4368_v47 = vld [vmem:[%s5042_s2 + $0x40] sm:$0xff] }
 0x178   : > { %1427 = vmatprep.subr.mxu0 %v4356_v58  ;;  %1504 = vmatprep.subr.mxu1 %v4362_v62  ;;  %5334 = vst [vmem:[#allocation32_spill] sm:$0xff] %v4368_v47  ;;  %v4375_v58 = vld [vmem:[%s5042_s2 + $0x28] sm:$0xff]  ;;  %v4382_v62 = vld [vmem:[%s5042_s2 + $0x20] sm:$0xff] }
 0x179   : > { %1428 = vmatpush1.msra.mxu0 %v4368_v47  ;;  %1505 = vmatpush1.msra.mxu1 %v5259_v11  ;;  %5335 = vst [vmem:[#allocation19_spill] sm:$0xff] %v4375_v58  ;;  %5336 = vst [vmem:[#allocation34_spill] sm:$0xff] %v4382_v62  ;;  %v4389_v11 = vld [vmem:[%s5042_s2 + $0x8] sm:$0xff]  ;;  %v2500_v47 = vld [vmem:[%s3075_s29 + $0x60] sm:$0xff] }
 0x17a   : > { %1429 = vmatprep.subr.mxu0 %v4375_v58  ;;  %1506 = vmatprep.subr.mxu1 %v5260_v12  ;;  %5337 = vst [vmem:[#allocation20_spill] sm:$0xff] %v4389_v11  ;;  %v4396_v12 = vld [vmem:[%s5042_s2] sm:$0xff] }
 0x17b   : > { %1430 = vmatpush1.msra.mxu0 %v4382_v62  ;;  %1507 = vmatpush1.msra.mxu1 %v3496_v63  ;;  %5338 = vst [vmem:[#allocation37_spill] sm:$0xff] %v4396_v12  ;;  %v4405_v63 = vld [vmem:[%s5043_s3 + $0x1e8] sm:$0xff] }
 0x17c   : > { %1431 = vmatprep.subr.mxu0 %v4389_v11  ;;  %1508 = vmatprep.subr.mxu1 %v5262_v14  ;;  %5339 = vst [vmem:[#allocation21_spill] sm:$0xff] %v4405_v63  ;;  %v2496_v14 = vld [vmem:[%s3075_s29 + $0x40] sm:$0xff]  ;;  %v2497_v62 = vld [vmem:[%s3075_s29 + $0x48] sm:$0xff] }
 0x17d   : > { %1432 = vmatpush1.msra.mxu0 %v4396_v12  ;;  %1465 = vmatprep.mubr.f32.mxu0 %v5199_v60 }
 0x17e   : > { %1509 = vmatpush1.msra.mxu1 %v5263_v15  ;;  %1542 = vmatprep.mubr.f32.mxu1 %v5199_v60 }
 0x17f   : > { %1623 = vmatprep.subr.mxu0 %v4405_v63  ;;  %1700 = vmatprep.subr.mxu1 %v5264_v16 }
 0x1f8   : > { %v1023_v11 = vpop.f32.mrf.mxu0  ;;  %v1100_v46 = vpop.f32.mrf.mxu1 }
 0x1f9   : > { %v1111_v12 = vadd.f32 %v2496_v14, %v1023_v11 }
 0x1fa   : > { %v1025_v58 = vpop.f32.mrf.mxu0  ;;  %v1102_v40 = vpop.f32.mrf.mxu1 }
 0x1fb   : > { %v2504_v0 = vmul.f32 -1.442695, %v1111_v12  ;;  %v1112_v15 = vadd.f32 %v2497_v62, %v1025_v58  ;;  %v1114_v14 = vadd.f32 %v2499_v42, %v1102_v40  ;;  %v2498_v12 = vld [vmem:[%s3075_s29 + $0x50] sm:$0xff]  ;;  %v2503_v40 = vld [vmem:[%s3075_s29 + $0x78] sm:$0xff] }
 0x1fc   : > { %v1029_v45 = vpop.f32.mrf.mxu0  ;;  %v1113_v39 = vadd.f32 %v2498_v12, %v1100_v46 }
 0x1fd   : > { %2678 = vpow2.f32 %v2504_v0  ;;  %v2506_v44 = vmul.f32 -1.442695, %v1112_v15  ;;  %v1115_v43 = vadd.f32 %v2500_v47, %v1029_v45  ;;  %v2508_v62 = vmul.f32 -1.442695, %v1114_v14 }
 0x1fe   : > { %v1031_v25 = vpop.f32.mrf.mxu0 }
 0x1ff   : > { %2680 = vpow2.f32 %v2506_v44  ;;  %v2505_v63 = vmul.f32 -1.442695, %v1115_v43  ;;  %v1116_v16 = vadd.f32 %v2501_v53, %v1031_v25  ;;  %v2502_v25 = vld [vmem:[%s3075_s29 + $0x70] sm:$0xff] }
 0x201   : > { %2682 = vpow2.f32 %v2505_v63  ;;  %v2507_v11 = vmul.f32 -1.442695, %v1116_v16 }
 0x203   : > { %2684 = vpow2.f32 %v2507_v11 }
 0x204   : > { %2686 = vpow2.f32 %v2508_v62 }
 0x20a   : > { %v2679_v58 = vpop.eup %2678 }
 0x20b   : > { %v1125_v38 = vadd.f32 1.0, %v2679_v58  ;;  %v2513_v58 = vld [vmem:[%s3080_s8 + $0x88] sm:$0xff] }
 0x20c   : > { %v2681_v0 = vpop.eup %2680 }
 0x20d   : > { %2688 = vrcp.f32 %v1125_v38  ;;  %v1137_v45 = vadd.f32 1.0, %v2681_v0 }
 0x20e   : > { %v2683_v44 = vpop.eup %2682  ;;  %2690 = vtanh.f32 %v1113_v39  ;;  %v2512_v39 = vld [vmem:[%s3080_s8 + $0x80] sm:$0xff] }
 0x20f   : > { %2692 = vrcp.f32 %v1137_v45  ;;  %v1126_v43 = vadd.f32 1.0, %v2683_v44 }
 0x210   : > { %v2685_v53 = vpop.eup %2684  ;;  %v1106_v47 = vpop.f32.mrf.mxu1 }
 0x211   : > { %v1138_v42 = vadd.f32 1.0, %v2685_v53  ;;  %v1117_v63 = vadd.f32 %v2502_v25, %v1106_v47  ;;  %2694 = vrcp.f32 %v1126_v43  ;;  %v2687_v16 = vpop.eup %2686  ;;  %v2516_v47 = vld [vmem:[%s3080_s8 + $0xa0] sm:$0xff] }
 0x212   : > { %v1108_v15 = vpop.f32.mrf.mxu1  ;;  %v1151_v12 = vadd.f32 1.0, %v2687_v16 }
 0x213   : > { %2696 = vrcp.f32 %v1138_v42  ;;  %v1118_v46 = vadd.f32 %v2503_v40, %v1108_v15 }
 0x214   : > { %2698 = vtanh.f32 %v1117_v63 }
 0x215   : > { %v2509_v38 = vmul.f32 -1.442695, %v1118_v46 }
 0x217   : > { %2700 = vpow2.f32 %v2509_v38  ;;  %v2517_v38 = vld [vmem:[%s3080_s8 + $0xa8] sm:$0xff] }
 0x218   : > { %2702 = vrcp.f32 %v1151_v12 }
 0x21a   : > { %v2689_v11 = vpop.eup %2688 }
 0x21b   : > { %v2691_v14 = vpop.eup %2690  ;;  %v1245_v62 = vpop.f32.mrf.mxu0 }
 0x21c   : > { %v2693_v0 = vpop.eup %2692  ;;  %v1333_v45 = vadd.f32 %v2512_v39, %v1245_v62  ;;  %v1322_v44 = vpop.f32.mrf.mxu1  ;;  %v1159_v25 = vmul.f32 %v2691_v14, %v2689_v11 }
 0x21d   : > { %v1157_v43 = vmul.f32 %v2693_v0, %v3948_v34  ;;  %v1247_v53 = vpop.f32.mrf.mxu0 }
 0x21e   : > { %v2520_v40 = vmul.f32 -1.442695, %v1333_v45  ;;  %v1334_v42 = vadd.f32 %v2513_v58, %v1247_v53  ;;  %v2695_v63 = vpop.eup %2694  ;;  %v1324_v55 = vpop.f32.mrf.mxu1  ;;  %v2515_v45 = vld [vmem:[%s3080_s8 + $0x98] sm:$0xff] }
 0x21f   : > { %v4421_v15 = vadd.f32 %v1159_v25, %v1157_v43  ;;  %v1251_v46 = vpop.f32.mrf.mxu0 }
 0x220   : > { %v2697_v16 = vpop.eup %2696  ;;  %2704 = vpow2.f32 %v2520_v40  ;;  %v2522_v37 = vmul.f32 -1.442695, %v1334_v42  ;;  %v1337_v39 = vadd.f32 %v2516_v47, %v1251_v46  ;;  %v1328_v25 = vpop.f32.mrf.mxu1  ;;  %v1336_v40 = vadd.f32 %v2515_v45, %v1324_v55 }
 0x221   : > { %v2699_v62 = vpop.eup %2698  ;;  %2706 = vtanh.f32 %v4421_v15  ;;  %v1158_v34 = vmul.f32 %v2697_v16, %v3951_v41  ;;  %v1253_v11 = vpop.f32.mrf.mxu0  ;;  %v2519_v41 = vld [vmem:[%s3080_s8 + $0xb8] sm:$0xff] }
 0x222   : > { %v1160_v14 = vmul.f32 %v2699_v62, %v2695_v63  ;;  %2708 = vpow2.f32 %v2522_v37  ;;  %v2521_v58 = vmul.f32 -1.442695, %v1337_v39  ;;  %v1338_v12 = vadd.f32 %v2517_v38, %v1253_v11  ;;  %v1330_v42 = vpop.f32.mrf.mxu1  ;;  %v2514_v37 = vld [vmem:[%s3080_s8 + $0x90] sm:$0xff] }
 0x223   : > { %v2524_v63 = vmul.f32 -1.442695, %v1336_v40  ;;  %v1340_v46 = vadd.f32 %v2519_v41, %v1330_v42  ;;  %v1335_v39 = vadd.f32 %v2514_v37, %v1322_v44  ;;  %v4437_v44 = vld [vmem:[%s5043_s3 + $0x1e0] sm:$0xff]  ;;  %v4449_v40 = vld [vmem:[%s5043_s3 + $0x1c8] sm:$0xff]  ;;  %v4455_v41 = vld [vmem:[%s5043_s3 + $0x1d8] sm:$0xff] }
 0x224   : > { %v2701_v0 = vpop.eup %2700  ;;  %2710 = vpow2.f32 %v2521_v58  ;;  %v2523_v43 = vmul.f32 -1.442695, %v1338_v12  ;;  %v4427_v53 = vadd.f32 %v1160_v14, %v1158_v34  ;;  %v2518_v34 = vld [vmem:[%s3080_s8 + $0xb0] sm:$0xff] }
 0x225   : > { %v1152_v47 = vadd.f32 1.0, %v2701_v0  ;;  %v2703_v38 = vpop.eup %2702  ;;  %v2525_v58 = vmul.f32 -1.442695, %v1340_v46  ;;  %v1339_v45 = vadd.f32 %v2518_v34, %v1328_v25  ;;  %v4469_v46 = vld [vmem:[%s5043_s3 + $0x1d0] sm:$0xff] }
 0x226   : > { %2712 = vpow2.f32 %v2523_v43  ;;  %v4493_v34 = vld [vmem:[%s5043_s3 + $0x1b0] sm:$0xff] }
 0x227   : > { %2714 = vrcp.f32 %v1152_v47  ;;  %v4443_v47 = vld [vmem:[%s5043_s3 + $0x1f0] sm:$0xff] }
 0x228   : > { %2716 = vtanh.f32 %v4427_v53 }
 0x229   : > { %2718 = vpow2.f32 %v2524_v63  ;;  %v4463_v63 = vld [vmem:[%s5043_s3 + $0x1c0] sm:$0xff] }
 0x22d   : > { %v2705_v16 = vpop.eup %2704 }
 0x22e   : > { %v2707_v62 = vpop.eup %2706  ;;  %v1347_v11 = vadd.f32 1.0, %v2705_v16  ;;  %v4475_v16 = vld [vmem:[%s5043_s3 + $0x1a8] sm:$0xff] }
 0x22f   : > { %v2709_v14 = vpop.eup %2708  ;;  %v1165_v12 = vmul.f32 %v2707_v62, %v2703_v38 }
 0x230   : > { %2720 = vrcp.f32 %v1347_v11  ;;  %v1359_v55 = vadd.f32 1.0, %v2709_v14  ;;  %v4487_v11 = vld [vmem:[%s5043_s3 + $0x1a0] sm:$0xff]  ;;  %v4499_v14 = vld [vmem:[%s5043_s3 + $0x188] sm:$0xff] }
 0x231   : > { %v2711_v0 = vpop.eup %2710  ;;  %2722 = vtanh.f32 %v1335_v39  ;;  %2510 = vst [vmem:[%s3085_s11 + $0x10] sm:$0xff] %v1165_v12  ;;  %1466 = vmatmul.mubr.f32.vlgmr.msra.gmra.mxu0 %v1165_v12  ;;  %1543 = vmatmul.mubr.f32.vlgmr.msra.gmra.mxu1 %v1165_v12  ;;  %v4481_v39 = vld [vmem:[%s5043_s3 + $0x1b8] sm:$0xff]  ;;  %v4512_v12 = vld [vmem:[%s5043_s3 + $0x180] sm:$0xff] }
 0x232   : > { %2724 = vrcp.f32 %v1359_v55  ;;  %v1348_v43 = vadd.f32 1.0, %v2711_v0  ;;  %1624 = vmatpush1.msra.mxu0 %v4437_v44  ;;  %1701 = vmatpush1.msra.mxu1 %v4443_v47  ;;  %5341 = vst [vmem:[#allocation23_spill] sm:$0xff] %v4512_v12  ;;  %v4518_v55 = vld [vmem:[%s5043_s3 + $0x190] sm:$0xff]  ;;  %v4524_v0 = vld [vmem:[%s5043_s3 + $0x168] sm:$0xff] }
 0x233   : > { %v2713_v25 = vpop.eup %2712  ;;  %2726 = vpow2.f32 %v2525_v58  ;;  %1625 = vmatprep.subr.mxu0 %v4449_v40  ;;  %1702 = vmatprep.subr.mxu1 %v4455_v41  ;;  %v4505_v58 = vld [vmem:[%s5043_s3 + $0x198] sm:$0xff]  ;;  %5342 = vst [vmem:[#allocation42_spill] sm:$0xff] %v4518_v55  ;;  %5343 = vst [vmem:[#allocation25_spill] sm:$0xff] %v4524_v0 }
 0x234   : > { %v2715_v42 = vpop.eup %2714  ;;  %2728 = vrcp.f32 %v1348_v43  ;;  %v1360_v37 = vadd.f32 1.0, %v2713_v25  ;;  %1471 = vmatprep.mubr.f32.mxu0 %v5199_v60  ;;  %1548 = vmatprep.mubr.f32.mxu1 %v5199_v60  ;;  %5340 = vst [vmem:[#allocation40_spill] sm:$0xff] %v4505_v58  ;;  %v4536_v25 = vld [vmem:[%s5043_s3 + $0x160] sm:$0xff] }
 0x235   : > { %2730 = vtanh.f32 %v1339_v45  ;;  %1626 = vmatpush1.msra.mxu0 %v4463_v63  ;;  %1703 = vmatpush1.msra.mxu1 %v4469_v46  ;;  %v2717_v38 = vpop.eup %2716  ;;  %v4530_v45 = vld [vmem:[%s5043_s3 + $0x178] sm:$0xff]  ;;  %5345 = vst [vmem:[#allocation27_spill] sm:$0xff] %v4536_v25 }
 0x236   : > { %2732 = vrcp.f32 %v1360_v37  ;;  %1627 = vmatprep.subr.mxu0 %v4475_v16  ;;  %1704 = vmatprep.subr.mxu1 %v4481_v39  ;;  %v1166_v62 = vmul.f32 %v2717_v38, %v2715_v42  ;;  %5344 = vst [vmem:[#allocation44_spill] sm:$0xff] %v4530_v45  ;;  %v2719_v43 = vpop.eup %2718  ;;  %v4542_v42 = vld [vmem:[%s5043_s3 + $0x170] sm:$0xff]  ;;  %v4548_v38 = vld [vmem:[%s5043_s3 + $0x148] sm:$0xff] }
 0x237   : > { %1628 = vmatpush1.msra.mxu0 %v4487_v11  ;;  %1705 = vmatpush1.msra.mxu1 %v4493_v34  ;;  %5346 = vst [vmem:[#allocation46_spill] sm:$0xff] %v4542_v42  ;;  %5347 = vst [vmem:[#allocation28_spill] sm:$0xff] %v4548_v38 }
 0x238   : > { %1629 = vmatprep.subr.mxu0 %v4499_v14  ;;  %1706 = vmatprep.subr.mxu1 %v4505_v58  ;;  %2511 = vst [vmem:[%s3085_s11 + $0x18] sm:$0xff] %v1166_v62 }
 0x239   : > { %1472 = vmatmul.mubr.f32.gmra.mxu0 %v1166_v62  ;;  %1549 = vmatmul.mubr.f32.gmra.mxu1 %v1166_v62  ;;  %v4554_v62 = vld [vmem:[%s5043_s3 + $0x158] sm:$0xff] }
 0x23a   : > { %1630 = vmatpush1.msra.mxu0 %v4512_v12  ;;  %1707 = vmatpush1.msra.mxu1 %v4518_v55  ;;  %5348 = vst [vmem:[#allocation48_spill] sm:$0xff] %v4554_v62 }
 0x23b   : > { %1631 = vmatprep.subr.mxu0 %v4524_v0  ;;  %1708 = vmatprep.subr.mxu1 %v4530_v45  ;;  %v4566_v45 = vld [vmem:[%s5043_s3 + $0x150] sm:$0xff]  ;;  %v1373_v0 = vadd.f32 1.0, %v2719_v43  ;;  %v4585_v43 = vld [vmem:[%s5043_s3 + $0x120] sm:$0xff] }
 0x23c   : > { %1632 = vmatpush1.msra.mxu0 %v4536_v25  ;;  %1709 = vmatpush1.msra.mxu1 %v4542_v42  ;;  %v4560_v42 = vld [vmem:[%s5043_s3 + $0x140] sm:$0xff]  ;;  %5350 = vst [vmem:[#allocation50_spill] sm:$0xff] %v4566_v45  ;;  %5352 = vst [vmem:[#allocation52_spill] sm:$0xff] %v4585_v43 }
 0x23d   : > { %v2721_v37 = vpop.eup %2720  ;;  %1633 = vmatprep.subr.mxu0 %v4548_v38  ;;  %1710 = vmatprep.subr.mxu1 %v4554_v62  ;;  %5349 = vst [vmem:[#allocation29_spill] sm:$0xff] %v4560_v42  ;;  %v4572_v62 = vld [vmem:[%s5043_s3 + $0x128] sm:$0xff]  ;;  %2734 = vrcp.f32 %v1373_v0 }
 0x23e   : > { %v2723_v25 = vpop.eup %2722  ;;  %1634 = vmatpush1.msra.mxu0 %v4560_v42  ;;  %1711 = vmatpush1.msra.mxu1 %v4566_v45  ;;  %5351 = vst [vmem:[#allocation31_spill] sm:$0xff] %v4572_v62  ;;  %v4578_v42 = vld [vmem:[%s5043_s3 + $0x138] sm:$0xff] }
 0x23f   : > { %v2725_v38 = vpop.eup %2724  ;;  %1635 = vmatprep.subr.mxu0 %v4572_v62  ;;  %1712 = vmatprep.subr.mxu1 %v4578_v42  ;;  %v1381_v12 = vmul.f32 %v2723_v25, %v2721_v37  ;;  %v4591_v62 = vld [vmem:[%s5043_s3 + $0x130] sm:$0xff]  ;;  %v4597_v25 = vld [vmem:[%s5043_s3 + $0x108] sm:$0xff] }
 0x240   : > { %v2727_v55 = vpop.eup %2726  ;;  %v1379_v45 = vmul.f32 %v2725_v38, %v3989_v6  ;;  %1636 = vmatpush1.msra.mxu0 %v4585_v43  ;;  %5353 = vst [vmem:[#allocation33_spill] sm:$0xff] %v4591_v62  ;;  %1713 = vmatpush1.msra.mxu1 %v4591_v62  ;;  %5354 = vst [vmem:[#allocation54_spill] sm:$0xff] %v4597_v25  ;;  %v4603_v6 = vld [vmem:[%s5043_s3 + $0x118] sm:$0xff]  ;;  %v4611_v62 = vld [vmem:[%s5043_s3 + $0x100] sm:$0xff] }
 0x241   : > { %v2729_v58 = vpop.eup %2728  ;;  %1637 = vmatprep.subr.mxu0 %v4597_v25  ;;  %5355 = vst [vmem:[#allocation35_spill] sm:$0xff] %v4603_v6  ;;  %1714 = vmatprep.subr.mxu1 %v4603_v6  ;;  %v4617_v25 = vld [vmem:[%s5043_s3 + $0x110] sm:$0xff]  ;;  %v1374_v6 = vadd.f32 1.0, %v2727_v55  ;;  %v4637_v55 = vld [vmem:[%s5043_s3 + $0xe0] sm:$0xff] }
 0x242   : > { %v2731_v37 = vpop.eup %2730  ;;  %v4606_v38 = vadd.f32 %v1381_v12, %v1379_v45  ;;  %1638 = vmatpush1.msra.mxu0 %v4611_v62  ;;  %5356 = vst [vmem:[#allocation56_spill] sm:$0xff] %v4617_v25  ;;  %1715 = vmatpush1.msra.mxu1 %v4617_v25  ;;  %v4623_v12 = vld [vmem:[%s5043_s3 + $0xe8] sm:$0xff]  ;;  %v4629_v45 = vld [vmem:[%s5043_s3 + $0xf8] sm:$0xff] }
 0x243   : > { %v2733_v43 = vpop.eup %2732  ;;  %5357 = vst [vmem:[#allocation36_spill] sm:$0xff] %v4623_v12  ;;  %1639 = vmatprep.subr.mxu0 %v4623_v12  ;;  %1716 = vmatprep.subr.mxu1 %v4629_v45  ;;  %v1382_v25 = vmul.f32 %v2731_v37, %v2729_v58  ;;  %v4643_v12 = vld [vmem:[%s5043_s3 + $0xf0] sm:$0xff]  ;;  %v4649_v58 = vld [vmem:[%s5043_s3 + $0xc8] sm:$0xff] }
 0x244   : > { %2736 = vtanh.f32 %v4606_v38  ;;  %v1380_v0 = vmul.f32 %v2733_v43, %v4002_v27  ;;  %1640 = vmatpush1.msra.mxu0 %v4637_v55  ;;  %5358 = vst [vmem:[#allocation59_spill] sm:$0xff] %v4643_v12  ;;  %1717 = vmatpush1.msra.mxu1 %v4643_v12  ;;  %5359 = vst [vmem:[#allocation38_spill] sm:$0xff] %v4649_v58  ;;  %v4655_v27 = vld [vmem:[%s5043_s3 + $0xd8] sm:$0xff]  ;;  %v4661_v43 = vld [vmem:[%s5043_s3 + $0xc0] sm:$0xff] }
 0x245   : > { %1641 = vmatprep.subr.mxu0 %v4649_v58  ;;  %5360 = vst [vmem:[#allocation61_spill] sm:$0xff] %v4655_v27  ;;  %1718 = vmatprep.subr.mxu1 %v4655_v27  ;;  %5361 = vst [vmem:[#allocation39_spill] sm:$0xff] %v4661_v43  ;;  %v4667_v37 = vld [vmem:[%s5043_s3 + $0xd0] sm:$0xff]  ;;  %2738 = vrcp.f32 %v1374_v6  ;;  %v4675_v27 = vld [vmem:[%s5043_s3 + $0xa8] sm:$0xff] }
 0x246   : > { %1642 = vmatpush1.msra.mxu0 %v4661_v43  ;;  %5362 = vst [vmem:[#allocation41_spill] sm:$0xff] %v4667_v37  ;;  %1719 = vmatpush1.msra.mxu1 %v4667_v37  ;;  %v4670_v58 = vadd.f32 %v1382_v25, %v1380_v0  ;;  %5363 = vst [vmem:[#allocation64_spill] sm:$0xff] %v4675_v27  ;;  %v4681_v43 = vld [vmem:[%s5043_s3 + $0xb8] sm:$0xff]  ;;  %v4687_v25 = vld [vmem:[%s5043_s3 + $0xa0] sm:$0xff] }
 0x247   : > { %1643 = vmatprep.subr.mxu0 %v4675_v27  ;;  %5364 = vst [vmem:[#allocation43_spill] sm:$0xff] %v4681_v43  ;;  %1720 = vmatprep.subr.mxu1 %v4681_v43  ;;  %5365 = vst [vmem:[#allocation45_spill] sm:$0xff] %v4687_v25  ;;  %v4693_v6 = vld [vmem:[%s5043_s3 + $0xb0] sm:$0xff]  ;;  %v4700_v0 = vld [vmem:[%s5043_s3 + $0x88] sm:$0xff] }
 0x248   : > { %1644 = vmatpush1.msra.mxu0 %v4687_v25  ;;  %5366 = vst [vmem:[#allocation66_spill] sm:$0xff] %v4693_v6  ;;  %1721 = vmatpush1.msra.mxu1 %v4693_v6  ;;  %2740 = vtanh.f32 %v4670_v58  ;;  %5367 = vst [vmem:[#allocation47_spill] sm:$0xff] %v4700_v0  ;;  %v4706_v25 = vld [vmem:[%s5043_s3 + $0x98] sm:$0xff]  ;;  %v4712_v6 = vld [vmem:[%s5043_s3 + $0x80] sm:$0xff] }
 0x249   : > { %1645 = vmatprep.subr.mxu0 %v4700_v0  ;;  %5368 = vst [vmem:[#allocation67_spill] sm:$0xff] %v4706_v25  ;;  %1722 = vmatprep.subr.mxu1 %v4706_v25  ;;  %5369 = vst [vmem:[#allocation49_spill] sm:$0xff] %v4712_v6  ;;  %v4718_v43 = vld [vmem:[%s5043_s3 + $0x90] sm:$0xff]  ;;  %v4724_v0 = vld [vmem:[%s5043_s3 + $0x68] sm:$0xff] }
 0x24a   : > { %1646 = vmatpush1.msra.mxu0 %v4712_v6  ;;  %5370 = vst [vmem:[#allocation68_spill] sm:$0xff] %v4718_v43  ;;  %1723 = vmatpush1.msra.mxu1 %v4718_v43  ;;  %5371 = vst [vmem:[#allocation51_spill] sm:$0xff] %v4724_v0  ;;  %v4730_v25 = vld [vmem:[%s5043_s3 + $0x78] sm:$0xff]  ;;  %v4736_v6 = vld [vmem:[%s5043_s3 + $0x60] sm:$0xff] }
 0x24b   : > { %1647 = vmatprep.subr.mxu0 %v4724_v0  ;;  %5372 = vst [vmem:[#allocation69_spill] sm:$0xff] %v4730_v25  ;;  %1724 = vmatprep.subr.mxu1 %v4730_v25  ;;  %5373 = vst [vmem:[#allocation53_spill] sm:$0xff] %v4736_v6  ;;  %v4742_v43 = vld [vmem:[%s5043_s3 + $0x70] sm:$0xff]  ;;  %v4748_v0 = vld [vmem:[%s5043_s3 + $0x48] sm:$0xff] }
 0x24c   : > { %1648 = vmatpush1.msra.mxu0 %v4736_v6  ;;  %5374 = vst [vmem:[#allocation55_spill] sm:$0xff] %v4742_v43  ;;  %1725 = vmatpush1.msra.mxu1 %v4742_v43  ;;  %5375 = vst [vmem:[#allocation70_spill] sm:$0xff] %v4748_v0  ;;  %v4754_v25 = vld [vmem:[%s5043_s3 + $0x58] sm:$0xff]  ;;  %v4760_v6 = vld [vmem:[%s5043_s3 + $0x40] sm:$0xff] }
 0x24d   : > { %1649 = vmatprep.subr.mxu0 %v4748_v0  ;;  %5376 = vst [vmem:[#allocation57_spill] sm:$0xff] %v4754_v25  ;;  %1726 = vmatprep.subr.mxu1 %v4754_v25  ;;  %5377 = vst [vmem:[#allocation58_spill] sm:$0xff] %v4760_v6  ;;  %v4766_v43 = vld [vmem:[%s5043_s3 + $0x50] sm:$0xff]  ;;  %v4772_v0 = vld [vmem:[%s5043_s3 + $0x28] sm:$0xff] }
 0x24e   : > { %1650 = vmatpush1.msra.mxu0 %v4760_v6  ;;  %5378 = vst [vmem:[#allocation60_spill] sm:$0xff] %v4766_v43  ;;  %1727 = vmatpush1.msra.mxu1 %v4766_v43  ;;  %5379 = vst [vmem:[#allocation62_spill] sm:$0xff] %v4772_v0  ;;  %v4778_v25 = vld [vmem:[%s5043_s3 + $0x38] sm:$0xff]  ;;  %v2735_v6 = vpop.eup %2734  ;;  %v4784_v27 = vld [vmem:[%s5043_s3 + $0x20] sm:$0xff] }
 0x24f   : > { %1651 = vmatprep.subr.mxu0 %v4772_v0  ;;  %5380 = vst [vmem:[#allocation63_spill] sm:$0xff] %v4778_v25  ;;  %1728 = vmatprep.subr.mxu1 %v4778_v25  ;;  %5381 = vst [vmem:[#allocation65_spill] sm:$0xff] %v4784_v27  ;;  %v4790_v0 = vld [vmem:[%s5043_s3 + $0x30] sm:$0xff]  ;;  %v4796_v25 = vld [vmem:[%s5043_s3 + $0x8] sm:$0xff] }
 0x250   : > { %1652 = vmatpush1.msra.mxu0 %v4784_v27  ;;  %5382 = vst [vmem:[#allocation71_spill] sm:$0xff] %v4790_v0  ;;  %1729 = vmatpush1.msra.mxu1 %v4790_v0  ;;  %5383 = vst [vmem:[#allocation72_spill] sm:$0xff] %v4796_v25  ;;  %v4802_v27 = vld [vmem:[%s5043_s3 + $0x18] sm:$0xff]  ;;  %v4808_v37 = vld [vmem:[%s5043_s3] sm:$0xff] }
 0x251   : > { %v2737_v43 = vpop.eup %2736  ;;  %1653 = vmatprep.subr.mxu0 %v4796_v25  ;;  %5384 = vst [vmem:[#allocation73_spill] sm:$0xff] %v4802_v27  ;;  %1730 = vmatprep.subr.mxu1 %v4802_v27  ;;  %v4815_v25 = vld [vmem:[%s5043_s3 + $0x10] sm:$0xff] }
 0x252   : > { %1654 = vmatpush1.msra.mxu0 %v4808_v37  ;;  %1687 = vmatprep.mubr.f32.mxu0 %v5199_v60  ;;  %v1387_v0 = vmul.f32 %v2737_v43, %v2735_v6  ;;  %v2739_v27 = vpop.eup %2738  ;;  %v2531_v6 = vld [vmem:[%s3075_s29 + $0x98] sm:$0xff] }
 0x253   : > { %1731 = vmatpush1.msra.mxu1 %v4815_v25  ;;  %1764 = vmatprep.mubr.f32.mxu1 %v5199_v60 }
 0x254   : > { %2526 = vst [vmem:[%s3090_s15 + $0x20] sm:$0xff] %v1387_v0  ;;  %1688 = vmatmul.mubr.f32.vlgmr.msra.gmra.mxu0 %v1387_v0  ;;  %1765 = vmatmul.mubr.f32.vlgmr.msra.gmra.mxu1 %v1387_v0 }
 0x255   : > { %v2741_v12 = vpop.eup %2740  ;;  %1693 = vmatprep.mubr.f32.mxu0 %v5199_v60  ;;  %1770 = vmatprep.mubr.f32.mxu1 %v5199_v60 }
 0x256   : > { %v1388_v43 = vmul.f32 %v2741_v12, %v2739_v27  ;;  %1845 = vmatprep.subr.mxu0 %v4044_v59  ;;  %1922 = vmatprep.subr.mxu1 %v4050_v1  ;;  %v5385_v59 = vld [vmem:[#allocation6_spill] sm:$0xff]  ;;  %v5386_v1 = vld [vmem:[#allocation8_spill] sm:$0xff] }
 0x257   : > { %1846 = vmatpush1.msra.mxu0 %v4056_v2  ;;  %1923 = vmatpush1.msra.mxu1 %v4062_v48  ;;  %v5387_v2 = vld [vmem:[#allocation7_spill] sm:$0xff]  ;;  %v5388_v48 = vld [vmem:[#allocation10_spill] sm:$0xff] }
 0x258   : > { %2527 = vst [vmem:[%s3090_s15 + $0x28] sm:$0xff] %v1388_v43  ;;  %1694 = vmatmul.mubr.f32.gmra.mxu0 %v1388_v43  ;;  %1771 = vmatmul.mubr.f32.gmra.mxu1 %v1388_v43  ;;  %v2532_v27 = vld [vmem:[%s3075_s29 + $0xa0] sm:$0xff] }
 0x259   : > { %1847 = vmatprep.subr.mxu0 %v4068_v49  ;;  %1924 = vmatprep.subr.mxu1 %v4074_v50  ;;  %v5389_v49 = vld [vmem:[#allocation9_spill] sm:$0xff]  ;;  %v5390_v50 = vld [vmem:[#allocation12_spill] sm:$0xff] }
 0x25a   : > { %1848 = vmatpush1.msra.mxu0 %v4080_v51  ;;  %1925 = vmatpush1.msra.mxu1 %v4086_v52  ;;  %v5391_v51 = vld [vmem:[#allocation11_spill] sm:$0xff]  ;;  %v5392_v52 = vld [vmem:[#allocation16_spill] sm:$0xff] }
 0x25b   : > { %1849 = vmatprep.subr.mxu0 %v4092_v54  ;;  %1926 = vmatprep.subr.mxu1 %v4098_v57  ;;  %v5393_v54 = vld [vmem:[#allocation18_spill] sm:$0xff]  ;;  %v5394_v57 = vld [vmem:[#allocation13_spill] sm:$0xff] }
 0x25c   : > { %1850 = vmatpush1.msra.mxu0 %v4104_v61  ;;  %1927 = vmatpush1.msra.mxu1 %v4110_v3  ;;  %v5395_v61 = vld [vmem:[#allocation22_spill] sm:$0xff]  ;;  %v5396_v3 = vld [vmem:[#allocation24_spill] sm:$0xff] }
 0x25d   : > { %1851 = vmatprep.subr.mxu0 %v4116_v4  ;;  %1928 = vmatprep.subr.mxu1 %v4122_v7  ;;  %v5397_v4 = vld [vmem:[#allocation26_spill] sm:$0xff] }
 0x25e   : > { %1852 = vmatpush1.msra.mxu0 %v4128_v8  ;;  %1929 = vmatpush1.msra.mxu1 %v4134_v9  ;;  %v5398_v7 = vld [vmem:[#allocation14_spill] sm:$0xff]  ;;  %v5399_v8 = vld [vmem:[#allocation15_spill] sm:$0xff] }
 0x25f   : > { %1853 = vmatprep.subr.mxu0 %v4140_v10  ;;  %1930 = vmatprep.subr.mxu1 %v4146_v13  ;;  %v5400_v9 = vld [vmem:[#allocation30_spill] sm:$0xff]  ;;  %v5401_v10 = vld [vmem:[#allocation17_spill] sm:$0xff]  ;;  %v5402_v13 = vld [vmem:[#allocation32_spill] sm:$0xff] }
 0x260   : > { %1854 = vmatpush1.msra.mxu0 %v4152_v17  ;;  %1931 = vmatpush1.msra.mxu1 %v4158_v18  ;;  %v2992_v17 = vld [vmem:[%s5042_s2 + $0x50] sm:$0xff]  ;;  %v5403_v18 = vld [vmem:[#allocation19_spill] sm:$0xff] }
 0x261   : > { %1855 = vmatprep.subr.mxu0 %v4164_v19  ;;  %1932 = vmatprep.subr.mxu1 %v4170_v20  ;;  %v2993_v19 = vld [vmem:[%s5042_s2 + $0x38] sm:$0xff]  ;;  %v5404_v20 = vld [vmem:[#allocation34_spill] sm:$0xff] }
 0x262   : > { %1856 = vmatpush1.msra.mxu0 %v4176_v21  ;;  %1933 = vmatpush1.msra.mxu1 %v4182_v22  ;;  %v2994_v21 = vld [vmem:[%s5042_s2 + $0x30] sm:$0xff] }
 0x263   : > { %1857 = vmatprep.subr.mxu0 %v4188_v23  ;;  %1934 = vmatprep.subr.mxu1 %v4194_v24  ;;  %v5405_v22 = vld [vmem:[#allocation20_spill] sm:$0xff]  ;;  %v2995_v23 = vld [vmem:[%s5042_s2 + $0x18] sm:$0xff] }
 0x264   : > { %1858 = vmatpush1.msra.mxu0 %v4200_v26  ;;  %1935 = vmatpush1.msra.mxu1 %v4206_v28  ;;  %v5406_v24 = vld [vmem:[#allocation37_spill] sm:$0xff]  ;;  %v2996_v26 = vld [vmem:[%s5042_s2 + $0x10] sm:$0xff] }
 0x265   : > { %1859 = vmatprep.subr.mxu0 %v4212_v56  ;;  %1936 = vmatprep.subr.mxu1 %v4218_v29  ;;  %v5407_v28 = vld [vmem:[#allocation21_spill] sm:$0xff]  ;;  %v2528_v29 = vld [vmem:[%s3075_s29 + $0x80] sm:$0xff] }
 0x266   : > { %1860 = vmatpush1.msra.mxu0 %v4224_v30  ;;  %1937 = vmatpush1.msra.mxu1 %v4230_v31  ;;  %v2997_v56 = vld [vmem:[%s5043_s3 + $0x1f8] sm:$0xff]  ;;  %v2529_v31 = vld [vmem:[%s3075_s29 + $0x88] sm:$0xff] }
 0x267   : > { %1861 = vmatprep.subr.mxu0 %v4236_v5  ;;  %1938 = vmatprep.subr.mxu1 %v4242_v32 }
 0x268   : > { %1862 = vmatpush1.msra.mxu0 %v4248_v33  ;;  %1939 = vmatpush1.msra.mxu1 %v4254_v35 }
 0x269   : > { %1863 = vmatprep.subr.mxu0 %v4260_v36  ;;  %1940 = vmatprep.subr.mxu1 %v5385_v59  ;;  %v2533_v59 = vld [vmem:[%s3075_s29 + $0xa8] sm:$0xff] }
 0x26a   : > { %1864 = vmatpush1.msra.mxu0 %v5386_v1  ;;  %1941 = vmatpush1.msra.mxu1 %v5387_v2 }
 0x26b   : > { %1865 = vmatprep.subr.mxu0 %v5388_v48  ;;  %1942 = vmatprep.subr.mxu1 %v5389_v49 }
 0x26c   : > { %1866 = vmatpush1.msra.mxu0 %v5390_v50  ;;  %1943 = vmatpush1.msra.mxu1 %v5391_v51 }
 0x26d   : > { %1867 = vmatprep.subr.mxu0 %v5392_v52  ;;  %1944 = vmatprep.subr.mxu1 %v5393_v54  ;;  %v2530_v54 = vld [vmem:[%s3075_s29 + $0x90] sm:$0xff] }
 0x26e   : > { %1868 = vmatpush1.msra.mxu0 %v5394_v57  ;;  %1945 = vmatpush1.msra.mxu1 %v5395_v61  ;;  %v2535_v61 = vld [vmem:[%s3075_s29 + $0xb8] sm:$0xff] }
 0x26f   : > { %1869 = vmatprep.subr.mxu0 %v5396_v3  ;;  %1946 = vmatprep.subr.mxu1 %v5397_v4 }
 0x270   : > { %1870 = vmatpush1.msra.mxu0 %v5398_v7  ;;  %1947 = vmatpush1.msra.mxu1 %v5399_v8 }
 0x271   : > { %1871 = vmatprep.subr.mxu0 %v5400_v9  ;;  %1948 = vmatprep.subr.mxu1 %v5401_v10 }
 0x272   : > { %1872 = vmatpush1.msra.mxu0 %v5402_v13  ;;  %1949 = vmatpush1.msra.mxu1 %v2992_v17  ;;  %v2534_v17 = vld [vmem:[%s3075_s29 + $0xb0] sm:$0xff] }
 0x273   : > { %1873 = vmatprep.subr.mxu0 %v5403_v18  ;;  %1950 = vmatprep.subr.mxu1 %v2993_v19 }
 0x274   : > { %1874 = vmatpush1.msra.mxu0 %v5404_v20  ;;  %1951 = vmatpush1.msra.mxu1 %v2994_v21 }
 0x275   : > { %1875 = vmatprep.subr.mxu0 %v5405_v22  ;;  %1952 = vmatprep.subr.mxu1 %v2995_v23 }
 0x276   : > { %1876 = vmatpush1.msra.mxu0 %v5406_v24  ;;  %1909 = vmatprep.mubr.f32.mxu0 %v5199_v60 }
 0x277   : > { %1953 = vmatpush1.msra.mxu1 %v2996_v26  ;;  %1986 = vmatprep.mubr.f32.mxu1 %v5199_v60  ;;  %v2544_v26 = vld [vmem:[%s3080_s8 + $0x40] sm:$0xff] }
 0x278   : > { %2066 = vmatprep.subr.mxu0 %v5407_v28  ;;  %2143 = vmatprep.subr.mxu1 %v2997_v56 }
 0x2f1   : > { %v1467_v30 = vpop.f32.mrf.mxu0  ;;  %v1544_v36 = vpop.f32.mrf.mxu1 }
 0x2f2   : > { %v1555_v5 = vadd.f32 %v2528_v29, %v1467_v30  ;;  %v1557_v7 = vadd.f32 %v2530_v54, %v1544_v36 }
 0x2f3   : > { %v1469_v32 = vpop.f32.mrf.mxu0  ;;  %v1546_v0 = vpop.f32.mrf.mxu1 }
 0x2f4   : > { %v2536_v33 = vmul.f32 -1.442695, %v1555_v5  ;;  %v1556_v35 = vadd.f32 %v2529_v31, %v1469_v32  ;;  %v1558_v48 = vadd.f32 %v2531_v6, %v1546_v0  ;;  %v2545_v31 = vld [vmem:[%s3080_s8 + $0x48] sm:$0xff] }
 0x2f6   : > { %2742 = vpow2.f32 %v2536_v33  ;;  %v2538_v12 = vmul.f32 -1.442695, %v1556_v35  ;;  %v2540_v57 = vmul.f32 -1.442695, %v1558_v48 }
 0x2f8   : > { %2744 = vpow2.f32 %v2538_v12 }
 0x2f9   : > { %v1473_v43 = vpop.f32.mrf.mxu0  ;;  %v1550_v51 = vpop.f32.mrf.mxu1 }
 0x2fa   : > { %v1559_v1 = vadd.f32 %v2532_v27, %v1473_v43  ;;  %v1561_v20 = vadd.f32 %v2534_v17, %v1550_v51  ;;  %v2548_v27 = vld [vmem:[%s3080_s8 + $0x60] sm:$0xff] }
 0x2fb   : > { %v1475_v2 = vpop.f32.mrf.mxu0  ;;  %v1552_v3 = vpop.f32.mrf.mxu1 }
 0x2fc   : > { %v2537_v49 = vmul.f32 -1.442695, %v1559_v1  ;;  %v1560_v50 = vadd.f32 %v2533_v59, %v1475_v2  ;;  %v1562_v10 = vadd.f32 %v2535_v61, %v1552_v3  ;;  %v2549_v1 = vld [vmem:[%s3080_s8 + $0x68] sm:$0xff] }
 0x2fe   : > { %2746 = vpow2.f32 %v2537_v49  ;;  %v2539_v52 = vmul.f32 -1.442695, %v1560_v50  ;;  %v2541_v18 = vmul.f32 -1.442695, %v1562_v10 }
 0x300   : > { %2748 = vpow2.f32 %v2539_v52 }
 0x301   : > { %2750 = vpow2.f32 %v2540_v57 }
 0x303   : > { %v2743_v4 = vpop.eup %2742 }
 0x304   : > { %v1569_v8 = vadd.f32 1.0, %v2743_v4  ;;  %v2547_v4 = vld [vmem:[%s3080_s8 + $0x58] sm:$0xff] }
 0x305   : > { %v2745_v9 = vpop.eup %2744 }
 0x306   : > { %2752 = vrcp.f32 %v1569_v8  ;;  %v1581_v13 = vadd.f32 1.0, %v2745_v9 }
 0x307   : > { %2754 = vtanh.f32 %v1557_v7 }
 0x308   : > { %2756 = vrcp.f32 %v1581_v13 }
 0x309   : > { %2758 = vpow2.f32 %v2541_v18  ;;  %v2551_v18 = vld [vmem:[%s3080_s8 + $0x78] sm:$0xff] }
 0x30b   : > { %v2747_v19 = vpop.eup %2746 }
 0x30c   : > { %v1570_v21 = vadd.f32 1.0, %v2747_v19 }
 0x30d   : > { %v2749_v22 = vpop.eup %2748 }
 0x30e   : > { %2760 = vrcp.f32 %v1570_v21  ;;  %v1582_v23 = vadd.f32 1.0, %v2749_v22  ;;  %v2751_v24 = vpop.eup %2750 }
 0x30f   : > { %2762 = vtanh.f32 %v1561_v20  ;;  %v1595_v29 = vadd.f32 1.0, %v2751_v24  ;;  %v2546_v20 = vld [vmem:[%s3080_s8 + $0x50] sm:$0xff] }
 0x310   : > { %2764 = vrcp.f32 %v1582_v23 }
 0x311   : > { %2766 = vrcp.f32 %v1595_v29 }
 0x313   : > { %v2753_v28 = vpop.eup %2752 }
 0x314   : > { %v2755_v56 = vpop.eup %2754  ;;  %v1689_v30 = vpop.f32.mrf.mxu0 }
 0x315   : > { %v2757_v5 = vpop.eup %2756  ;;  %v1777_v32 = vadd.f32 %v2544_v26, %v1689_v30  ;;  %v1766_v33 = vpop.f32.mrf.mxu1  ;;  %v1603_v35 = vmul.f32 %v2755_v56, %v2753_v28 }
 0x316   : > { %v1601_v36 = vmul.f32 %v2757_v5, %v4421_v15  ;;  %v1691_v12 = vpop.f32.mrf.mxu0  ;;  %v2759_v50 = vpop.eup %2758  ;;  %v1779_v26 = vadd.f32 %v2546_v20, %v1766_v33  ;;  %v5427_v20 = vld [vmem:[#allocation38_spill] sm:$0xff] }
 0x317   : > { %v2552_v6 = vmul.f32 -1.442695, %v1777_v32  ;;  %v1778_v0 = vadd.f32 %v2545_v31, %v1691_v12  ;;  %v1768_v48 = vpop.f32.mrf.mxu1  ;;  %v1596_v3 = vadd.f32 1.0, %v2759_v50  ;;  %v5419_v50 = vld [vmem:[#allocation31_spill] sm:$0xff] }
 0x318   : > { %v4915_v43 = vadd.f32 %v1603_v35, %v1601_v36  ;;  %v1695_v59 = vpop.f32.mrf.mxu0  ;;  %v1780_v13 = vadd.f32 %v2547_v4, %v1768_v48  ;;  %v5423_v4 = vld [vmem:[#allocation35_spill] sm:$0xff] }
 0x319   : > { %2768 = vpow2.f32 %v2552_v6  ;;  %v2554_v2 = vmul.f32 -1.442695, %v1778_v0  ;;  %v1781_v49 = vadd.f32 %v2548_v27, %v1695_v59  ;;  %v1772_v7 = vpop.f32.mrf.mxu1  ;;  %v5413_v6 = vld [vmem:[#allocation27_spill] sm:$0xff]  ;;  %v5416_v0 = vld [vmem:[#allocation48_spill] sm:$0xff] }
 0x31a   : > { %2770 = vtanh.f32 %v4915_v43  ;;  %v1697_v51 = vpop.f32.mrf.mxu0  ;;  %v2556_v21 = vmul.f32 -1.442695, %v1780_v13 }
 0x31b   : > { %v2761_v52 = vpop.eup %2760  ;;  %2772 = vpow2.f32 %v2554_v2  ;;  %v2553_v15 = vmul.f32 -1.442695, %v1781_v49  ;;  %v1782_v54 = vadd.f32 %v2549_v1, %v1697_v51  ;;  %v1774_v19 = vpop.f32.mrf.mxu1  ;;  %v5417_v1 = vld [vmem:[#allocation29_spill] sm:$0xff]  ;;  %v5418_v2 = vld [vmem:[#allocation50_spill] sm:$0xff] }
 0x31c   : > { %v2763_v57 = vpop.eup %2762  ;;  %v1784_v22 = vadd.f32 %v2551_v18, %v1774_v19  ;;  %v5426_v19 = vld [vmem:[#allocation59_spill] sm:$0xff] }
 0x31d   : > { %v2765_v61 = vpop.eup %2764  ;;  %2774 = vpow2.f32 %v2553_v15  ;;  %v2555_v8 = vmul.f32 -1.442695, %v1782_v54  ;;  %v1604_v9 = vmul.f32 %v2763_v57, %v2761_v52  ;;  %v5420_v54 = vld [vmem:[#allocation52_spill] sm:$0xff]  ;;  %v5421_v57 = vld [vmem:[#allocation33_spill] sm:$0xff] }
 0x31e   : > { %v1602_v10 = vmul.f32 %v2765_v61, %v4427_v53  ;;  %v2767_v23 = vpop.eup %2766  ;;  %v2550_v53 = vld [vmem:[%s3080_s8 + $0x70] sm:$0xff]  ;;  %v2557_v30 = vmul.f32 -1.442695, %v1784_v22  ;;  %v5430_v22 = vld [vmem:[#allocation41_spill] sm:$0xff] }
 0x31f   : > { %2776 = vpow2.f32 %v2555_v8  ;;  %v1783_v35 = vadd.f32 %v2550_v53, %v1772_v7  ;;  %v5438_v53 = vld [vmem:[#allocation68_spill] sm:$0xff] }
 0x320   : > { %v4921_v17 = vadd.f32 %v1604_v9, %v1602_v10  ;;  %2778 = vrcp.f32 %v1596_v3  ;;  %v5422_v3 = vld [vmem:[#allocation54_spill] sm:$0xff]  ;;  %v5424_v9 = vld [vmem:[#allocation56_spill] sm:$0xff] }
 0x322   : > { %2780 = vtanh.f32 %v4921_v17 }
 0x323   : > { %2782 = vpow2.f32 %v2556_v21  ;;  %v5429_v21 = vld [vmem:[#allocation39_spill] sm:$0xff] }
 0x326   : > { %v2769_v24 = vpop.eup %2768 }
 0x327   : > { %v2771_v28 = vpop.eup %2770  ;;  %v1791_v56 = vadd.f32 1.0, %v2769_v24  ;;  %v5432_v24 = vld [vmem:[#allocation43_spill] sm:$0xff] }
 0x328   : > { %v2773_v29 = vpop.eup %2772  ;;  %v1609_v31 = vmul.f32 %v2771_v28, %v2767_v23  ;;  %v5436_v28 = vld [vmem:[#allocation67_spill] sm:$0xff] }
 0x329   : > { %2784 = vrcp.f32 %v1791_v56  ;;  %v1803_v5 = vadd.f32 1.0, %v2773_v29  ;;  %v5437_v56 = vld [vmem:[#allocation49_spill] sm:$0xff]  ;;  %v5439_v29 = vld [vmem:[#allocation51_spill] sm:$0xff] }
 0x32a   : > { %v2775_v32 = vpop.eup %2774  ;;  %2786 = vtanh.f32 %v1779_v26  ;;  %2542 = vst [vmem:[%s3085_s11 + $0x20] sm:$0xff] %v1609_v31  ;;  %1910 = vmatmul.mubr.f32.vlgmr.msra.gmra.mxu0 %v1609_v31  ;;  %1987 = vmatmul.mubr.f32.vlgmr.msra.gmra.mxu1 %v1609_v31  ;;  %v5435_v26 = vld [vmem:[#allocation47_spill] sm:$0xff]  ;;  %v5441_v31 = vld [vmem:[#allocation53_spill] sm:$0xff] }
 0x32b   : > { %2788 = vrcp.f32 %v1803_v5  ;;  %v1792_v36 = vadd.f32 1.0, %v2775_v32  ;;  %2067 = vmatpush1.msra.mxu0 %v4437_v44  ;;  %2144 = vmatpush1.msra.mxu1 %v4443_v47  ;;  %v5442_v5 = vld [vmem:[#allocation55_spill] sm:$0xff]  ;;  %v5443_v32 = vld [vmem:[#allocation70_spill] sm:$0xff] }
 0x32c   : > { %v2777_v33 = vpop.eup %2776  ;;  %2790 = vpow2.f32 %v2557_v30  ;;  %2068 = vmatprep.subr.mxu0 %v4449_v40  ;;  %2145 = vmatprep.subr.mxu1 %v4455_v41  ;;  %v5408_v40 = vld [vmem:[#allocation40_spill] sm:$0xff]  ;;  %v5409_v41 = vld [vmem:[#allocation23_spill] sm:$0xff]  ;;  %v5440_v30 = vld [vmem:[#allocation69_spill] sm:$0xff] }
 0x32d   : > { %2792 = vrcp.f32 %v1792_v36  ;;  %v1804_v12 = vadd.f32 1.0, %v2777_v33  ;;  %1915 = vmatprep.mubr.f32.mxu0 %v5199_v60  ;;  %1992 = vmatprep.mubr.f32.mxu1 %v5199_v60  ;;  %v2779_v27 = vpop.eup %2778  ;;  %v5445_v36 = vld [vmem:[#allocation58_spill] sm:$0xff]  ;;  %v5446_v33 = vld [vmem:[#allocation60_spill] sm:$0xff] }
 0x32e   : > { %2794 = vtanh.f32 %v1783_v35  ;;  %2069 = vmatpush1.msra.mxu0 %v4463_v63  ;;  %2146 = vmatpush1.msra.mxu1 %v4469_v46  ;;  %v5410_v63 = vld [vmem:[#allocation42_spill] sm:$0xff]  ;;  %v5411_v46 = vld [vmem:[#allocation25_spill] sm:$0xff] }
 0x32f   : > { %v2781_v44 = vpop.eup %2780  ;;  %2796 = vrcp.f32 %v1804_v12  ;;  %2070 = vmatprep.subr.mxu0 %v4475_v16  ;;  %2147 = vmatprep.subr.mxu1 %v4481_v39  ;;  %v5412_v16 = vld [vmem:[#allocation44_spill] sm:$0xff]  ;;  %v5444_v35 = vld [vmem:[#allocation57_spill] sm:$0xff]  ;;  %v5447_v12 = vld [vmem:[#allocation62_spill] sm:$0xff] }
 0x330   : > { %v1610_v47 = vmul.f32 %v2781_v44, %v2779_v27  ;;  %2071 = vmatpush1.msra.mxu0 %v4487_v11  ;;  %2148 = vmatpush1.msra.mxu1 %v4493_v34  ;;  %v2783_v39 = vpop.eup %2782  ;;  %v5414_v11 = vld [vmem:[#allocation46_spill] sm:$0xff]  ;;  %v5448_v27 = vld [vmem:[#allocation63_spill] sm:$0xff] }
 0x331   : > { %2072 = vmatprep.subr.mxu0 %v4499_v14  ;;  %2149 = vmatprep.subr.mxu1 %v5408_v40  ;;  %v5415_v14 = vld [vmem:[#allocation28_spill] sm:$0xff]  ;;  %v1817_v49 = vadd.f32 1.0, %v2783_v39  ;;  %v5450_v40 = vld [vmem:[#allocation71_spill] sm:$0xff] }
 0x332   : > { %2543 = vst [vmem:[%s3085_s11 + $0x28] sm:$0xff] %v1610_v47  ;;  %1916 = vmatmul.mubr.f32.gmra.mxu0 %v1610_v47  ;;  %1993 = vmatmul.mubr.f32.gmra.mxu1 %v1610_v47  ;;  %v5449_v47 = vld [vmem:[#allocation65_spill] sm:$0xff] }
 0x333   : > { %2073 = vmatpush1.msra.mxu0 %v5409_v41  ;;  %2150 = vmatpush1.msra.mxu1 %v5410_v63  ;;  %2798 = vrcp.f32 %v1817_v49  ;;  %v5451_v63 = vld [vmem:[#allocation72_spill] sm:$0xff]  ;;  %v2564_v49 = vld [vmem:[%s3075_s29 + $0xe0] sm:$0xff] }
 0x334   : > { %2074 = vmatprep.subr.mxu0 %v5411_v46  ;;  %2151 = vmatprep.subr.mxu1 %v5412_v16  ;;  %v5452_v46 = vld [vmem:[#allocation73_spill] sm:$0xff] }
 0x335   : > { %2075 = vmatpush1.msra.mxu0 %v5413_v6  ;;  %2152 = vmatpush1.msra.mxu1 %v5414_v11  ;;  %v2560_v11 = vld [vmem:[%s3075_s29 + $0xc0] sm:$0xff] }
 0x336   : > { %v2785_v34 = vpop.eup %2784  ;;  %2076 = vmatprep.subr.mxu0 %v5415_v14  ;;  %2153 = vmatprep.subr.mxu1 %v5416_v0 }
 0x337   : > { %v2787_v59 = vpop.eup %2786  ;;  %2077 = vmatpush1.msra.mxu0 %v5417_v1  ;;  %2154 = vmatpush1.msra.mxu1 %v5418_v2 }
 0x338   : > { %v2789_v48 = vpop.eup %2788  ;;  %2078 = vmatprep.subr.mxu0 %v5419_v50  ;;  %2155 = vmatprep.subr.mxu1 %v4578_v42  ;;  %v1825_v52 = vmul.f32 %v2787_v59, %v2785_v34  ;;  %v2561_v34 = vld [vmem:[%s3075_s29 + $0xc8] sm:$0xff] }
 0x339   : > { %v2791_v51 = vpop.eup %2790  ;;  %v1823_v15 = vmul.f32 %v2789_v48, %v4606_v38  ;;  %2079 = vmatpush1.msra.mxu0 %v5420_v54  ;;  %2156 = vmatpush1.msra.mxu1 %v5421_v57  ;;  %v5425_v38 = vld [vmem:[#allocation36_spill] sm:$0xff] }
 0x33a   : > { %v2793_v61 = vpop.eup %2792  ;;  %2080 = vmatprep.subr.mxu0 %v5422_v3  ;;  %2157 = vmatprep.subr.mxu1 %v5423_v4  ;;  %v1818_v10 = vadd.f32 1.0, %v2791_v51 }
 0x33b   : > { %v2795_v7 = vpop.eup %2794  ;;  %v4960_v8 = vadd.f32 %v1825_v52, %v1823_v15  ;;  %2081 = vmatpush1.msra.mxu0 %v4611_v62  ;;  %2158 = vmatpush1.msra.mxu1 %v5424_v9  ;;  %v5428_v62 = vld [vmem:[#allocation61_spill] sm:$0xff]  ;;  %v2565_v52 = vld [vmem:[%s3075_s29 + $0xe8] sm:$0xff]  ;;  %v2562_v9 = vld [vmem:[%s3075_s29 + $0xd0] sm:$0xff] }
 0x33c   : > { %v2797_v42 = vpop.eup %2796  ;;  %2082 = vmatprep.subr.mxu0 %v5425_v38  ;;  %2159 = vmatprep.subr.mxu1 %v4629_v45  ;;  %v1826_v13 = vmul.f32 %v2795_v7, %v2793_v61  ;;  %v5431_v45 = vld [vmem:[#allocation64_spill] sm:$0xff] }
 0x33d   : > { %2800 = vtanh.f32 %v4960_v8  ;;  %v1824_v18 = vmul.f32 %v2797_v42, %v4670_v58  ;;  %2083 = vmatpush1.msra.mxu0 %v4637_v55  ;;  %2160 = vmatpush1.msra.mxu1 %v5426_v19  ;;  %v5433_v58 = vld [vmem:[#allocation45_spill] sm:$0xff]  ;;  %v5434_v55 = vld [vmem:[#allocation66_spill] sm:$0xff] }
 0x33e   : > { %2084 = vmatprep.subr.mxu0 %v5427_v20  ;;  %2161 = vmatprep.subr.mxu1 %v5428_v62  ;;  %2802 = vrcp.f32 %v1818_v10  ;;  %v2567_v10 = vld [vmem:[%s3075_s29 + $0xf8] sm:$0xff] }
 0x33f   : > { %2085 = vmatpush1.msra.mxu0 %v5429_v21  ;;  %2162 = vmatpush1.msra.mxu1 %v5430_v22  ;;  %v4974_v23 = vadd.f32 %v1826_v13, %v1824_v18  ;;  %v2566_v22 = vld [vmem:[%s3075_s29 + $0xf0] sm:$0xff] }
 0x340   : > { %2086 = vmatprep.subr.mxu0 %v5431_v45  ;;  %2163 = vmatprep.subr.mxu1 %v5432_v24  ;;  %v2799_v44 = vpop.eup %2798 }
 0x341   : > { %2087 = vmatpush1.msra.mxu0 %v5433_v58  ;;  %2164 = vmatpush1.msra.mxu1 %v5434_v55  ;;  %2804 = vtanh.f32 %v4974_v23 }
 0x342   : > { %2088 = vmatprep.subr.mxu0 %v5435_v26  ;;  %2165 = vmatprep.subr.mxu1 %v5436_v28 }
 0x343   : > { %2089 = vmatpush1.msra.mxu0 %v5437_v56  ;;  %2166 = vmatpush1.msra.mxu1 %v5438_v53  ;;  %v2058_v53 = vld [vmem:[%s3080_s8] sm:$0xff] }
 0x344   : > { %2090 = vmatprep.subr.mxu0 %v5439_v29  ;;  %2167 = vmatprep.subr.mxu1 %v5440_v30 }
 0x345   : > { %2091 = vmatpush1.msra.mxu0 %v5441_v31  ;;  %2168 = vmatpush1.msra.mxu1 %v5442_v5 }
 0x346   : > { %2092 = vmatprep.subr.mxu0 %v5443_v32  ;;  %2169 = vmatprep.subr.mxu1 %v5444_v35  ;;  %v2059_v32 = vld [vmem:[%s3080_s8 + $0x8] sm:$0xff] }
 0x347   : > { %2093 = vmatpush1.msra.mxu0 %v5445_v36  ;;  %2170 = vmatpush1.msra.mxu1 %v5446_v33 }
 0x348   : > { %2094 = vmatprep.subr.mxu0 %v5447_v12  ;;  %2171 = vmatprep.subr.mxu1 %v5448_v27 }
 0x349   : > { %2095 = vmatpush1.msra.mxu0 %v5449_v47  ;;  %2172 = vmatpush1.msra.mxu1 %v5450_v40  ;;  %v2062_v47 = vld [vmem:[%s3080_s8 + $0x20] sm:$0xff] }
 0x34a   : > { %v2801_v41 = vpop.eup %2800  ;;  %2096 = vmatprep.subr.mxu0 %v5451_v63  ;;  %2173 = vmatprep.subr.mxu1 %v5452_v46 }
 0x34b   : > { %2097 = vmatpush1.msra.mxu0 %v4808_v37  ;;  %2130 = vmatprep.mubr.f32.mxu0 %v5199_v60  ;;  %v1831_v16 = vmul.f32 %v2801_v41, %v2799_v44  ;;  %v2803_v39 = vpop.eup %2802 }
 0x34c   : > { %2174 = vmatpush1.msra.mxu1 %v4815_v25  ;;  %2207 = vmatprep.mubr.f32.mxu1 %v5199_v60 }
 0x34d   : > { %2558 = vst [vmem:[%s3090_s15 + $0x10] sm:$0xff] %v1831_v16  ;;  %2131 = vmatmul.mubr.f32.vlgmr.msra.gmra.mxu0 %v1831_v16  ;;  %2208 = vmatmul.mubr.f32.vlgmr.msra.gmra.mxu1 %v1831_v16  ;;  %v2063_v16 = vld [vmem:[%s3080_s8 + $0x28] sm:$0xff] }
 0x34e   : > { %v2805_v6 = vpop.eup %2804  ;;  %2136 = vmatprep.mubr.f32.mxu0 %v5199_v60  ;;  %2213 = vmatprep.mubr.f32.mxu1 %v5199_v60  ;;  %v2563_v60 = vld [vmem:[%s3075_s29 + $0xd8] sm:$0xff] }
 0x34f   : > { %v1832_v37 = vmul.f32 %v2805_v6, %v2803_v39 }
 0x351   : > { %2559 = vst [vmem:[%s3090_s15 + $0x18] sm:$0xff] %v1832_v37  ;;  %2137 = vmatmul.mubr.f32.gmra.mxu0 %v1832_v37  ;;  %2214 = vmatmul.mubr.f32.gmra.mxu1 %v1832_v37 }
 0x3ea   : > { %v1911_v25 = vpop.f32.mrf.mxu0  ;;  %v1988_v2 = vpop.f32.mrf.mxu1 }
 0x3eb   : > { %v1999_v14 = vadd.f32 %v2560_v11, %v1911_v25  ;;  %v2001_v18 = vadd.f32 %v2562_v9, %v1988_v2  ;;  %v2061_v2 = vld [vmem:[%s3080_s8 + $0x18] sm:$0xff] }
 0x3ec   : > { %v1913_v0 = vpop.f32.mrf.mxu0  ;;  %v1990_v50 = vpop.f32.mrf.mxu1 }
 0x3ed   : > { %v2568_v59 = vmul.f32 -1.442695, %v1999_v14  ;;  %v2000_v1 = vadd.f32 %v2561_v34, %v1913_v0  ;;  %v2002_v57 = vadd.f32 %v2563_v60, %v1990_v50 }
 0x3ef   : > { %2806 = vpow2.f32 %v2568_v59  ;;  %v2570_v48 = vmul.f32 -1.442695, %v2000_v1  ;;  %v2572_v42 = vmul.f32 -1.442695, %v2002_v57  ;;  %v2060_v57 = vld [vmem:[%s3080_s8 + $0x10] sm:$0xff] }
 0x3f1   : > { %2808 = vpow2.f32 %v2570_v48 }
 0x3f2   : > { %v1917_v51 = vpop.f32.mrf.mxu0  ;;  %v1994_v4 = vpop.f32.mrf.mxu1 }
 0x3f3   : > { %v2003_v15 = vadd.f32 %v2564_v49, %v1917_v51  ;;  %v2005_v58 = vadd.f32 %v2566_v22, %v1994_v4 }
 0x3f4   : > { %v1919_v54 = vpop.f32.mrf.mxu0  ;;  %v1996_v38 = vpop.f32.mrf.mxu1 }
 0x3f5   : > { %v2569_v61 = vmul.f32 -1.442695, %v2003_v15  ;;  %v2004_v3 = vadd.f32 %v2565_v52, %v1919_v54  ;;  %v2006_v62 = vadd.f32 %v2567_v10, %v1996_v38  ;;  %v2065_v15 = vld [vmem:[%s3080_s8 + $0x38] sm:$0xff]  ;;  %v2064_v38 = vld [vmem:[%s3080_s8 + $0x30] sm:$0xff] }
 0x3f7   : > { %2810 = vpow2.f32 %v2569_v61  ;;  %v2571_v7 = vmul.f32 -1.442695, %v2004_v3  ;;  %v2573_v45 = vmul.f32 -1.442695, %v2006_v62 }
 0x3f9   : > { %2812 = vpow2.f32 %v2571_v7 }
 0x3fa   : > { %2814 = vpow2.f32 %v2572_v42 }
 0x3fc   : > { %v2807_v13 = vpop.eup %2806 }
 0x3fd   : > { %v2013_v19 = vadd.f32 1.0, %v2807_v13 }
 0x3fe   : > { %v2809_v20 = vpop.eup %2808 }
 0x3ff   : > { %2816 = vrcp.f32 %v2013_v19  ;;  %v2025_v21 = vadd.f32 1.0, %v2809_v20 }
 0x400   : > { %2818 = vtanh.f32 %v2001_v18 }
 0x401   : > { %2820 = vrcp.f32 %v2025_v21 }
 0x402   : > { %2822 = vpow2.f32 %v2573_v45 }
 0x404   : > { %v2811_v24 = vpop.eup %2810 }
 0x405   : > { %v2014_v55 = vadd.f32 1.0, %v2811_v24 }
 0x406   : > { %v2813_v26 = vpop.eup %2812 }
 0x407   : > { %2824 = vrcp.f32 %v2014_v55  ;;  %v2026_v28 = vadd.f32 1.0, %v2813_v26  ;;  %v2815_v56 = vpop.eup %2814 }
 0x408   : > { %2826 = vtanh.f32 %v2005_v58  ;;  %v2039_v31 = vadd.f32 1.0, %v2815_v56 }
 0x409   : > { %2828 = vrcp.f32 %v2026_v28 }
 0x40a   : > { %2830 = vrcp.f32 %v2039_v31 }
 0x40c   : > { %v2817_v29 = vpop.eup %2816 }
 0x40d   : > { %v2819_v30 = vpop.eup %2818  ;;  %v2132_v5 = vpop.f32.mrf.mxu0 }
 0x40e   : > { %v2821_v35 = vpop.eup %2820  ;;  %v2220_v36 = vadd.f32 %v2132_v5, %v2058_v53  ;;  %v2209_v33 = vpop.f32.mrf.mxu1  ;;  %v2047_v12 = vmul.f32 %v2819_v30, %v2817_v29 }
 0x40f   : > { %v2045_v27 = vmul.f32 %v2821_v35, %v4915_v43  ;;  %v2134_v44 = vpop.f32.mrf.mxu0  ;;  %v2823_v11 = vpop.eup %2822  ;;  %v2222_v9 = vadd.f32 %v2209_v33, %v2060_v57 }
 0x410   : > { %v2576_v40 = vmul.f32 -1.442695, %v2220_v36  ;;  %v2221_v41 = vadd.f32 %v2134_v44, %v2059_v32  ;;  %v2211_v6 = vpop.f32.mrf.mxu1  ;;  %v2040_v1 = vadd.f32 1.0, %v2823_v11 }
 0x411   : > { %v2049_v63 = vadd.f32 %v2047_v12, %v2045_v27  ;;  %v2138_v46 = vpop.f32.mrf.mxu0  ;;  %v2223_v52 = vadd.f32 %v2211_v6, %v2061_v2 }
 0x412   : > { %2832 = vpow2.f32 %v2576_v40  ;;  %v2578_v39 = vmul.f32 -1.442695, %v2221_v41  ;;  %v2224_v37 = vadd.f32 %v2138_v46, %v2062_v47  ;;  %v2215_v48 = vpop.f32.mrf.mxu1 }
 0x413   : > { %2834 = vtanh.f32 %v2049_v63  ;;  %2280 = vst [vmem:[#allocation3 + $0x8] sm:$0xff] %v2049_v63  ;;  %v2140_v25 = vpop.f32.mrf.mxu0  ;;  %v2580_v61 = vmul.f32 -1.442695, %v2223_v52  ;;  %v2226_v62 = vadd.f32 %v2215_v48, %v2064_v38 }
 0x414   : > { %v2825_v34 = vpop.eup %2824  ;;  %2836 = vpow2.f32 %v2578_v39  ;;  %v2577_v43 = vmul.f32 -1.442695, %v2224_v37  ;;  %v2225_v14 = vadd.f32 %v2140_v25, %v2063_v16  ;;  %v2217_v54 = vpop.f32.mrf.mxu1 }
 0x415   : > { %v2827_v0 = vpop.eup %2826  ;;  %v2227_v3 = vadd.f32 %v2217_v54, %v2065_v15 }
 0x416   : > { %v2829_v59 = vpop.eup %2828  ;;  %2838 = vpow2.f32 %v2577_v43  ;;  %v2579_v49 = vmul.f32 -1.442695, %v2225_v14  ;;  %v2048_v60 = vmul.f32 %v2827_v0, %v2825_v34 }
 0x417   : > { %v2046_v50 = vmul.f32 %v2829_v59, %v4921_v17  ;;  %v2831_v4 = vpop.eup %2830  ;;  %v2581_v18 = vmul.f32 -1.442695, %v2227_v3 }
 0x418   : > { %2840 = vpow2.f32 %v2579_v49 }
 0x419   : > { %v2050_v51 = vadd.f32 %v2048_v60, %v2046_v50  ;;  %2842 = vrcp.f32 %v2040_v1 }
 0x41b   : > { %2844 = vtanh.f32 %v2050_v51  ;;  %2281 = vst [vmem:[#allocation3] sm:$0xff] %v2050_v51 }
 0x41c   : > { %2846 = vpow2.f32 %v2580_v61 }
 0x41f   : > { %v2833_v7 = vpop.eup %2832 }
 0x420   : > { %v2835_v42 = vpop.eup %2834  ;;  %v2234_v10 = vadd.f32 1.0, %v2833_v7 }
 0x421   : > { %v2837_v17 = vpop.eup %2836  ;;  %v2053_v13 = vmul.f32 %v2835_v42, %v2831_v4 }
 0x422   : > { %2848 = vrcp.f32 %v2234_v10  ;;  %v2246_v19 = vadd.f32 1.0, %v2837_v17 }
 0x423   : > { %v2839_v20 = vpop.eup %2838  ;;  %2574 = vst [vmem:[%s3085_s11 + $0x30] sm:$0xff] %v2053_v13  ;;  %2278 = vst [vmem:[#allocation2] sm:$0xff] %v2053_v13  ;;  %2850 = vtanh.f32 %v2222_v9 }
 0x424   : > { %2852 = vrcp.f32 %v2246_v19  ;;  %v2235_v21 = vadd.f32 1.0, %v2839_v20 }
 0x425   : > { %v2841_v22 = vpop.eup %2840  ;;  %2854 = vpow2.f32 %v2581_v18 }
 0x426   : > { %2856 = vrcp.f32 %v2235_v21  ;;  %v2247_v45 = vadd.f32 1.0, %v2841_v22  ;;  %v2843_v24 = vpop.eup %2842 }
 0x427   : > { %2858 = vtanh.f32 %v2226_v62 }
 0x428   : > { %v2845_v58 = vpop.eup %2844  ;;  %2860 = vrcp.f32 %v2247_v45 }
 0x429   : > { %v2054_v55 = vmul.f32 %v2845_v58, %v2843_v24  ;;  %v2847_v26 = vpop.eup %2846 }
 0x42a   : > { %v2260_v29 = vadd.f32 1.0, %v2847_v26 }
 0x42b   : > { %2575 = vst [vmem:[%s3085_s11 + $0x38] sm:$0xff] %v2054_v55  ;;  %2279 = vst [vmem:[#allocation2 + $0x8] sm:$0xff] %v2054_v55 }
 0x42c   : > { %2862 = vrcp.f32 %v2260_v29 }
 0x42f   : > { %v2849_v28 = vpop.eup %2848 }
 0x430   : > { %v2851_v56 = vpop.eup %2850 }
 0x431   : > { %v2853_v53 = vpop.eup %2852  ;;  %v2268_v31 = vmul.f32 %v2851_v56, %v2849_v28 }
 0x432   : > { %v2855_v30 = vpop.eup %2854  ;;  %v2266_v5 = vmul.f32 %v2853_v53, %v4960_v8 }
 0x433   : > { %v2857_v32 = vpop.eup %2856  ;;  %v2261_v12 = vadd.f32 1.0, %v2855_v30 }
 0x434   : > { %v2859_v35 = vpop.eup %2858  ;;  %v2270_v36 = vadd.f32 %v2268_v31, %v2266_v5 }
 0x435   : > { %v2861_v33 = vpop.eup %2860  ;;  %v2269_v27 = vmul.f32 %v2859_v35, %v2857_v32 }
 0x436   : > { %2864 = vtanh.f32 %v2270_v36  ;;  %2284 = vst [vmem:[#allocation5] sm:$0xff] %v2270_v36  ;;  %v2267_v44 = vmul.f32 %v2861_v33, %v4974_v23 }
 0x437   : > { %2866 = vrcp.f32 %v2261_v12 }
 0x438   : > { %v2271_v47 = vadd.f32 %v2269_v27, %v2267_v44 }
 0x439   : > { %v2863_v40 = vpop.eup %2862 }
 0x43a   : > { %2868 = vtanh.f32 %v2271_v47  ;;  %2285 = vst [vmem:[#allocation5 + $0x8] sm:$0xff] %v2271_v47 }
 0x443   : > { %v2865_v41 = vpop.eup %2864 }
 0x444   : > { %v2274_v8 = vmul.f32 %v2865_v41, %v2863_v40  ;;  %v2867_v63 = vpop.eup %2866 }
 0x446   : > { %2276 = vst [vmem:[%s3090_s15] sm:$0xff] %v2274_v8  ;;  %2282 = vst [vmem:[#allocation4 + $0x8] sm:$0xff] %v2274_v8 }
 0x447   : > { %v2869_v46 = vpop.eup %2868 }
 0x448   : > { %v2275_v16 = vmul.f32 %v2869_v46, %v2867_v63 }
 0x44a   : > { %2277 = vst [vmem:[%s3090_s15 + $0x8] sm:$0xff] %v2275_v16  ;;  %2283 = vst [vmem:[#allocation4] sm:$0xff] %v2275_v16 }
 0x44b PF: > { %s16_s20 = sadd.s32 1, %s3020_s20   ;;  %s5453_s18 = smov %s3016_s19 }
 0x44c   : > { %p13_p7 = scmp.ge.s32.totalorder %s16_s20, 4   ;;  %s5454_s19 = smov %s5456_s21 }
 0x44e   :  { %15 = sbr.rel (!%p13_p7) target bundleno = 2 (0x2), region = 97 }

</bundles_post_ra>
